<compile_context>
chip_gen: v7x
topology: tpu7x:2x2x1
jax: 0.10.0
libtpu: 0.0.40
codegen_flags: <defaults>
</compile_context>

<pallas_src>
import functools
import math

import jax
import jax.numpy as jnp
from jax import lax
from jax.experimental import pallas as pl
from jax.experimental.pallas import tpu as pltpu


def _round_up(x, m):
    return ((x + m - 1) // m) * m


def _pick_vmem_limit(default=64 * 1024 * 1024):
    # Generation-aware VMEM limit: never request more than ~3/4 of the physical
    # per-core VMEM (v7x has only 64 MiB); keep 64 MiB on v5e/v6e.
    try:
        info = pltpu.get_tpu_info()
        cap = int(getattr(info, "vmem_capacity_bytes", 2 * default))
        if cap > 0:
            return min(default, (cap * 3) // 4)
    except Exception:
        pass
    return default


# ----------------------------------------------------------------------------
# Fused Block kernel: add + LayerNorm + Mamba mixer (one (batch, L-tile) step)
# ----------------------------------------------------------------------------
def _block_mamba_kernel(*refs, eps, has_residual, chunk):
    if has_residual:
        (h_ref, r_ref, nw_ref, nb_ref, w_in_x_ref, w_in_z_ref,
         conv_w_ref, conv_b_ref, w_x_ref, w_dt_ref, b_dt_ref,
         a_log_ref, dpar_ref, w_out_ref,
         hs_out_ref, res_out_ref,
         tail_s, hstate_s, hn_s, dt_s, xact_s, bct_s, y_s) = refs
    else:
        (h_ref, nw_ref, nb_ref, w_in_x_ref, w_in_z_ref,
         conv_w_ref, conv_b_ref, w_x_ref, w_dt_ref, b_dt_ref,
         a_log_ref, dpar_ref, w_out_ref,
         hs_out_ref, res_out_ref,
         tail_s, hstate_s, hn_s, dt_s, xact_s, bct_s, y_s) = refs
        r_ref = None

    lt = pl.program_id(1)                       # L-tile index (sequential, "arbitrary")
    TL = h_ref.shape[1]                         # sequence-tile length
    K = conv_w_ref.shape[0]                     # d_conv
    d_inner = conv_w_ref.shape[1]
    n_state = a_log_ref.shape[0]
    dt_rank = w_dt_ref.shape[0]
    two_n = 2 * n_state
    n_ch = TL // chunk

    # ---- per-sequence carried state reset on the first L tile ----------------
    @pl.when(lt == 0)
    def _():
        tail_s[...] = jnp.zeros_like(tail_s)
        hstate_s[...] = jnp.zeros_like(hstate_s)

    # ---- fused residual-add + LayerNorm (no HBM round trip) ------------------
    x_in = h_ref[0]                                             # (TL, D) f32
    res = x_in + r_ref[0] if has_residual else x_in
    res_out_ref[0] = res
    mean = jnp.mean(res, axis=-1, keepdims=True)
    xc = res - mean
    var = jnp.mean(xc * xc, axis=-1, keepdims=True)
    hnorm = xc * lax.rsqrt(var + eps) * nw_ref[...] + nb_ref[...]
    hn16 = hnorm.astype(jnp.bfloat16)
    hn_s[...] = hn16               # kept for the deferred z matmul (short z live range)

    # ---- in_proj, x branch (bf16 MXU operands, f32 accumulation) -------------
    xx = jnp.dot(hn16, w_in_x_ref[...], preferred_element_type=jnp.float32)

    # ---- causal depthwise conv1d along L with carried tail, then SiLU --------
    # tail_s holds the previous tile's last 8 rows (zeros on the first tile);
    # taps slice the in-register value -> no relayouted VMEM copies.
    full = jnp.concatenate([tail_s[...], xx], axis=0)           # (8 + TL, Di)
    conv = jnp.zeros((TL, d_inner), jnp.float32)
    for k in range(K):
        off = 8 - (K - 1) + k
        conv = conv + full[off:off + TL, :] * conv_w_ref[k:k + 1, :]
    tail_s[...] = xx[TL - 8:TL, :]                              # carry for next tile
    x_act = conv + conv_b_ref[...]
    x_act = x_act * jax.nn.sigmoid(x_act)                       # SiLU, f32
    xact_s[...] = x_act
    xa16 = x_act.astype(jnp.bfloat16)

    # ---- fused x_proj: columns [dt_low | B | C] in a single matmul -----------
    x_dbl = jnp.dot(xa16, w_x_ref[...], preferred_element_type=jnp.float32)   # (TL, R+2N)

    # dt_proj kept in f32 (tiny contraction) for a tighter exp(dt*A) path.
    dt_low = x_dbl[:, 0:dt_rank]
    dt = jnp.dot(dt_low, w_dt_ref[...],
                 preferred_element_type=jnp.float32) + b_dt_ref[...]
    dt = jnp.maximum(dt, 0.0) + jnp.log(1.0 + jnp.exp(-jnp.abs(dt)))  # softplus
    dt_s[...] = dt

    # ---- hoisted [B|C] slice + transpose: one matmul per tile ----------------
    # sel[n, dt_rank + n] = 1  ->  bcT[n, t] = x_dbl[t, dt_rank + n]
    r_iota = lax.broadcasted_iota(jnp.int32, (two_n, dt_rank + two_n), 0)
    c_iota = lax.broadcasted_iota(jnp.int32, (two_n, dt_rank + two_n), 1)
    sel = (c_iota == r_iota + dt_rank).astype(jnp.float32)
    bcT = lax.dot_general(sel, x_dbl, (((1,), (1,)), ((), ())),
                          preferred_element_type=jnp.float32)   # (2N, TL)
    for ci in range(n_ch):                                      # chunk-blocked layout
        bct_s[ci] = bcT[:, ci * chunk:(ci + 1) * chunk]

    A = -jnp.exp(a_log_ref[...])                                # (N, Di) f32
    # Hoisted loop invariant (JAX does not CSE iota/broadcast inside loops).
    row_ids = lax.broadcasted_iota(jnp.int32, (chunk, d_inner), 0)

    # ---- chunked selective scan (state carried across tiles in hstate_s) -----
    def chunk_body(ci, h):                                      # h: (N, Di) f32
        off = pl.multiple_of(ci * chunk, chunk)
        dt_c = dt_s[pl.ds(off, chunk), :]                       # aligned block loads
        xa_c = xact_s[pl.ds(off, chunk), :]
        u_c = dt_c * xa_c                                       # dt * u
        bct_c = bct_s[ci]                                       # (2N, chunk)
        y_acc = jnp.zeros((chunk, d_inner), jnp.float32)
        for i in range(chunk):                                  # unrolled: VPU/EUP/XLU only
            dA_i = jnp.exp(dt_c[i:i + 1, :] * A)                # EUP, off the serial chain
            dBu = bct_c[0:n_state, i:i + 1] * u_c[i:i + 1, :]   # (N,1)*(1,Di)
            h = dA_i * h + dBu
            y_i = jnp.sum(bct_c[n_state:, i:i + 1] * h,
                          axis=0, keepdims=True)                # (1, Di) XLU reduce
            y_acc = jnp.where(row_ids == i, y_i, y_acc)
        y_s[pl.ds(off, chunk), :] = y_acc                       # aligned block store
        return h

    h_fin = lax.fori_loop(0, n_ch, chunk_body, hstate_s[...])
    hstate_s[...] = h_fin                                       # carry to next L tile

    # ---- deferred z branch, skip (D*u), gating, out_proj ---------------------
    z = jnp.dot(hn_s[...], w_in_z_ref[...], preferred_element_type=jnp.float32)
    y = y_s[...] + xact_s[...] * dpar_ref[...]
    y = y * (z * jax.nn.sigmoid(z))
    out = jnp.dot(y.astype(jnp.bfloat16), w_out_ref[...],
                  preferred_element_type=jnp.float32)           # (TL, D)
    hs_out_ref[0] = out.astype(hs_out_ref.dtype)


# ----------------------------------------------------------------------------
# Wrapper: Block.forward
# ----------------------------------------------------------------------------
def block_forward(hidden_states, residual, params, eps=1e-5,
                  seq_tile=128, chunk=16):
    assert chunk % 8 == 0
    B, L, D = hidden_states.shape
    TL = min(seq_tile, _round_up(L, chunk))
    TL = _round_up(TL, chunk)
    Lp = _round_up(L, TL)
    n_lt = Lp // TL
    pad = Lp - L

    f32, bf16 = jnp.float32, jnp.bfloat16
    h = hidden_states.astype(f32)
    r = None if residual is None else residual.astype(f32)
    if pad:
        h = jnp.pad(h, ((0, 0), (0, pad), (0, 0)))
        if r is not None:
            r = jnp.pad(r, ((0, 0), (0, pad), (0, 0)))

    d_inner = params['w_in_x'].shape[1]
    d_state = params['a_log_t'].shape[0]
    d_conv = params['conv_w'].shape[0]
    assert d_conv - 1 <= 8, "carried conv tail holds at most 8 rows"
    n_ch = TL // chunk

    weights = [
        params['norm_w'].reshape(1, D).astype(f32),
        params['norm_b'].reshape(1, D).astype(f32),
        params['w_in_x'].astype(bf16),
        params['w_in_z'].astype(bf16),
        params['conv_w'].astype(f32),
        params['conv_b'].astype(f32),
        params['w_x'].astype(bf16),           # fused x_proj: [dt_low | B | C]
        params['w_dt'].astype(f32),           # dt_proj kept in f32
        params['b_dt'].astype(f32),
        params['a_log_t'].astype(f32),
        params['d_par'].astype(f32),
        params['w_out'].astype(bf16),
    ]

    has_residual = r is not None
    seq_spec = pl.BlockSpec((1, TL, D), lambda b, t: (b, t, 0))
    w_specs = [pl.BlockSpec(w.shape, lambda b, t: (0, 0)) for w in weights]
    in_specs = [seq_spec] + ([seq_spec] if has_residual else []) + w_specs
    inputs = [h] + ([r] if has_residual else []) + weights

    kernel = functools.partial(_block_mamba_kernel, eps=eps,
                               has_residual=has_residual, chunk=chunk)
    hs, res = pl.pallas_call(
        kernel,
        out_shape=(jax.ShapeDtypeStruct((B, Lp, D), f32),
                   jax.ShapeDtypeStruct((B, Lp, D), f32)),
        grid=(B, n_lt),
        in_specs=in_specs,
        out_specs=(seq_spec, seq_spec),
        scratch_shapes=[
            pltpu.VMEM((8, d_inner), f32),                  # conv tail (carried over L tiles)
            pltpu.VMEM((d_state, d_inner), f32),            # scan state (carried over L tiles)
            pltpu.VMEM((TL, D), bf16),                      # normalized activations (for z)
            pltpu.VMEM((TL, d_inner), f32),                 # dt (post-softplus)
            pltpu.VMEM((TL, d_inner), f32),                 # conv+SiLU activations
            pltpu.VMEM((n_ch, 2 * d_state, chunk), f32),    # transposed [B|C], chunk-blocked
            pltpu.VMEM((TL, d_inner), f32),                 # scan outputs y
        ],
        compiler_params=pltpu.CompilerParams(
            dimension_semantics=("parallel", "arbitrary"),  # megacore over B; L sequential
            vmem_limit_bytes=_pick_vmem_limit()),
    )(*inputs)

    if pad:
        hs = hs[:, :L, :]
        res = res[:, :L, :]
    return hs, res


# ----------------------------------------------------------------------------
# Pure-JAX reference (same cast points as the kernel) for correctness checking
# ----------------------------------------------------------------------------
def block_reference(hidden, residual, params, eps=1e-5):
    f32, bf16 = jnp.float32, jnp.bfloat16
    x = hidden.astype(f32)
    res = x if residual is None else x + residual.astype(f32)
    mean = jnp.mean(res, axis=-1, keepdims=True)
    xc = res - mean
    var = jnp.mean(xc * xc, axis=-1, keepdims=True)
    hn = xc * lax.rsqrt(var + eps) * params['norm_w'] + params['norm_b']
    hn16 = hn.astype(bf16)

    xx = jnp.einsum('bld,de->ble', hn16, params['w_in_x'].astype(bf16),
                    preferred_element_type=f32)
    z = jnp.einsum('bld,de->ble', hn16, params['w_in_z'].astype(bf16),
                   preferred_element_type=f32)

    K = params['conv_w'].shape[0]
    L = x.shape[1]
    xp = jnp.pad(xx, ((0, 0), (K - 1, 0), (0, 0)))
    conv = sum(xp[:, k:k + L, :] * params['conv_w'][k][None, None, :]
               for k in range(K))
    x_act = conv + params['conv_b']
    x_act = x_act * jax.nn.sigmoid(x_act)
    xa16 = x_act.astype(bf16)

    N = params['a_log_t'].shape[0]
    R = params['w_dt'].shape[0]
    x_dbl = jnp.einsum('ble,ef->blf', xa16, params['w_x'].astype(bf16),
                       preferred_element_type=f32)               # (B, L, R+2N)
    dt_low = x_dbl[..., :R]
    bmat = x_dbl[..., R:R + N]
    cmat = x_dbl[..., R + N:]
    dt = jnp.einsum('blr,re->ble', dt_low, params['w_dt'],
                    preferred_element_type=f32) + params['b_dt']
    dt = jnp.maximum(dt, 0.0) + jnp.log(1.0 + jnp.exp(-jnp.abs(dt)))
    A = -jnp.exp(params['a_log_t'])                              # (N, Di)
    u = dt * x_act

    def scan_one(dt_b, u_b, b_b, c_b):
        dA = jnp.exp(dt_b[:, None, :] * A[None, :, :])           # (L, N, Di)
        dBu = b_b[:, :, None] * u_b[:, None, :]                  # (L, N, Di)

        def step(h, inp):
            dA_t, dBu_t, c_t = inp
            h = dA_t * h + dBu_t
            return h, jnp.sum(c_t[:, None] * h, axis=0)

        _, ys = lax.scan(step, jnp.zeros(A.shape, f32), (dA, dBu, c_b))
        return ys

    y = jax.vmap(scan_one)(dt, u, bmat, cmat)
    y = y + x_act * params['d_par']
    y = y * (z * jax.nn.sigmoid(z))
    out = jnp.einsum('ble,ed->bld', y.astype(bf16), params['w_out'].astype(bf16),
                     preferred_element_type=f32)
    return out, res


# ----------------------------------------------------------------------------
# Deterministic parameter init (Mamba defaults: d_state=16, d_conv=4, expand=2)
# ----------------------------------------------------------------------------
def init_params(key, dim, d_state=16, d_conv=4, expand=2):
    d_inner = expand * dim
    dt_rank = math.ceil(dim / 16)
    ks = jax.random.split(key, 6)

    def lin(k, fan_in, shape):
        return jax.random.normal(k, shape, jnp.float32) / jnp.sqrt(float(fan_in))

    w_in = lin(ks[0], dim, (dim, 2 * d_inner))
    conv_w = lin(ks[1], d_conv, (d_conv, d_inner))               # depthwise taps
    conv_b = jnp.zeros((1, d_inner), jnp.float32)
    w_x = lin(ks[2], d_inner, (d_inner, dt_rank + 2 * d_state))  # fused [dt|B|C]
    w_dt = lin(ks[3], dt_rank, (dt_rank, d_inner))
    dt = jnp.exp(jax.random.uniform(ks[4], (d_inner,), jnp.float32)
                 * (math.log(0.1) - math.log(0.001)) + math.log(0.001))
    dt = jnp.clip(dt, 1e-4)
    b_dt = (dt + jnp.log(-jnp.expm1(-dt))).reshape(1, d_inner)   # inv-softplus init
    a_log = jnp.log(jnp.broadcast_to(
        jnp.arange(1, d_state + 1, dtype=jnp.float32), (d_inner, d_state)))
    d_par = jnp.ones((1, d_inner), jnp.float32)
    w_out = lin(ks[5], d_inner, (d_inner, dim))

    return dict(
        w_in_x=w_in[:, :d_inner], w_in_z=w_in[:, d_inner:],
        conv_w=conv_w, conv_b=conv_b,
        w_x=w_x, w_dt=w_dt, b_dt=b_dt,
        a_log_t=a_log.T,                                         # (d_state, d_inner)
        d_par=d_par, w_out=w_out,
        norm_w=jnp.ones((dim,), jnp.float32),
        norm_b=jnp.zeros((dim,), jnp.float32),
    )


if __name__ == "__main__":
    key = jax.random.PRNGKey(0)
    k1, k2, k3 = jax.random.split(key, 3)

    B, L, dim = 2, 16, 128                                       # D multiple of 128
    params = init_params(k3, dim)
    hidden = jax.random.normal(k1, (B, L, dim), jnp.float32)
    residual = jax.random.normal(k2, (B, L, dim), jnp.float32)

    # standard block (residual provided), single L tile
    hs, res = block_forward(hidden, residual, params)
    jax.block_until_ready((hs, res))
    hs_ref, res_ref = block_reference(hidden, residual, params)
    assert hs.shape == (B, L, dim) and res.shape == (B, L, dim)
    assert jnp.allclose(res, res_ref, atol=1e-5, rtol=1e-5)
    assert jnp.allclose(hs, hs_ref, atol=2e-2, rtol=2e-2)

    # first block (residual is None), ragged L to exercise the pad-to-chunk path
    L0 = 13
    h0_in = hidden[:, :L0, :]
    hs0, res0 = block_forward(h0_in, None, params)
    jax.block_until_ready((hs0, res0))
    hs0_ref, res0_ref = block_reference(h0_in, None, params)
    assert hs0.shape == (B, L0, dim) and res0.shape == (B, L0, dim)
    assert jnp.allclose(res0, res0_ref, atol=1e-5, rtol=1e-5)
    assert jnp.allclose(hs0, hs0_ref, atol=2e-2, rtol=2e-2)

    # multi-tile sequence: exercises the carried conv tail + scan state across L tiles
    L1 = 70
    k4, k5 = jax.random.split(k1)
    h1 = jax.random.normal(k4, (B, L1, dim), jnp.float32)
    r1 = jax.random.normal(k5, (B, L1, dim), jnp.float32)
    hs1, res1 = block_forward(h1, r1, params, seq_tile=32)
    jax.block_until_ready((hs1, res1))
    hs1_ref, res1_ref = block_reference(h1, r1, params)
    assert hs1.shape == (B, L1, dim) and res1.shape == (B, L1, dim)
    assert jnp.allclose(res1, res1_ref, atol=1e-5, rtol=1e-5)
    assert jnp.allclose(hs1, hs1_ref, atol=2e-2, rtol=2e-2)

    assert (jnp.all(jnp.isfinite(hs)) and jnp.all(jnp.isfinite(hs0))
            and jnp.all(jnp.isfinite(hs1)))
    print("KERNEL_OK")
</pallas_src>

<mosaic_0001>
module attributes {stable_mosaic.version = 11 : i64} {
  func.func @_block_mamba_kernel(%arg0: i32, %arg1: i32, %arg2: memref<1x16x128xf32, #tpu.memory_space<vmem>>, %arg3: memref<1x16x128xf32, #tpu.memory_space<vmem>>, %arg4: memref<1x128xf32, #tpu.memory_space<vmem>>, %arg5: memref<1x128xf32, #tpu.memory_space<vmem>>, %arg6: memref<128x256xbf16, #tpu.memory_space<vmem>>, %arg7: memref<128x256xbf16, #tpu.memory_space<vmem>>, %arg8: memref<4x256xf32, #tpu.memory_space<vmem>>, %arg9: memref<1x256xf32, #tpu.memory_space<vmem>>, %arg10: memref<256x40xbf16, #tpu.memory_space<vmem>>, %arg11: memref<8x256xf32, #tpu.memory_space<vmem>>, %arg12: memref<1x256xf32, #tpu.memory_space<vmem>>, %arg13: memref<16x256xf32, #tpu.memory_space<vmem>>, %arg14: memref<1x256xf32, #tpu.memory_space<vmem>>, %arg15: memref<256x128xbf16, #tpu.memory_space<vmem>>, %arg16: memref<1x16x128xf32, #tpu.memory_space<vmem>>, %arg17: memref<1x16x128xf32, #tpu.memory_space<vmem>>, %arg18: memref<8x256xf32, #tpu.memory_space<vmem>>, %arg19: memref<16x256xf32, #tpu.memory_space<vmem>>, %arg20: memref<16x128xbf16, #tpu.memory_space<vmem>>, %arg21: memref<16x256xf32, #tpu.memory_space<vmem>>, %arg22: memref<16x256xf32, #tpu.memory_space<vmem>>, %arg23: memref<1x32x16xf32, #tpu.memory_space<vmem>>, %arg24: memref<16x256xf32, #tpu.memory_space<vmem>>) attributes {dimension_semantics = [#tpu.dimension_semantics<parallel>, #tpu.dimension_semantics<arbitrary>], iteration_bounds = array<i64: 2, 1>, scalar_prefetch = 0 : i64, scratch_operands = 7 : i64, tpu.core_type = #tpu.core_type<tc>, window_params = [{transform_indices = @transform_0, window_bounds = array<i64: 1, 16, 128>}, {transform_indices = @transform_1, window_bounds = array<i64: 1, 16, 128>}, {pipeline_mode = #tpu.pipeline_mode<synchronous>, transform_indices = @transform_2, window_bounds = array<i64: 1, 128>}, {pipeline_mode = #tpu.pipeline_mode<synchronous>, transform_indices = @transform_3, window_bounds = array<i64: 1, 128>}, {pipeline_mode = #tpu.pipeline_mode<synchronous>, transform_indices = @transform_4, window_bounds = array<i64: 128, 256>}, {pipeline_mode = #tpu.pipeline_mode<synchronous>, transform_indices = @transform_5, window_bounds = array<i64: 128, 256>}, {pipeline_mode = #tpu.pipeline_mode<synchronous>, transform_indices = @transform_6, window_bounds = array<i64: 4, 256>}, {pipeline_mode = #tpu.pipeline_mode<synchronous>, transform_indices = @transform_7, window_bounds = array<i64: 1, 256>}, {pipeline_mode = #tpu.pipeline_mode<synchronous>, transform_indices = @transform_8, window_bounds = array<i64: 256, 40>}, {pipeline_mode = #tpu.pipeline_mode<synchronous>, transform_indices = @transform_9, window_bounds = array<i64: 8, 256>}, {pipeline_mode = #tpu.pipeline_mode<synchronous>, transform_indices = @transform_10, window_bounds = array<i64: 1, 256>}, {pipeline_mode = #tpu.pipeline_mode<synchronous>, transform_indices = @transform_11, window_bounds = array<i64: 16, 256>}, {pipeline_mode = #tpu.pipeline_mode<synchronous>, transform_indices = @transform_12, window_bounds = array<i64: 1, 256>}, {pipeline_mode = #tpu.pipeline_mode<synchronous>, transform_indices = @transform_13, window_bounds = array<i64: 256, 128>}, {transform_indices = @transform_14, window_bounds = array<i64: 1, 16, 128>}, {transform_indices = @transform_15, window_bounds = array<i64: 1, 16, 128>}]} {
    %c0_i32 = arith.constant 0 : i32
    %0 = arith.cmpi eq, %arg1, %c0_i32 : i32
    %1 = arith.extui %0 : i1 to i32
    %c0_i32_0 = arith.constant 0 : i32
    %2 = arith.cmpi ne, %1, %c0_i32_0 : i32
    scf.if %2 {
      %cst_105 = arith.constant 0.000000e+00 : f32
      %481 = vector.broadcast %cst_105 : f32 to vector<8x256xf32>
      %c0_106 = arith.constant 0 : index
      %c0_107 = arith.constant 0 : index
      %482 = vector.load %arg18[%c0_106, %c0_107] : memref<8x256xf32, #tpu.memory_space<vmem>>, vector<8x256xf32>
      tpu.vector_store %arg18[%c0_106, %c0_107], %481 {strides = array<i32>} : memref<8x256xf32, #tpu.memory_space<vmem>>, vector<8x256xf32>,
      %cst_108 = arith.constant 0.000000e+00 : f32
      %483 = vector.broadcast %cst_108 : f32 to vector<16x256xf32>
      %c0_109 = arith.constant 0 : index
      %c0_110 = arith.constant 0 : index
      %484 = vector.load %arg19[%c0_109, %c0_110] : memref<16x256xf32, #tpu.memory_space<vmem>>, vector<16x256xf32>
      tpu.vector_store %arg19[%c0_109, %c0_110], %483 {strides = array<i32>} : memref<16x256xf32, #tpu.memory_space<vmem>>, vector<16x256xf32>,
    } else {
    }
    %c0 = arith.constant 0 : index
    %c0_1 = arith.constant 0 : index
    %c0_2 = arith.constant 0 : index
    %3 = vector.load %arg2[%c0, %c0_1, %c0_2] : memref<1x16x128xf32, #tpu.memory_space<vmem>>, vector<1x16x128xf32>
    %4 = vector.shape_cast %3 : vector<1x16x128xf32> to vector<16x128xf32>
    %c0_3 = arith.constant 0 : index
    %c0_4 = arith.constant 0 : index
    %c0_5 = arith.constant 0 : index
    %5 = vector.load %arg3[%c0_3, %c0_4, %c0_5] : memref<1x16x128xf32, #tpu.memory_space<vmem>>, vector<1x16x128xf32>
    %6 = vector.shape_cast %5 : vector<1x16x128xf32> to vector<16x128xf32>
    %7 = arith.addf %4, %6 : vector<16x128xf32>
    %c0_6 = arith.constant 0 : index
    %c0_7 = arith.constant 0 : index
    %c0_8 = arith.constant 0 : index
    %8 = vector.load %arg17[%c0_6, %c0_7, %c0_8] : memref<1x16x128xf32, #tpu.memory_space<vmem>>, vector<1x16x128xf32>
    %9 = vector.shape_cast %8 : vector<1x16x128xf32> to vector<16x128xf32>
    %10 = vector.shape_cast %7 : vector<16x128xf32> to vector<1x16x128xf32>
    tpu.vector_store %arg17[%c0_6, %c0_7, %c0_8], %10 {strides = array<i32>} : memref<1x16x128xf32, #tpu.memory_space<vmem>>, vector<1x16x128xf32>,
    %cst = arith.constant dense<0.000000e+00> : vector<16xf32>
    %11 = vector.multi_reduction <add>, %7, %cst [1] : vector<16x128xf32> to vector<16xf32>
    %12 = vector.shape_cast %11 : vector<16xf32> to vector<16x1xf32>
    %cst_9 = arith.constant 1.280000e+02 : f32
    %13 = vector.broadcast %cst_9 : f32 to vector<16x1xf32>
    %14 = arith.divf %12, %13 : vector<16x1xf32>
    %15 = vector.broadcast %14 : vector<16x1xf32> to vector<16x128xf32>
    %16 = arith.subf %7, %15 : vector<16x128xf32>
    %17 = arith.mulf %16, %16 : vector<16x128xf32>
    %cst_10 = arith.constant dense<0.000000e+00> : vector<16xf32>
    %18 = vector.multi_reduction <add>, %17, %cst_10 [1] : vector<16x128xf32> to vector<16xf32>
    %19 = vector.shape_cast %18 : vector<16xf32> to vector<16x1xf32>
    %cst_11 = arith.constant 1.280000e+02 : f32
    %20 = vector.broadcast %cst_11 : f32 to vector<16x1xf32>
    %21 = arith.divf %19, %20 : vector<16x1xf32>
    %cst_12 = arith.constant 9.99999974E-6 : f32
    %22 = vector.broadcast %cst_12 : f32 to vector<16x1xf32>
    %23 = arith.addf %21, %22 : vector<16x1xf32>
    %24 = math.rsqrt %23 : vector<16x1xf32>
    %25 = vector.broadcast %24 : vector<16x1xf32> to vector<16x128xf32>
    %26 = arith.mulf %16, %25 : vector<16x128xf32>
    %c0_13 = arith.constant 0 : index
    %c0_14 = arith.constant 0 : index
    %27 = vector.load %arg4[%c0_13, %c0_14] : memref<1x128xf32, #tpu.memory_space<vmem>>, vector<1x128xf32>
    %28 = vector.broadcast %27 : vector<1x128xf32> to vector<16x128xf32>
    %29 = arith.mulf %26, %28 : vector<16x128xf32>
    %c0_15 = arith.constant 0 : index
    %c0_16 = arith.constant 0 : index
    %30 = vector.load %arg5[%c0_15, %c0_16] : memref<1x128xf32, #tpu.memory_space<vmem>>, vector<1x128xf32>
    %31 = vector.broadcast %30 : vector<1x128xf32> to vector<16x128xf32>
    %32 = arith.addf %29, %31 : vector<16x128xf32>
    %33 = arith.truncf %32 : vector<16x128xf32> to vector<16x128xbf16>
    %c0_17 = arith.constant 0 : index
    %c0_18 = arith.constant 0 : index
    %34 = vector.load %arg20[%c0_17, %c0_18] : memref<16x128xbf16, #tpu.memory_space<vmem>>, vector<16x128xbf16>
    tpu.vector_store %arg20[%c0_17, %c0_18], %33 {strides = array<i32>} : memref<16x128xbf16, #tpu.memory_space<vmem>>, vector<16x128xbf16>,
    %c0_19 = arith.constant 0 : index
    %c0_20 = arith.constant 0 : index
    %35 = vector.load %arg6[%c0_19, %c0_20] : memref<128x256xbf16, #tpu.memory_space<vmem>>, vector<128x256xbf16>
    %cst_21 = arith.constant dense<0.000000e+00> : vector<16x256xf32>
    %36 = tpu.matmul %33, %35, %cst_21 {dimension_numbers = #tpu.dot_dimension_numbers<[1], [0], [0], [1], [0, 0, 1, 1], [], []>} : vector<16x128xbf16>, vector<128x256xbf16>, vector<16x256xf32> -> vector<16x256xf32>
    %c0_22 = arith.constant 0 : index
    %c0_23 = arith.constant 0 : index
    %37 = vector.load %arg18[%c0_22, %c0_23] : memref<8x256xf32, #tpu.memory_space<vmem>>, vector<8x256xf32>
    %38 = tpu.concatenate %37, %36 in 0 : vector<8x256xf32>, vector<16x256xf32> -> vector<24x256xf32>
    %cst_24 = arith.constant 0.000000e+00 : f32
    %39 = vector.broadcast %cst_24 : f32 to vector<16x256xf32>
    %40 = vector.extract_strided_slice %38 {offsets = [5, 0], sizes = [16, 256], strides = [1, 1]} : vector<24x256xf32> to vector<16x256xf32>
    %c0_25 = arith.constant 0 : index
    %c0_26 = arith.constant 0 : index
    %41 = vector.load %arg8[%c0_25, %c0_26] : memref<4x256xf32, #tpu.memory_space<vmem>>, vector<1x256xf32>
    %42 = vector.broadcast %41 : vector<1x256xf32> to vector<16x256xf32>
    %43 = arith.mulf %40, %42 : vector<16x256xf32>
    %44 = arith.addf %39, %43 : vector<16x256xf32>
    %45 = vector.extract_strided_slice %38 {offsets = [6, 0], sizes = [16, 256], strides = [1, 1]} : vector<24x256xf32> to vector<16x256xf32>
    %c1 = arith.constant 1 : index
    %c0_27 = arith.constant 0 : index
    %46 = vector.load %arg8[%c1, %c0_27] : memref<4x256xf32, #tpu.memory_space<vmem>>, vector<1x256xf32>
    %47 = vector.broadcast %46 : vector<1x256xf32> to vector<16x256xf32>
    %48 = arith.mulf %45, %47 : vector<16x256xf32>
    %49 = arith.addf %44, %48 : vector<16x256xf32>
    %50 = vector.extract_strided_slice %38 {offsets = [7, 0], sizes = [16, 256], strides = [1, 1]} : vector<24x256xf32> to vector<16x256xf32>
    %c2 = arith.constant 2 : index
    %c0_28 = arith.constant 0 : index
    %51 = vector.load %arg8[%c2, %c0_28] : memref<4x256xf32, #tpu.memory_space<vmem>>, vector<1x256xf32>
    %52 = vector.broadcast %51 : vector<1x256xf32> to vector<16x256xf32>
    %53 = arith.mulf %50, %52 : vector<16x256xf32>
    %54 = arith.addf %49, %53 : vector<16x256xf32>
    %55 = vector.extract_strided_slice %38 {offsets = [8, 0], sizes = [16, 256], strides = [1, 1]} : vector<24x256xf32> to vector<16x256xf32>
    %c3 = arith.constant 3 : index
    %c0_29 = arith.constant 0 : index
    %56 = vector.load %arg8[%c3, %c0_29] : memref<4x256xf32, #tpu.memory_space<vmem>>, vector<1x256xf32>
    %57 = vector.broadcast %56 : vector<1x256xf32> to vector<16x256xf32>
    %58 = arith.mulf %55, %57 : vector<16x256xf32>
    %59 = arith.addf %54, %58 : vector<16x256xf32>
    %60 = vector.extract_strided_slice %36 {offsets = [8, 0], sizes = [8, 256], strides = [1, 1]} : vector<16x256xf32> to vector<8x256xf32>
    %c0_30 = arith.constant 0 : index
    %c0_31 = arith.constant 0 : index
    %61 = vector.load %arg18[%c0_30, %c0_31] : memref<8x256xf32, #tpu.memory_space<vmem>>, vector<8x256xf32>
    tpu.vector_store %arg18[%c0_30, %c0_31], %60 {strides = array<i32>} : memref<8x256xf32, #tpu.memory_space<vmem>>, vector<8x256xf32>,
    %c0_32 = arith.constant 0 : index
    %c0_33 = arith.constant 0 : index
    %62 = vector.load %arg9[%c0_32, %c0_33] : memref<1x256xf32, #tpu.memory_space<vmem>>, vector<1x256xf32>
    %63 = vector.broadcast %62 : vector<1x256xf32> to vector<16x256xf32>
    %64 = arith.addf %59, %63 : vector<16x256xf32>
    %65 = arith.negf %64 : vector<16x256xf32>
    %66 = math.exp %65 : vector<16x256xf32>
    %cst_34 = arith.constant 1.000000e+00 : f32
    %67 = vector.broadcast %cst_34 : f32 to vector<16x256xf32>
    %68 = arith.addf %67, %66 : vector<16x256xf32>
    %69 = arith.divf %67, %68 : vector<16x256xf32>
    %70 = arith.mulf %64, %69 : vector<16x256xf32>
    %c0_35 = arith.constant 0 : index
    %c0_36 = arith.constant 0 : index
    %71 = vector.load %arg22[%c0_35, %c0_36] : memref<16x256xf32, #tpu.memory_space<vmem>>, vector<16x256xf32>
    tpu.vector_store %arg22[%c0_35, %c0_36], %70 {strides = array<i32>} : memref<16x256xf32, #tpu.memory_space<vmem>>, vector<16x256xf32>,
    %72 = arith.truncf %70 : vector<16x256xf32> to vector<16x256xbf16>
    %c0_37 = arith.constant 0 : index
    %c0_38 = arith.constant 0 : index
    %73 = vector.load %arg10[%c0_37, %c0_38] : memref<256x40xbf16, #tpu.memory_space<vmem>>, vector<256x40xbf16>
    %cst_39 = arith.constant dense<0.000000e+00> : vector<16x40xf32>
    %74 = tpu.matmul %72, %73, %cst_39 {dimension_numbers = #tpu.dot_dimension_numbers<[1], [0], [0], [1], [0, 0, 1, 1], [], []>} : vector<16x256xbf16>, vector<256x40xbf16>, vector<16x40xf32> -> vector<16x40xf32>
    %75 = vector.extract_strided_slice %74 {offsets = [0, 0], sizes = [16, 8], strides = [1, 1]} : vector<16x40xf32> to vector<16x8xf32>
    %c0_40 = arith.constant 0 : index
    %c0_41 = arith.constant 0 : index
    %76 = vector.load %arg11[%c0_40, %c0_41] : memref<8x256xf32, #tpu.memory_space<vmem>>, vector<8x256xf32>
    %cst_42 = arith.constant dense<0.000000e+00> : vector<16x256xf32>
    %77 = tpu.matmul %75, %76, %cst_42 {dimension_numbers = #tpu.dot_dimension_numbers<[1], [0], [0], [1], [0, 0, 1, 1], [], []>} : vector<16x8xf32>, vector<8x256xf32>, vector<16x256xf32> -> vector<16x256xf32>
    %c0_43 = arith.constant 0 : index
    %c0_44 = arith.constant 0 : index
    %78 = vector.load %arg12[%c0_43, %c0_44] : memref<1x256xf32, #tpu.memory_space<vmem>>, vector<1x256xf32>
    %79 = vector.broadcast %78 : vector<1x256xf32> to vector<16x256xf32>
    %80 = arith.addf %77, %79 : vector<16x256xf32>
    %cst_45 = arith.constant 0.000000e+00 : f32
    %81 = vector.broadcast %cst_45 : f32 to vector<16x256xf32>
    %82 = arith.maximumf %80, %81 : vector<16x256xf32>
    %83 = math.absf %80 : vector<16x256xf32>
    %cst_46 = arith.constant 0.000000e+00 : f32
    %84 = vector.broadcast %cst_46 : f32 to vector<16x256xf32>
    %85 = arith.subf %84, %83 : vector<16x256xf32>
    %86 = math.exp %85 : vector<16x256xf32>
    %cst_47 = arith.constant 1.000000e+00 : f32
    %87 = vector.broadcast %cst_47 : f32 to vector<16x256xf32>
    %88 = arith.addf %87, %86 : vector<16x256xf32>
    %89 = math.log %88 : vector<16x256xf32>
    %90 = arith.addf %82, %89 : vector<16x256xf32>
    %c0_48 = arith.constant 0 : index
    %c0_49 = arith.constant 0 : index
    %91 = vector.load %arg21[%c0_48, %c0_49] : memref<16x256xf32, #tpu.memory_space<vmem>>, vector<16x256xf32>
    tpu.vector_store %arg21[%c0_48, %c0_49], %90 {strides = array<i32>} : memref<16x256xf32, #tpu.memory_space<vmem>>, vector<16x256xf32>,
    %92 = tpu.iota {dimensions = array<i32: 0>} : vector<32x40xi32>
    %93 = tpu.iota {dimensions = array<i32: 1>} : vector<32x40xi32>
    %c8_i32 = arith.constant 8 : i32
    %94 = vector.broadcast %c8_i32 : i32 to vector<32x40xi32>
    %95 = arith.addi %92, %94 : vector<32x40xi32>
    %96 = arith.cmpi eq, %93, %95 : vector<32x40xi32>
    %97 = arith.extui %96 : vector<32x40xi1> to vector<32x40xi32>
    %98 = arith.sitofp %97 : vector<32x40xi32> to vector<32x40xf32>
    %cst_50 = arith.constant dense<0.000000e+00> : vector<32x16xf32>
    %99 = tpu.matmul %98, %74, %cst_50 {dimension_numbers = #tpu.dot_dimension_numbers<[1], [1], [0], [0], [0, 0, 1, 0], [], []>} : vector<32x40xf32>, vector<16x40xf32>, vector<32x16xf32> -> vector<32x16xf32>
    %c0_51 = arith.constant 0 : index
    %c0_52 = arith.constant 0 : index
    %c0_53 = arith.constant 0 : index
    %100 = vector.load %arg23[%c0_51, %c0_52, %c0_53] : memref<1x32x16xf32, #tpu.memory_space<vmem>>, vector<1x32x16xf32>
    %101 = vector.shape_cast %100 : vector<1x32x16xf32> to vector<32x16xf32>
    %102 = vector.shape_cast %99 : vector<32x16xf32> to vector<1x32x16xf32>
    tpu.vector_store %arg23[%c0_51, %c0_52, %c0_53], %102 {strides = array<i32>} : memref<1x32x16xf32, #tpu.memory_space<vmem>>, vector<1x32x16xf32>,
    %c0_54 = arith.constant 0 : index
    %c0_55 = arith.constant 0 : index
    %103 = vector.load %arg13[%c0_54, %c0_55] : memref<16x256xf32, #tpu.memory_space<vmem>>, vector<16x256xf32>
    %104 = math.exp %103 : vector<16x256xf32>
    %cst_56 = arith.constant 0.000000e+00 : f32
    %105 = vector.broadcast %cst_56 : f32 to vector<16x256xf32>
    %106 = arith.subf %105, %104 : vector<16x256xf32>
    %107 = tpu.iota {dimensions = array<i32: 0>} : vector<16x256xi32>
    %c0_57 = arith.constant 0 : index
    %c0_58 = arith.constant 0 : index
    %108 = vector.load %arg19[%c0_57, %c0_58] : memref<16x256xf32, #tpu.memory_space<vmem>>, vector<16x256xf32>
    %c0_i32_59 = arith.constant 0 : i32
    %c16_i32 = arith.constant 16 : i32
    %109 = arith.muli %c0_i32_59, %c16_i32 : i32
    %110 = tpu.assume_multiple %109, 16 : i32
    %111 = arith.index_cast %110 : i32 to index
    %c0_60 = arith.constant 0 : index
    %112 = vector.load %arg21[%111, %c0_60] : memref<16x256xf32, #tpu.memory_space<vmem>>, vector<16x256xf32>
    %113 = arith.index_cast %110 : i32 to index
    %c0_61 = arith.constant 0 : index
    %114 = vector.load %arg22[%113, %c0_61] : memref<16x256xf32, #tpu.memory_space<vmem>>, vector<16x256xf32>
    %115 = arith.mulf %112, %114 : vector<16x256xf32>
    %116 = arith.index_cast %c0_i32_59 : i32 to index
    %c0_62 = arith.constant 0 : index
    %c0_63 = arith.constant 0 : index
    %117 = vector.load %arg23[%116, %c0_62, %c0_63] : memref<1x32x16xf32, #tpu.memory_space<vmem>>, vector<1x32x16xf32>
    %118 = vector.shape_cast %117 : vector<1x32x16xf32> to vector<32x16xf32>
    %cst_64 = arith.constant 0.000000e+00 : f32
    %119 = vector.broadcast %cst_64 : f32 to vector<16x256xf32>
    %120 = vector.extract_strided_slice %112 {offsets = [0, 0], sizes = [1, 256], strides = [1, 1]} : vector<16x256xf32> to vector<1x256xf32>
    %121 = vector.broadcast %120 : vector<1x256xf32> to vector<16x256xf32>
    %122 = arith.mulf %121, %106 : vector<16x256xf32>
    %123 = math.exp %122 : vector<16x256xf32>
    %124 = vector.extract_strided_slice %118 {offsets = [0, 0], sizes = [16, 1], strides = [1, 1]} : vector<32x16xf32> to vector<16x1xf32>
    %125 = vector.extract_strided_slice %115 {offsets = [0, 0], sizes = [1, 256], strides = [1, 1]} : vector<16x256xf32> to vector<1x256xf32>
    %126 = vector.broadcast %124 : vector<16x1xf32> to vector<16x256xf32>
    %127 = vector.broadcast %125 : vector<1x256xf32> to vector<16x256xf32>
    %128 = arith.mulf %126, %127 : vector<16x256xf32>
    %129 = arith.mulf %123, %108 : vector<16x256xf32>
    %130 = arith.addf %129, %128 : vector<16x256xf32>
    %131 = vector.extract_strided_slice %118 {offsets = [16, 0], sizes = [16, 1], strides = [1, 1]} : vector<32x16xf32> to vector<16x1xf32>
    %132 = vector.broadcast %131 : vector<16x1xf32> to vector<16x256xf32>
    %133 = arith.mulf %132, %130 : vector<16x256xf32>
    %cst_65 = arith.constant dense<0.000000e+00> : vector<256xf32>
    %134 = vector.multi_reduction <add>, %133, %cst_65 [0] : vector<16x256xf32> to vector<256xf32>
    %135 = vector.shape_cast %134 : vector<256xf32> to vector<1x256xf32>
    %c0_i32_66 = arith.constant 0 : i32
    %136 = vector.broadcast %c0_i32_66 : i32 to vector<16x256xi32>
    %137 = arith.cmpi eq, %107, %136 : vector<16x256xi32>
    %138 = vector.shape_cast %135 : vector<1x256xf32> to vector<1x256xf32>
    %139 = vector.broadcast %138 : vector<1x256xf32> to vector<16x256xf32>
    %140 = arith.select %137, %139, %119 : vector<16x256xi1>, vector<16x256xf32>
    %141 = vector.extract_strided_slice %112 {offsets = [1, 0], sizes = [1, 256], strides = [1, 1]} : vector<16x256xf32> to vector<1x256xf32>
    %142 = vector.broadcast %141 : vector<1x256xf32> to vector<16x256xf32>
    %143 = arith.mulf %142, %106 : vector<16x256xf32>
    %144 = math.exp %143 : vector<16x256xf32>
    %145 = vector.extract_strided_slice %118 {offsets = [0, 1], sizes = [16, 1], strides = [1, 1]} : vector<32x16xf32> to vector<16x1xf32>
    %146 = vector.extract_strided_slice %115 {offsets = [1, 0], sizes = [1, 256], strides = [1, 1]} : vector<16x256xf32> to vector<1x256xf32>
    %147 = vector.broadcast %145 : vector<16x1xf32> to vector<16x256xf32>
    %148 = vector.broadcast %146 : vector<1x256xf32> to vector<16x256xf32>
    %149 = arith.mulf %147, %148 : vector<16x256xf32>
    %150 = arith.mulf %144, %130 : vector<16x256xf32>
    %151 = arith.addf %150, %149 : vector<16x256xf32>
    %152 = vector.extract_strided_slice %118 {offsets = [16, 1], sizes = [16, 1], strides = [1, 1]} : vector<32x16xf32> to vector<16x1xf32>
    %153 = vector.broadcast %152 : vector<16x1xf32> to vector<16x256xf32>
    %154 = arith.mulf %153, %151 : vector<16x256xf32>
    %cst_67 = arith.constant dense<0.000000e+00> : vector<256xf32>
    %155 = vector.multi_reduction <add>, %154, %cst_67 [0] : vector<16x256xf32> to vector<256xf32>
    %156 = vector.shape_cast %155 : vector<256xf32> to vector<1x256xf32>
    %c1_i32 = arith.constant 1 : i32
    %157 = vector.broadcast %c1_i32 : i32 to vector<16x256xi32>
    %158 = arith.cmpi eq, %107, %157 : vector<16x256xi32>
    %159 = vector.shape_cast %156 : vector<1x256xf32> to vector<1x256xf32>
    %160 = vector.broadcast %159 : vector<1x256xf32> to vector<16x256xf32>
    %161 = arith.select %158, %160, %140 : vector<16x256xi1>, vector<16x256xf32>
    %162 = vector.extract_strided_slice %112 {offsets = [2, 0], sizes = [1, 256], strides = [1, 1]} : vector<16x256xf32> to vector<1x256xf32>
    %163 = vector.broadcast %162 : vector<1x256xf32> to vector<16x256xf32>
    %164 = arith.mulf %163, %106 : vector<16x256xf32>
    %165 = math.exp %164 : vector<16x256xf32>
    %166 = vector.extract_strided_slice %118 {offsets = [0, 2], sizes = [16, 1], strides = [1, 1]} : vector<32x16xf32> to vector<16x1xf32>
    %167 = vector.extract_strided_slice %115 {offsets = [2, 0], sizes = [1, 256], strides = [1, 1]} : vector<16x256xf32> to vector<1x256xf32>
    %168 = vector.broadcast %166 : vector<16x1xf32> to vector<16x256xf32>
    %169 = vector.broadcast %167 : vector<1x256xf32> to vector<16x256xf32>
    %170 = arith.mulf %168, %169 : vector<16x256xf32>
    %171 = arith.mulf %165, %151 : vector<16x256xf32>
    %172 = arith.addf %171, %170 : vector<16x256xf32>
    %173 = vector.extract_strided_slice %118 {offsets = [16, 2], sizes = [16, 1], strides = [1, 1]} : vector<32x16xf32> to vector<16x1xf32>
    %174 = vector.broadcast %173 : vector<16x1xf32> to vector<16x256xf32>
    %175 = arith.mulf %174, %172 : vector<16x256xf32>
    %cst_68 = arith.constant dense<0.000000e+00> : vector<256xf32>
    %176 = vector.multi_reduction <add>, %175, %cst_68 [0] : vector<16x256xf32> to vector<256xf32>
    %177 = vector.shape_cast %176 : vector<256xf32> to vector<1x256xf32>
    %c2_i32 = arith.constant 2 : i32
    %178 = vector.broadcast %c2_i32 : i32 to vector<16x256xi32>
    %179 = arith.cmpi eq, %107, %178 : vector<16x256xi32>
    %180 = vector.shape_cast %177 : vector<1x256xf32> to vector<1x256xf32>
    %181 = vector.broadcast %180 : vector<1x256xf32> to vector<16x256xf32>
    %182 = arith.select %179, %181, %161 : vector<16x256xi1>, vector<16x256xf32>
    %183 = vector.extract_strided_slice %112 {offsets = [3, 0], sizes = [1, 256], strides = [1, 1]} : vector<16x256xf32> to vector<1x256xf32>
    %184 = vector.broadcast %183 : vector<1x256xf32> to vector<16x256xf32>
    %185 = arith.mulf %184, %106 : vector<16x256xf32>
    %186 = math.exp %185 : vector<16x256xf32>
    %187 = vector.extract_strided_slice %118 {offsets = [0, 3], sizes = [16, 1], strides = [1, 1]} : vector<32x16xf32> to vector<16x1xf32>
    %188 = vector.extract_strided_slice %115 {offsets = [3, 0], sizes = [1, 256], strides = [1, 1]} : vector<16x256xf32> to vector<1x256xf32>
    %189 = vector.broadcast %187 : vector<16x1xf32> to vector<16x256xf32>
    %190 = vector.broadcast %188 : vector<1x256xf32> to vector<16x256xf32>
    %191 = arith.mulf %189, %190 : vector<16x256xf32>
    %192 = arith.mulf %186, %172 : vector<16x256xf32>
    %193 = arith.addf %192, %191 : vector<16x256xf32>
    %194 = vector.extract_strided_slice %118 {offsets = [16, 3], sizes = [16, 1], strides = [1, 1]} : vector<32x16xf32> to vector<16x1xf32>
    %195 = vector.broadcast %194 : vector<16x1xf32> to vector<16x256xf32>
    %196 = arith.mulf %195, %193 : vector<16x256xf32>
    %cst_69 = arith.constant dense<0.000000e+00> : vector<256xf32>
    %197 = vector.multi_reduction <add>, %196, %cst_69 [0] : vector<16x256xf32> to vector<256xf32>
    %198 = vector.shape_cast %197 : vector<256xf32> to vector<1x256xf32>
    %c3_i32 = arith.constant 3 : i32
    %199 = vector.broadcast %c3_i32 : i32 to vector<16x256xi32>
    %200 = arith.cmpi eq, %107, %199 : vector<16x256xi32>
    %201 = vector.shape_cast %198 : vector<1x256xf32> to vector<1x256xf32>
    %202 = vector.broadcast %201 : vector<1x256xf32> to vector<16x256xf32>
    %203 = arith.select %200, %202, %182 : vector<16x256xi1>, vector<16x256xf32>
    %204 = vector.extract_strided_slice %112 {offsets = [4, 0], sizes = [1, 256], strides = [1, 1]} : vector<16x256xf32> to vector<1x256xf32>
    %205 = vector.broadcast %204 : vector<1x256xf32> to vector<16x256xf32>
    %206 = arith.mulf %205, %106 : vector<16x256xf32>
    %207 = math.exp %206 : vector<16x256xf32>
    %208 = vector.extract_strided_slice %118 {offsets = [0, 4], sizes = [16, 1], strides = [1, 1]} : vector<32x16xf32> to vector<16x1xf32>
    %209 = vector.extract_strided_slice %115 {offsets = [4, 0], sizes = [1, 256], strides = [1, 1]} : vector<16x256xf32> to vector<1x256xf32>
    %210 = vector.broadcast %208 : vector<16x1xf32> to vector<16x256xf32>
    %211 = vector.broadcast %209 : vector<1x256xf32> to vector<16x256xf32>
    %212 = arith.mulf %210, %211 : vector<16x256xf32>
    %213 = arith.mulf %207, %193 : vector<16x256xf32>
    %214 = arith.addf %213, %212 : vector<16x256xf32>
    %215 = vector.extract_strided_slice %118 {offsets = [16, 4], sizes = [16, 1], strides = [1, 1]} : vector<32x16xf32> to vector<16x1xf32>
    %216 = vector.broadcast %215 : vector<16x1xf32> to vector<16x256xf32>
    %217 = arith.mulf %216, %214 : vector<16x256xf32>
    %cst_70 = arith.constant dense<0.000000e+00> : vector<256xf32>
    %218 = vector.multi_reduction <add>, %217, %cst_70 [0] : vector<16x256xf32> to vector<256xf32>
    %219 = vector.shape_cast %218 : vector<256xf32> to vector<1x256xf32>
    %c4_i32 = arith.constant 4 : i32
    %220 = vector.broadcast %c4_i32 : i32 to vector<16x256xi32>
    %221 = arith.cmpi eq, %107, %220 : vector<16x256xi32>
    %222 = vector.shape_cast %219 : vector<1x256xf32> to vector<1x256xf32>
    %223 = vector.broadcast %222 : vector<1x256xf32> to vector<16x256xf32>
    %224 = arith.select %221, %223, %203 : vector<16x256xi1>, vector<16x256xf32>
    %225 = vector.extract_strided_slice %112 {offsets = [5, 0], sizes = [1, 256], strides = [1, 1]} : vector<16x256xf32> to vector<1x256xf32>
    %226 = vector.broadcast %225 : vector<1x256xf32> to vector<16x256xf32>
    %227 = arith.mulf %226, %106 : vector<16x256xf32>
    %228 = math.exp %227 : vector<16x256xf32>
    %229 = vector.extract_strided_slice %118 {offsets = [0, 5], sizes = [16, 1], strides = [1, 1]} : vector<32x16xf32> to vector<16x1xf32>
    %230 = vector.extract_strided_slice %115 {offsets = [5, 0], sizes = [1, 256], strides = [1, 1]} : vector<16x256xf32> to vector<1x256xf32>
    %231 = vector.broadcast %229 : vector<16x1xf32> to vector<16x256xf32>
    %232 = vector.broadcast %230 : vector<1x256xf32> to vector<16x256xf32>
    %233 = arith.mulf %231, %232 : vector<16x256xf32>
    %234 = arith.mulf %228, %214 : vector<16x256xf32>
    %235 = arith.addf %234, %233 : vector<16x256xf32>
    %236 = vector.extract_strided_slice %118 {offsets = [16, 5], sizes = [16, 1], strides = [1, 1]} : vector<32x16xf32> to vector<16x1xf32>
    %237 = vector.broadcast %236 : vector<16x1xf32> to vector<16x256xf32>
    %238 = arith.mulf %237, %235 : vector<16x256xf32>
    %cst_71 = arith.constant dense<0.000000e+00> : vector<256xf32>
    %239 = vector.multi_reduction <add>, %238, %cst_71 [0] : vector<16x256xf32> to vector<256xf32>
    %240 = vector.shape_cast %239 : vector<256xf32> to vector<1x256xf32>
    %c5_i32 = arith.constant 5 : i32
    %241 = vector.broadcast %c5_i32 : i32 to vector<16x256xi32>
    %242 = arith.cmpi eq, %107, %241 : vector<16x256xi32>
    %243 = vector.shape_cast %240 : vector<1x256xf32> to vector<1x256xf32>
    %244 = vector.broadcast %243 : vector<1x256xf32> to vector<16x256xf32>
    %245 = arith.select %242, %244, %224 : vector<16x256xi1>, vector<16x256xf32>
    %246 = vector.extract_strided_slice %112 {offsets = [6, 0], sizes = [1, 256], strides = [1, 1]} : vector<16x256xf32> to vector<1x256xf32>
    %247 = vector.broadcast %246 : vector<1x256xf32> to vector<16x256xf32>
    %248 = arith.mulf %247, %106 : vector<16x256xf32>
    %249 = math.exp %248 : vector<16x256xf32>
    %250 = vector.extract_strided_slice %118 {offsets = [0, 6], sizes = [16, 1], strides = [1, 1]} : vector<32x16xf32> to vector<16x1xf32>
    %251 = vector.extract_strided_slice %115 {offsets = [6, 0], sizes = [1, 256], strides = [1, 1]} : vector<16x256xf32> to vector<1x256xf32>
    %252 = vector.broadcast %250 : vector<16x1xf32> to vector<16x256xf32>
    %253 = vector.broadcast %251 : vector<1x256xf32> to vector<16x256xf32>
    %254 = arith.mulf %252, %253 : vector<16x256xf32>
    %255 = arith.mulf %249, %235 : vector<16x256xf32>
    %256 = arith.addf %255, %254 : vector<16x256xf32>
    %257 = vector.extract_strided_slice %118 {offsets = [16, 6], sizes = [16, 1], strides = [1, 1]} : vector<32x16xf32> to vector<16x1xf32>
    %258 = vector.broadcast %257 : vector<16x1xf32> to vector<16x256xf32>
    %259 = arith.mulf %258, %256 : vector<16x256xf32>
    %cst_72 = arith.constant dense<0.000000e+00> : vector<256xf32>
    %260 = vector.multi_reduction <add>, %259, %cst_72 [0] : vector<16x256xf32> to vector<256xf32>
    %261 = vector.shape_cast %260 : vector<256xf32> to vector<1x256xf32>
    %c6_i32 = arith.constant 6 : i32
    %262 = vector.broadcast %c6_i32 : i32 to vector<16x256xi32>
    %263 = arith.cmpi eq, %107, %262 : vector<16x256xi32>
    %264 = vector.shape_cast %261 : vector<1x256xf32> to vector<1x256xf32>
    %265 = vector.broadcast %264 : vector<1x256xf32> to vector<16x256xf32>
    %266 = arith.select %263, %265, %245 : vector<16x256xi1>, vector<16x256xf32>
    %267 = vector.extract_strided_slice %112 {offsets = [7, 0], sizes = [1, 256], strides = [1, 1]} : vector<16x256xf32> to vector<1x256xf32>
    %268 = vector.broadcast %267 : vector<1x256xf32> to vector<16x256xf32>
    %269 = arith.mulf %268, %106 : vector<16x256xf32>
    %270 = math.exp %269 : vector<16x256xf32>
    %271 = vector.extract_strided_slice %118 {offsets = [0, 7], sizes = [16, 1], strides = [1, 1]} : vector<32x16xf32> to vector<16x1xf32>
    %272 = vector.extract_strided_slice %115 {offsets = [7, 0], sizes = [1, 256], strides = [1, 1]} : vector<16x256xf32> to vector<1x256xf32>
    %273 = vector.broadcast %271 : vector<16x1xf32> to vector<16x256xf32>
    %274 = vector.broadcast %272 : vector<1x256xf32> to vector<16x256xf32>
    %275 = arith.mulf %273, %274 : vector<16x256xf32>
    %276 = arith.mulf %270, %256 : vector<16x256xf32>
    %277 = arith.addf %276, %275 : vector<16x256xf32>
    %278 = vector.extract_strided_slice %118 {offsets = [16, 7], sizes = [16, 1], strides = [1, 1]} : vector<32x16xf32> to vector<16x1xf32>
    %279 = vector.broadcast %278 : vector<16x1xf32> to vector<16x256xf32>
    %280 = arith.mulf %279, %277 : vector<16x256xf32>
    %cst_73 = arith.constant dense<0.000000e+00> : vector<256xf32>
    %281 = vector.multi_reduction <add>, %280, %cst_73 [0] : vector<16x256xf32> to vector<256xf32>
    %282 = vector.shape_cast %281 : vector<256xf32> to vector<1x256xf32>
    %c7_i32 = arith.constant 7 : i32
    %283 = vector.broadcast %c7_i32 : i32 to vector<16x256xi32>
    %284 = arith.cmpi eq, %107, %283 : vector<16x256xi32>
    %285 = vector.shape_cast %282 : vector<1x256xf32> to vector<1x256xf32>
    %286 = vector.broadcast %285 : vector<1x256xf32> to vector<16x256xf32>
    %287 = arith.select %284, %286, %266 : vector<16x256xi1>, vector<16x256xf32>
    %288 = vector.extract_strided_slice %112 {offsets = [8, 0], sizes = [1, 256], strides = [1, 1]} : vector<16x256xf32> to vector<1x256xf32>
    %289 = vector.broadcast %288 : vector<1x256xf32> to vector<16x256xf32>
    %290 = arith.mulf %289, %106 : vector<16x256xf32>
    %291 = math.exp %290 : vector<16x256xf32>
    %292 = vector.extract_strided_slice %118 {offsets = [0, 8], sizes = [16, 1], strides = [1, 1]} : vector<32x16xf32> to vector<16x1xf32>
    %293 = vector.extract_strided_slice %115 {offsets = [8, 0], sizes = [1, 256], strides = [1, 1]} : vector<16x256xf32> to vector<1x256xf32>
    %294 = vector.broadcast %292 : vector<16x1xf32> to vector<16x256xf32>
    %295 = vector.broadcast %293 : vector<1x256xf32> to vector<16x256xf32>
    %296 = arith.mulf %294, %295 : vector<16x256xf32>
    %297 = arith.mulf %291, %277 : vector<16x256xf32>
    %298 = arith.addf %297, %296 : vector<16x256xf32>
    %299 = vector.extract_strided_slice %118 {offsets = [16, 8], sizes = [16, 1], strides = [1, 1]} : vector<32x16xf32> to vector<16x1xf32>
    %300 = vector.broadcast %299 : vector<16x1xf32> to vector<16x256xf32>
    %301 = arith.mulf %300, %298 : vector<16x256xf32>
    %cst_74 = arith.constant dense<0.000000e+00> : vector<256xf32>
    %302 = vector.multi_reduction <add>, %301, %cst_74 [0] : vector<16x256xf32> to vector<256xf32>
    %303 = vector.shape_cast %302 : vector<256xf32> to vector<1x256xf32>
    %c8_i32_75 = arith.constant 8 : i32
    %304 = vector.broadcast %c8_i32_75 : i32 to vector<16x256xi32>
    %305 = arith.cmpi eq, %107, %304 : vector<16x256xi32>
    %306 = vector.shape_cast %303 : vector<1x256xf32> to vector<1x256xf32>
    %307 = vector.broadcast %306 : vector<1x256xf32> to vector<16x256xf32>
    %308 = arith.select %305, %307, %287 : vector<16x256xi1>, vector<16x256xf32>
    %309 = vector.extract_strided_slice %112 {offsets = [9, 0], sizes = [1, 256], strides = [1, 1]} : vector<16x256xf32> to vector<1x256xf32>
    %310 = vector.broadcast %309 : vector<1x256xf32> to vector<16x256xf32>
    %311 = arith.mulf %310, %106 : vector<16x256xf32>
    %312 = math.exp %311 : vector<16x256xf32>
    %313 = vector.extract_strided_slice %118 {offsets = [0, 9], sizes = [16, 1], strides = [1, 1]} : vector<32x16xf32> to vector<16x1xf32>
    %314 = vector.extract_strided_slice %115 {offsets = [9, 0], sizes = [1, 256], strides = [1, 1]} : vector<16x256xf32> to vector<1x256xf32>
    %315 = vector.broadcast %313 : vector<16x1xf32> to vector<16x256xf32>
    %316 = vector.broadcast %314 : vector<1x256xf32> to vector<16x256xf32>
    %317 = arith.mulf %315, %316 : vector<16x256xf32>
    %318 = arith.mulf %312, %298 : vector<16x256xf32>
    %319 = arith.addf %318, %317 : vector<16x256xf32>
    %320 = vector.extract_strided_slice %118 {offsets = [16, 9], sizes = [16, 1], strides = [1, 1]} : vector<32x16xf32> to vector<16x1xf32>
    %321 = vector.broadcast %320 : vector<16x1xf32> to vector<16x256xf32>
    %322 = arith.mulf %321, %319 : vector<16x256xf32>
    %cst_76 = arith.constant dense<0.000000e+00> : vector<256xf32>
    %323 = vector.multi_reduction <add>, %322, %cst_76 [0] : vector<16x256xf32> to vector<256xf32>
    %324 = vector.shape_cast %323 : vector<256xf32> to vector<1x256xf32>
    %c9_i32 = arith.constant 9 : i32
    %325 = vector.broadcast %c9_i32 : i32 to vector<16x256xi32>
    %326 = arith.cmpi eq, %107, %325 : vector<16x256xi32>
    %327 = vector.shape_cast %324 : vector<1x256xf32> to vector<1x256xf32>
    %328 = vector.broadcast %327 : vector<1x256xf32> to vector<16x256xf32>
    %329 = arith.select %326, %328, %308 : vector<16x256xi1>, vector<16x256xf32>
    %330 = vector.extract_strided_slice %112 {offsets = [10, 0], sizes = [1, 256], strides = [1, 1]} : vector<16x256xf32> to vector<1x256xf32>
    %331 = vector.broadcast %330 : vector<1x256xf32> to vector<16x256xf32>
    %332 = arith.mulf %331, %106 : vector<16x256xf32>
    %333 = math.exp %332 : vector<16x256xf32>
    %334 = vector.extract_strided_slice %118 {offsets = [0, 10], sizes = [16, 1], strides = [1, 1]} : vector<32x16xf32> to vector<16x1xf32>
    %335 = vector.extract_strided_slice %115 {offsets = [10, 0], sizes = [1, 256], strides = [1, 1]} : vector<16x256xf32> to vector<1x256xf32>
    %336 = vector.broadcast %334 : vector<16x1xf32> to vector<16x256xf32>
    %337 = vector.broadcast %335 : vector<1x256xf32> to vector<16x256xf32>
    %338 = arith.mulf %336, %337 : vector<16x256xf32>
    %339 = arith.mulf %333, %319 : vector<16x256xf32>
    %340 = arith.addf %339, %338 : vector<16x256xf32>
    %341 = vector.extract_strided_slice %118 {offsets = [16, 10], sizes = [16, 1], strides = [1, 1]} : vector<32x16xf32> to vector<16x1xf32>
    %342 = vector.broadcast %341 : vector<16x1xf32> to vector<16x256xf32>
    %343 = arith.mulf %342, %340 : vector<16x256xf32>
    %cst_77 = arith.constant dense<0.000000e+00> : vector<256xf32>
    %344 = vector.multi_reduction <add>, %343, %cst_77 [0] : vector<16x256xf32> to vector<256xf32>
    %345 = vector.shape_cast %344 : vector<256xf32> to vector<1x256xf32>
    %c10_i32 = arith.constant 10 : i32
    %346 = vector.broadcast %c10_i32 : i32 to vector<16x256xi32>
    %347 = arith.cmpi eq, %107, %346 : vector<16x256xi32>
    %348 = vector.shape_cast %345 : vector<1x256xf32> to vector<1x256xf32>
    %349 = vector.broadcast %348 : vector<1x256xf32> to vector<16x256xf32>
    %350 = arith.select %347, %349, %329 : vector<16x256xi1>, vector<16x256xf32>
    %351 = vector.extract_strided_slice %112 {offsets = [11, 0], sizes = [1, 256], strides = [1, 1]} : vector<16x256xf32> to vector<1x256xf32>
    %352 = vector.broadcast %351 : vector<1x256xf32> to vector<16x256xf32>
    %353 = arith.mulf %352, %106 : vector<16x256xf32>
    %354 = math.exp %353 : vector<16x256xf32>
    %355 = vector.extract_strided_slice %118 {offsets = [0, 11], sizes = [16, 1], strides = [1, 1]} : vector<32x16xf32> to vector<16x1xf32>
    %356 = vector.extract_strided_slice %115 {offsets = [11, 0], sizes = [1, 256], strides = [1, 1]} : vector<16x256xf32> to vector<1x256xf32>
    %357 = vector.broadcast %355 : vector<16x1xf32> to vector<16x256xf32>
    %358 = vector.broadcast %356 : vector<1x256xf32> to vector<16x256xf32>
    %359 = arith.mulf %357, %358 : vector<16x256xf32>
    %360 = arith.mulf %354, %340 : vector<16x256xf32>
    %361 = arith.addf %360, %359 : vector<16x256xf32>
    %362 = vector.extract_strided_slice %118 {offsets = [16, 11], sizes = [16, 1], strides = [1, 1]} : vector<32x16xf32> to vector<16x1xf32>
    %363 = vector.broadcast %362 : vector<16x1xf32> to vector<16x256xf32>
    %364 = arith.mulf %363, %361 : vector<16x256xf32>
    %cst_78 = arith.constant dense<0.000000e+00> : vector<256xf32>
    %365 = vector.multi_reduction <add>, %364, %cst_78 [0] : vector<16x256xf32> to vector<256xf32>
    %366 = vector.shape_cast %365 : vector<256xf32> to vector<1x256xf32>
    %c11_i32 = arith.constant 11 : i32
    %367 = vector.broadcast %c11_i32 : i32 to vector<16x256xi32>
    %368 = arith.cmpi eq, %107, %367 : vector<16x256xi32>
    %369 = vector.shape_cast %366 : vector<1x256xf32> to vector<1x256xf32>
    %370 = vector.broadcast %369 : vector<1x256xf32> to vector<16x256xf32>
    %371 = arith.select %368, %370, %350 : vector<16x256xi1>, vector<16x256xf32>
    %372 = vector.extract_strided_slice %112 {offsets = [12, 0], sizes = [1, 256], strides = [1, 1]} : vector<16x256xf32> to vector<1x256xf32>
    %373 = vector.broadcast %372 : vector<1x256xf32> to vector<16x256xf32>
    %374 = arith.mulf %373, %106 : vector<16x256xf32>
    %375 = math.exp %374 : vector<16x256xf32>
    %376 = vector.extract_strided_slice %118 {offsets = [0, 12], sizes = [16, 1], strides = [1, 1]} : vector<32x16xf32> to vector<16x1xf32>
    %377 = vector.extract_strided_slice %115 {offsets = [12, 0], sizes = [1, 256], strides = [1, 1]} : vector<16x256xf32> to vector<1x256xf32>
    %378 = vector.broadcast %376 : vector<16x1xf32> to vector<16x256xf32>
    %379 = vector.broadcast %377 : vector<1x256xf32> to vector<16x256xf32>
    %380 = arith.mulf %378, %379 : vector<16x256xf32>
    %381 = arith.mulf %375, %361 : vector<16x256xf32>
    %382 = arith.addf %381, %380 : vector<16x256xf32>
    %383 = vector.extract_strided_slice %118 {offsets = [16, 12], sizes = [16, 1], strides = [1, 1]} : vector<32x16xf32> to vector<16x1xf32>
    %384 = vector.broadcast %383 : vector<16x1xf32> to vector<16x256xf32>
    %385 = arith.mulf %384, %382 : vector<16x256xf32>
    %cst_79 = arith.constant dense<0.000000e+00> : vector<256xf32>
    %386 = vector.multi_reduction <add>, %385, %cst_79 [0] : vector<16x256xf32> to vector<256xf32>
    %387 = vector.shape_cast %386 : vector<256xf32> to vector<1x256xf32>
    %c12_i32 = arith.constant 12 : i32
    %388 = vector.broadcast %c12_i32 : i32 to vector<16x256xi32>
    %389 = arith.cmpi eq, %107, %388 : vector<16x256xi32>
    %390 = vector.shape_cast %387 : vector<1x256xf32> to vector<1x256xf32>
    %391 = vector.broadcast %390 : vector<1x256xf32> to vector<16x256xf32>
    %392 = arith.select %389, %391, %371 : vector<16x256xi1>, vector<16x256xf32>
    %393 = vector.extract_strided_slice %112 {offsets = [13, 0], sizes = [1, 256], strides = [1, 1]} : vector<16x256xf32> to vector<1x256xf32>
    %394 = vector.broadcast %393 : vector<1x256xf32> to vector<16x256xf32>
    %395 = arith.mulf %394, %106 : vector<16x256xf32>
    %396 = math.exp %395 : vector<16x256xf32>
    %397 = vector.extract_strided_slice %118 {offsets = [0, 13], sizes = [16, 1], strides = [1, 1]} : vector<32x16xf32> to vector<16x1xf32>
    %398 = vector.extract_strided_slice %115 {offsets = [13, 0], sizes = [1, 256], strides = [1, 1]} : vector<16x256xf32> to vector<1x256xf32>
    %399 = vector.broadcast %397 : vector<16x1xf32> to vector<16x256xf32>
    %400 = vector.broadcast %398 : vector<1x256xf32> to vector<16x256xf32>
    %401 = arith.mulf %399, %400 : vector<16x256xf32>
    %402 = arith.mulf %396, %382 : vector<16x256xf32>
    %403 = arith.addf %402, %401 : vector<16x256xf32>
    %404 = vector.extract_strided_slice %118 {offsets = [16, 13], sizes = [16, 1], strides = [1, 1]} : vector<32x16xf32> to vector<16x1xf32>
    %405 = vector.broadcast %404 : vector<16x1xf32> to vector<16x256xf32>
    %406 = arith.mulf %405, %403 : vector<16x256xf32>
    %cst_80 = arith.constant dense<0.000000e+00> : vector<256xf32>
    %407 = vector.multi_reduction <add>, %406, %cst_80 [0] : vector<16x256xf32> to vector<256xf32>
    %408 = vector.shape_cast %407 : vector<256xf32> to vector<1x256xf32>
    %c13_i32 = arith.constant 13 : i32
    %409 = vector.broadcast %c13_i32 : i32 to vector<16x256xi32>
    %410 = arith.cmpi eq, %107, %409 : vector<16x256xi32>
    %411 = vector.shape_cast %408 : vector<1x256xf32> to vector<1x256xf32>
    %412 = vector.broadcast %411 : vector<1x256xf32> to vector<16x256xf32>
    %413 = arith.select %410, %412, %392 : vector<16x256xi1>, vector<16x256xf32>
    %414 = vector.extract_strided_slice %112 {offsets = [14, 0], sizes = [1, 256], strides = [1, 1]} : vector<16x256xf32> to vector<1x256xf32>
    %415 = vector.broadcast %414 : vector<1x256xf32> to vector<16x256xf32>
    %416 = arith.mulf %415, %106 : vector<16x256xf32>
    %417 = math.exp %416 : vector<16x256xf32>
    %418 = vector.extract_strided_slice %118 {offsets = [0, 14], sizes = [16, 1], strides = [1, 1]} : vector<32x16xf32> to vector<16x1xf32>
    %419 = vector.extract_strided_slice %115 {offsets = [14, 0], sizes = [1, 256], strides = [1, 1]} : vector<16x256xf32> to vector<1x256xf32>
    %420 = vector.broadcast %418 : vector<16x1xf32> to vector<16x256xf32>
    %421 = vector.broadcast %419 : vector<1x256xf32> to vector<16x256xf32>
    %422 = arith.mulf %420, %421 : vector<16x256xf32>
    %423 = arith.mulf %417, %403 : vector<16x256xf32>
    %424 = arith.addf %423, %422 : vector<16x256xf32>
    %425 = vector.extract_strided_slice %118 {offsets = [16, 14], sizes = [16, 1], strides = [1, 1]} : vector<32x16xf32> to vector<16x1xf32>
    %426 = vector.broadcast %425 : vector<16x1xf32> to vector<16x256xf32>
    %427 = arith.mulf %426, %424 : vector<16x256xf32>
    %cst_81 = arith.constant dense<0.000000e+00> : vector<256xf32>
    %428 = vector.multi_reduction <add>, %427, %cst_81 [0] : vector<16x256xf32> to vector<256xf32>
    %429 = vector.shape_cast %428 : vector<256xf32> to vector<1x256xf32>
    %c14_i32 = arith.constant 14 : i32
    %430 = vector.broadcast %c14_i32 : i32 to vector<16x256xi32>
    %431 = arith.cmpi eq, %107, %430 : vector<16x256xi32>
    %432 = vector.shape_cast %429 : vector<1x256xf32> to vector<1x256xf32>
    %433 = vector.broadcast %432 : vector<1x256xf32> to vector<16x256xf32>
    %434 = arith.select %431, %433, %413 : vector<16x256xi1>, vector<16x256xf32>
    %435 = vector.extract_strided_slice %112 {offsets = [15, 0], sizes = [1, 256], strides = [1, 1]} : vector<16x256xf32> to vector<1x256xf32>
    %436 = vector.broadcast %435 : vector<1x256xf32> to vector<16x256xf32>
    %437 = arith.mulf %436, %106 : vector<16x256xf32>
    %438 = math.exp %437 : vector<16x256xf32>
    %439 = vector.extract_strided_slice %118 {offsets = [0, 15], sizes = [16, 1], strides = [1, 1]} : vector<32x16xf32> to vector<16x1xf32>
    %440 = vector.extract_strided_slice %115 {offsets = [15, 0], sizes = [1, 256], strides = [1, 1]} : vector<16x256xf32> to vector<1x256xf32>
    %441 = vector.broadcast %439 : vector<16x1xf32> to vector<16x256xf32>
    %442 = vector.broadcast %440 : vector<1x256xf32> to vector<16x256xf32>
    %443 = arith.mulf %441, %442 : vector<16x256xf32>
    %444 = arith.mulf %438, %424 : vector<16x256xf32>
    %445 = arith.addf %444, %443 : vector<16x256xf32>
    %446 = vector.extract_strided_slice %118 {offsets = [16, 15], sizes = [16, 1], strides = [1, 1]} : vector<32x16xf32> to vector<16x1xf32>
    %447 = vector.broadcast %446 : vector<16x1xf32> to vector<16x256xf32>
    %448 = arith.mulf %447, %445 : vector<16x256xf32>
    %cst_82 = arith.constant dense<0.000000e+00> : vector<256xf32>
    %449 = vector.multi_reduction <add>, %448, %cst_82 [0] : vector<16x256xf32> to vector<256xf32>
    %450 = vector.shape_cast %449 : vector<256xf32> to vector<1x256xf32>
    %c15_i32 = arith.constant 15 : i32
    %451 = vector.broadcast %c15_i32 : i32 to vector<16x256xi32>
    %452 = arith.cmpi eq, %107, %451 : vector<16x256xi32>
    %453 = vector.shape_cast %450 : vector<1x256xf32> to vector<1x256xf32>
    %454 = vector.broadcast %453 : vector<1x256xf32> to vector<16x256xf32>
    %455 = arith.select %452, %454, %434 : vector<16x256xi1>, vector<16x256xf32>
    %456 = arith.index_cast %110 : i32 to index
    %c0_83 = arith.constant 0 : index
    %457 = vector.load %arg24[%456, %c0_83] : memref<16x256xf32, #tpu.memory_space<vmem>>, vector<16x256xf32>
    tpu.vector_store %arg24[%456, %c0_83], %455 {strides = array<i32>} : memref<16x256xf32, #tpu.memory_space<vmem>>, vector<16x256xf32>,
    %c1_i32_84 = arith.constant 1 : i32
    %c0_85 = arith.constant 0 : index
    %c0_86 = arith.constant 0 : index
    %458 = vector.load %arg19[%c0_85, %c0_86] : memref<16x256xf32, #tpu.memory_space<vmem>>, vector<16x256xf32>
    tpu.vector_store %arg19[%c0_85, %c0_86], %445 {strides = array<i32>} : memref<16x256xf32, #tpu.memory_space<vmem>>, vector<16x256xf32>,
    %c0_87 = arith.constant 0 : index
    %c0_88 = arith.constant 0 : index
    %459 = vector.load %arg20[%c0_87, %c0_88] : memref<16x128xbf16, #tpu.memory_space<vmem>>, vector<16x128xbf16>
    %c0_89 = arith.constant 0 : index
    %c0_90 = arith.constant 0 : index
    %460 = vector.load %arg7[%c0_89, %c0_90] : memref<128x256xbf16, #tpu.memory_space<vmem>>, vector<128x256xbf16>
    %cst_91 = arith.constant dense<0.000000e+00> : vector<16x256xf32>
    %461 = tpu.matmul %459, %460, %cst_91 {dimension_numbers = #tpu.dot_dimension_numbers<[1], [0], [0], [1], [0, 0, 1, 1], [], []>} : vector<16x128xbf16>, vector<128x256xbf16>, vector<16x256xf32> -> vector<16x256xf32>
    %c0_92 = arith.constant 0 : index
    %c0_93 = arith.constant 0 : index
    %462 = vector.load %arg24[%c0_92, %c0_93] : memref<16x256xf32, #tpu.memory_space<vmem>>, vector<16x256xf32>
    %c0_94 = arith.constant 0 : index
    %c0_95 = arith.constant 0 : index
    %463 = vector.load %arg22[%c0_94, %c0_95] : memref<16x256xf32, #tpu.memory_space<vmem>>, vector<16x256xf32>
    %c0_96 = arith.constant 0 : index
    %c0_97 = arith.constant 0 : index
    %464 = vector.load %arg14[%c0_96, %c0_97] : memref<1x256xf32, #tpu.memory_space<vmem>>, vector<1x256xf32>
    %465 = vector.broadcast %464 : vector<1x256xf32> to vector<16x256xf32>
    %466 = arith.mulf %463, %465 : vector<16x256xf32>
    %467 = arith.addf %462, %466 : vector<16x256xf32>
    %468 = arith.negf %461 : vector<16x256xf32>
    %469 = math.exp %468 : vector<16x256xf32>
    %cst_98 = arith.constant 1.000000e+00 : f32
    %470 = vector.broadcast %cst_98 : f32 to vector<16x256xf32>
    %471 = arith.addf %470, %469 : vector<16x256xf32>
    %472 = arith.divf %470, %471 : vector<16x256xf32>
    %473 = arith.mulf %461, %472 : vector<16x256xf32>
    %474 = arith.mulf %467, %473 : vector<16x256xf32>
    %475 = arith.truncf %474 : vector<16x256xf32> to vector<16x256xbf16>
    %c0_99 = arith.constant 0 : index
    %c0_100 = arith.constant 0 : index
    %476 = vector.load %arg15[%c0_99, %c0_100] : memref<256x128xbf16, #tpu.memory_space<vmem>>, vector<256x128xbf16>
    %cst_101 = arith.constant dense<0.000000e+00> : vector<16x128xf32>
    %477 = tpu.matmul %475, %476, %cst_101 {dimension_numbers = #tpu.dot_dimension_numbers<[1], [0], [0], [1], [0, 0, 1, 1], [], []>} : vector<16x256xbf16>, vector<256x128xbf16>, vector<16x128xf32> -> vector<16x128xf32>
    %c0_102 = arith.constant 0 : index
    %c0_103 = arith.constant 0 : index
    %c0_104 = arith.constant 0 : index
    %478 = vector.load %arg16[%c0_102, %c0_103, %c0_104] : memref<1x16x128xf32, #tpu.memory_space<vmem>>, vector<1x16x128xf32>
    %479 = vector.shape_cast %478 : vector<1x16x128xf32> to vector<16x128xf32>
    %480 = vector.shape_cast %477 : vector<16x128xf32> to vector<1x16x128xf32>
    tpu.vector_store %arg16[%c0_102, %c0_103, %c0_104], %480 {strides = array<i32>} : memref<1x16x128xf32, #tpu.memory_space<vmem>>, vector<1x16x128xf32>,
    return
  }
  func.func @transform_0(%arg0: i32, %arg1: i32) -> (i32, i32, i32) {
    %c0_i32 = arith.constant 0 : i32
    %c0_i32_0 = arith.constant 0 : i32
    return %arg0, %arg1, %c0_i32 : i32, i32, i32
  }
  func.func @transform_1(%arg0: i32, %arg1: i32) -> (i32, i32, i32) {
    %c0_i32 = arith.constant 0 : i32
    %c0_i32_0 = arith.constant 0 : i32
    return %arg0, %arg1, %c0_i32 : i32, i32, i32
  }
  func.func @transform_2(%arg0: i32, %arg1: i32) -> (i32, i32) {
    %c0_i32 = arith.constant 0 : i32
    %c0_i32_0 = arith.constant 0 : i32
    %c0_i32_1 = arith.constant 0 : i32
    return %c0_i32, %c0_i32_0 : i32, i32
  }
  func.func @transform_3(%arg0: i32, %arg1: i32) -> (i32, i32) {
    %c0_i32 = arith.constant 0 : i32
    %c0_i32_0 = arith.constant 0 : i32
    %c0_i32_1 = arith.constant 0 : i32
    return %c0_i32, %c0_i32_0 : i32, i32
  }
  func.func @transform_4(%arg0: i32, %arg1: i32) -> (i32, i32) {
    %c0_i32 = arith.constant 0 : i32
    %c0_i32_0 = arith.constant 0 : i32
    %c0_i32_1 = arith.constant 0 : i32
    return %c0_i32, %c0_i32_0 : i32, i32
  }
  func.func @transform_5(%arg0: i32, %arg1: i32) -> (i32, i32) {
    %c0_i32 = arith.constant 0 : i32
    %c0_i32_0 = arith.constant 0 : i32
    %c0_i32_1 = arith.constant 0 : i32
    return %c0_i32, %c0_i32_0 : i32, i32
  }
  func.func @transform_6(%arg0: i32, %arg1: i32) -> (i32, i32) {
    %c0_i32 = arith.constant 0 : i32
    %c0_i32_0 = arith.constant 0 : i32
    %c0_i32_1 = arith.constant 0 : i32
    return %c0_i32, %c0_i32_0 : i32, i32
  }
  func.func @transform_7(%arg0: i32, %arg1: i32) -> (i32, i32) {
    %c0_i32 = arith.constant 0 : i32
    %c0_i32_0 = arith.constant 0 : i32
    %c0_i32_1 = arith.constant 0 : i32
    return %c0_i32, %c0_i32_0 : i32, i32
  }
  func.func @transform_8(%arg0: i32, %arg1: i32) -> (i32, i32) {
    %c0_i32 = arith.constant 0 : i32
    %c0_i32_0 = arith.constant 0 : i32
    %c0_i32_1 = arith.constant 0 : i32
    return %c0_i32, %c0_i32_0 : i32, i32
  }
  func.func @transform_9(%arg0: i32, %arg1: i32) -> (i32, i32) {
    %c0_i32 = arith.constant 0 : i32
    %c0_i32_0 = arith.constant 0 : i32
    %c0_i32_1 = arith.constant 0 : i32
    return %c0_i32, %c0_i32_0 : i32, i32
  }
  func.func @transform_10(%arg0: i32, %arg1: i32) -> (i32, i32) {
    %c0_i32 = arith.constant 0 : i32
    %c0_i32_0 = arith.constant 0 : i32
    %c0_i32_1 = arith.constant 0 : i32
    return %c0_i32, %c0_i32_0 : i32, i32
  }
  func.func @transform_11(%arg0: i32, %arg1: i32) -> (i32, i32) {
    %c0_i32 = arith.constant 0 : i32
    %c0_i32_0 = arith.constant 0 : i32
    %c0_i32_1 = arith.constant 0 : i32
    return %c0_i32, %c0_i32_0 : i32, i32
  }
  func.func @transform_12(%arg0: i32, %arg1: i32) -> (i32, i32) {
    %c0_i32 = arith.constant 0 : i32
    %c0_i32_0 = arith.constant 0 : i32
    %c0_i32_1 = arith.constant 0 : i32
    return %c0_i32, %c0_i32_0 : i32, i32
  }
  func.func @transform_13(%arg0: i32, %arg1: i32) -> (i32, i32) {
    %c0_i32 = arith.constant 0 : i32
    %c0_i32_0 = arith.constant 0 : i32
    %c0_i32_1 = arith.constant 0 : i32
    return %c0_i32, %c0_i32_0 : i32, i32
  }
  func.func @transform_14(%arg0: i32, %arg1: i32) -> (i32, i32, i32) {
    %c0_i32 = arith.constant 0 : i32
    %c0_i32_0 = arith.constant 0 : i32
    return %arg0, %arg1, %c0_i32 : i32, i32, i32
  }
  func.func @transform_15(%arg0: i32, %arg1: i32) -> (i32, i32, i32) {
    %c0_i32 = arith.constant 0 : i32
    %c0_i32_0 = arith.constant 0 : i32
    return %arg0, %arg1, %c0_i32 : i32, i32, i32
  }
}

</mosaic_0001>

<bundles_post_ra>
// kernel: tpu_custom_call.1
= control target key start
LH: loop header
LB: loop body
LE: loop exit
PB: predicated region body
PF: predicated region fallthrough
CT: control target
= control target key end

     0   :  { %s6977_s0 = inlined_call_operand.hbm [shape: f32[2,16,128], index: 0, kind: input, shape index: {}]   ;;  %s6978_s1 = inlined_call_operand.hbm [shape: f32[2,16,128], index: 1, kind: input, shape index: {}]   ;;  %s6979_s2 = inlined_call_operand.hbm [shape: f32[1,128], index: 2, kind: input, shape index: {}]   ;;  %s6980_s3 = inlined_call_operand.hbm [shape: f32[1,128], index: 3, kind: input, shape index: {}]   ;;  %s6981_s4 = inlined_call_operand.hbm [shape: bf16[128,256], index: 4, kind: input, shape index: {}]   ;;  %s6982_s5 = inlined_call_operand.hbm [shape: bf16[128,256], index: 5, kind: input, shape index: {}]   ;;  %s6983_s6 = inlined_call_operand.hbm [shape: f32[4,256], index: 6, kind: input, shape index: {}]   ;;  %s6984_s7 = inlined_call_operand.hbm [shape: f32[1,256], index: 7, kind: input, shape index: {}]   ;;  %s6985_s8 = inlined_call_operand.hbm [shape: bf16[256,40], index: 8, kind: input, shape index: {}]   ;;  %s6986_s9 = inlined_call_operand.hbm [shape: f32[8,256], index: 9, kind: input, shape index: {}]   ;;  %s6987_s10 = inlined_call_operand.hbm [shape: f32[1,256], index: 10, kind: input, shape index: {}]   ;;  %s6988_s11 = inlined_call_operand.hbm [shape: f32[16,256], index: 11, kind: input, shape index: {}]   ;;  %s6989_s12 = inlined_call_operand.hbm [shape: f32[1,256], index: 12, kind: input, shape index: {}]   ;;  %s6990_s13 = inlined_call_operand.hbm [shape: bf16[256,128], index: 13, kind: input, shape index: {}]   ;;  %s6991_s14 = inlined_call_operand.hbm [shape: f32[2,16,128], index: 14, kind: output, shape index: {0}]   ;;  %s6992_s15 = inlined_call_operand.hbm [shape: f32[2,16,128], index: 15, kind: output, shape index: {1}]  }
   0x1   :  { %7105 = sst [smem:[#allocation114_spill]] %s6977_s0 }
   0x2   :  { %7106 = sst [smem:[#allocation115_spill]] %s6978_s1 }
   0x3   :  { %7107 = sst [smem:[#allocation116_spill]] %s6979_s2 }
   0x4   :  { %7108 = sst [smem:[#allocation117_spill]] %s6980_s3 }
   0x5   :  { %7109 = sst [smem:[#allocation118_spill]] %s6981_s4 }
   0x6   :  { %7110 = sst [smem:[#allocation119_spill]] %s6982_s5 }
   0x7   :  { %7111 = sst [smem:[#allocation120_spill]] %s6983_s6 }
   0x8   :  { %7112 = sst [smem:[#allocation121_spill]] %s6984_s7 }
   0x9   :  { %7113 = sst [smem:[#allocation122_spill]] %s6985_s8 }
   0xa   :  { %7114 = sst [smem:[#allocation123_spill]] %s6986_s9 }
   0xb   :  { %7115 = sst [smem:[#allocation124_spill]] %s6987_s10 }
   0xc   :  { %7116 = sst [smem:[#allocation125_spill]] %s6991_s14 }
   0xd   :  { %7117 = sst [smem:[#allocation126_spill]] %s6992_s15 }
   0xe   :  { %21 = vsyncpa [#allocation10], 0 }
   0xf   :  { %23 = vsyncpa [#allocation10 + $0x1], 0 }
  0x10   :  { %24 = vsyncpa [#allocation13], 0 }
  0x11   :  { %26 = vsyncpa [#allocation13 + $0x1], 0 }
  0x12   :  { %27 = vsyncpa [#allocation16], 0 }
  0x13   :  { %28 = vsyncpa [#allocation19], 0 }
  0x14   :  { %29 = vsyncpa [#allocation22], 0 }
  0x15   :  { %30 = vsyncpa [#allocation25], 0 }
  0x16   :  { %31 = vsyncpa [#allocation28], 0 }
  0x17   :  { %32 = vsyncpa [#allocation31], 0 }
  0x18   :  { %33 = vsyncpa [#allocation11], 0 }
  0x19   :  { %35 = vsyncpa [#allocation11 + $0x1], 0 }
  0x1a   :  { %36 = vsyncpa [#allocation34], 0 }
  0x1b   :  { %38 = vsyncpa [#allocation34 + $0x1], 0  ;;  %s5117_s18 = smov 0   ;;  %s5119_s19 = smov 0  }
  0x1c   :  { %s5121_s20 = smov 0   ;;  %s5123_s21 = smov 0  }
  0x1d   :  { %s5125_s22 = smov 0   ;;  %s5127_s23 = smov 0  }
  0x1e LB: > { %7118 = sst [smem:[#allocation46_spill]] %s4974_s18  ;;  %s5148_s24 = sadd.s32 4294967295, %s4994_s23   ;;  %s4994_s23 = sphi %s5127_s23, %s44_s23   ;;  %s4990_s22 = sphi %s5125_s22, %s7362_s22   ;;  %s4986_s21 = sphi %s5123_s21, %s7361_s21   ;;  %s4982_s20 = sphi %s5121_s20, %s7360_s20   ;;  %s4978_s19 = sphi %s5119_s19, %s7359_s19   ;;  %s4974_s18 = sphi %s5117_s18, %s7358_s18  }
  0x1f   : > { %7119 = sst [smem:[#allocation47_spill]] %s4978_s19  ;;  %p3690_p0 = scmp.ge.s32.totalorder %s4994_s23, 1 }
  0x20   : > { %7120 = sst [smem:[#allocation48_spill]] %s4986_s21  ;;  %p6998_p1 = scmp.eq.s32.totalorder %s5148_s24, 0 }
  0x21   : > { %7121 = sst [smem:[#allocation49_spill]] %s5148_s24  ;;  %p425_p2 = scmp.lt.s32.totalorder %s4994_s23, 3 }
  0x22   : > { %s4996_s26 = smov [#allocation14]   ;;  %s4997_s28 = smov [#allocation15]  }
  0x23   : > { %p5153_p3 = pnand %p3690_p0, %p425_p2  ;;  %s438_s27 = sshll.u32 %s4996_s26, 4  ;;  %s439_s27 = int_to_ptr.vmem [resolvable:$true] %s438_s27 }
  0x24   : > { %s449_s29 = sshll.u32 %s4997_s28, 4  ;;  %s4998_s16 = smov [#allocation18]   ;;  %s5166_s29 = int_to_ptr.vmem [resolvable:$true] %s449_s29 }
  0x25   : > { %s7122_s25 = scalar_select %p5153_p3, 1, 0 }
  0x26   : > { %p3949_p5 = pneg %p5153_p3  ;;  %s5168_s17 = sshll.u32 %s4998_s16, 4  ;;  %s473_s17 = int_to_ptr.vmem [resolvable:$true] %s5168_s17 }
  0x27   : > { %7123 = sst [smem:[#allocation50_spill]] %s7122_s25  ;;  %s7125_s2 = sld [smem:[#allocation116_spill]] }
  0x28   : > { %p5162_p6 = pnand %p3949_p5, %p6998_p1 }
  0x2a   : > { %p5178_p8 = pneg %p5162_p6 }
  0x2d   : > { %s4452_s26 = scalar_lea.hbm %s7125_s2, 16 }
  0x2e   : > { %p4453_p7 = scmp.ne.s32.totalorder %s7125_s2, %s4452_s26  ;;  %p4459_p11 = scmp.lt.u32.totalorder %s4452_s26, %s7125_s2 }
  0x30   : > { %p4455_p9 = pnand %p5178_p8, %p4453_p7 }
  0x32   : > { %p4456_p10 = pneg %p4455_p9 }
  0x34   : > { %p4461_p12 = pnand %p4459_p11, %p4456_p10 }
  0x36   : > { %4464 = shalt.err (!%p4461_p12)
}
  0x37   : > { %s4465_s14 = scalar_lea.vmem %s439_s27, 16  ;;  %s4472_s15 = scalar_lea.vmem %s439_s27, 32 }
  0x38   : > { %p4466_p13 = scmp.ne.s32.totalorder %s439_s27, %s4465_s14  ;;  %p4473_p5 = scmp.lt.s32.totalorder %s439_s27, %s439_s27 }
  0x39   : > { %p4474_p4 = scmp.lt.s32.totalorder %s4472_s15, %s4465_s14 }
  0x3a   : > { %p4468_p0 = pnand %p4466_p13, %p5178_p8 }
  0x3b   : > { %p4475_p1 = por %p4474_p4, %p4473_p5 }
  0x3c   : > { %p4469_p2 = pneg %p4468_p0 }
  0x3e   : > { %p4476_p3 = pnand %p4475_p1, %p4469_p2 }
  0x40   : > { %4479 = shalt.err (!%p4476_p3)
}
  0x41   : > { %3952 = dma.hbm_to_vmem [thread:$0]  (!%p5162_p6), %s7125_s2, 16, %s439_s27, [#allocation13]  }
  0x42   : > { %s7127_s3 = sld [smem:[#allocation117_spill]] }
  0x48   : > { %s4480_s16 = scalar_lea.hbm %s7127_s3, 16 }
  0x49   : > { %p4481_p7 = scmp.ne.s32.totalorder %s7127_s3, %s4480_s16  ;;  %p4487_p1 = scmp.lt.u32.totalorder %s4480_s16, %s7127_s3 }
  0x4b   : > { %p4483_p9 = pnand %p4481_p7, %p5178_p8 }
  0x4d   : > { %p4484_p4 = pneg %p4483_p9 }
  0x4f   : > { %p4489_p3 = pnand %p4487_p1, %p4484_p4 }
  0x51   : > { %4492 = shalt.err (!%p4489_p3)
}
  0x52   : > { %s4493_s27 = scalar_lea.vmem %s5166_s29, 16  ;;  %s4500_s0 = scalar_lea.vmem %s5166_s29, 32 }
  0x53   : > { %p4494_p10 = scmp.ne.s32.totalorder %s5166_s29, %s4493_s27  ;;  %p4501_p13 = scmp.lt.s32.totalorder %s5166_s29, %s5166_s29 }
  0x54   : > { %p4502_p0 = scmp.lt.s32.totalorder %s4500_s0, %s4493_s27 }
  0x55   : > { %p4496_p11 = pnand %p4494_p10, %p5178_p8 }
  0x56   : > { %p4503_p2 = por %p4502_p0, %p4501_p13 }
  0x57   : > { %p4497_p12 = pneg %p4496_p11 }
  0x59   : > { %p4504_p5 = pnand %p4503_p2, %p4497_p12 }
  0x5b   : > { %4507 = shalt.err (!%p4504_p5)
}
  0x5c   : > { %3955 = dma.hbm_to_vmem [thread:$0]  (!%p5162_p6), %s7127_s3, 16, %s5166_s29, [#allocation16]  }
  0x5d   : > { %s7128_s5 = sld [smem:[#allocation119_spill]] }
  0x63   : > { %s4508_s26 = scalar_lea.hbm %s7128_s5, 2048 }
  0x64   : > { %p4509_p7 = scmp.ne.s32.totalorder %s7128_s5, %s4508_s26  ;;  %p4515_p1 = scmp.lt.u32.totalorder %s4508_s26, %s7128_s5 }
  0x66   : > { %p4511_p9 = pnand %p4509_p7, %p5178_p8 }
  0x68   : > { %p4512_p4 = pneg %p4511_p9 }
  0x6a   : > { %p4517_p3 = pnand %p4515_p1, %p4512_p4 }
  0x6c   : > { %4520 = shalt.err (!%p4517_p3)
}
  0x6d   : > { %s4521_s0 = scalar_lea.vmem %s473_s17, 2048  ;;  %p4529_p13 = scmp.lt.s32.totalorder %s473_s17, %s473_s17 }
  0x6e   : > { %p4522_p10 = scmp.ne.s32.totalorder %s473_s17, %s4521_s0  ;;  %p4530_p0 = scmp.lt.s32.totalorder %s4521_s0, %s4521_s0 }
  0x70   : > { %p4524_p11 = pnand %p4522_p10, %p5178_p8  ;;  %p4531_p2 = por %p4530_p0, %p4529_p13 }
  0x72   : > { %p4525_p12 = pneg %p4524_p11 }
  0x74   : > { %p4532_p5 = pnand %p4531_p2, %p4525_p12 }
  0x76   : > { %4535 = shalt.err (!%p4532_p5)
}
  0x77   : > { %s7005_s29 = smov 128   ;;  %s7007_s24 = smov 8  }
  0x78   : > { %3961 = dma.hbm_to_vmem [thread:$0]  (!%p5162_p6), %s7128_s5, 2048, %s473_s17, [#allocation19], %s7005_s29, %s7005_s29, %s7007_s24  }
  0x79   : > { %s5001_s1 = smov [#allocation21]   ;;  %s5002_s16 = smov [#allocation24]  }
  0x7a   : > { %s497_s26 = sshll.u32 %s5001_s1, 4  ;;  %s521_s14 = sshll.u32 %s5002_s16, 4  ;;  %s498_s26 = int_to_ptr.vmem [resolvable:$true] %s497_s26  ;;  %s522_s14 = int_to_ptr.vmem [resolvable:$true] %s521_s14 }
  0x7b   : > { %s7129_s7 = sld [smem:[#allocation121_spill]] }
  0x81   : > { %s4536_s0 = scalar_lea.hbm %s7129_s7, 32 }
  0x82   : > { %p4537_p7 = scmp.ne.s32.totalorder %s7129_s7, %s4536_s0  ;;  %p4543_p1 = scmp.lt.u32.totalorder %s4536_s0, %s7129_s7 }
  0x84   : > { %p4539_p9 = pnand %p4537_p7, %p5178_p8 }
  0x86   : > { %p4540_p4 = pneg %p4539_p9 }
  0x88   : > { %p4545_p3 = pnand %p4543_p1, %p4540_p4 }
  0x8a   : > { %4548 = shalt.err (!%p4545_p3)
}
  0x8b   : > { %s4549_s17 = scalar_lea.vmem %s498_s26, 32  ;;  %p4557_p13 = scmp.lt.s32.totalorder %s498_s26, %s498_s26 }
  0x8c   : > { %p4550_p10 = scmp.ne.s32.totalorder %s498_s26, %s4549_s17  ;;  %p4558_p0 = scmp.lt.s32.totalorder %s4549_s17, %s4549_s17 }
  0x8e   : > { %p4552_p11 = pnand %p4550_p10, %p5178_p8  ;;  %p4559_p2 = por %p4558_p0, %p4557_p13 }
  0x90   : > { %p4553_p12 = pneg %p4552_p11 }
  0x92   : > { %p4560_p5 = pnand %p4559_p2, %p4553_p12 }
  0x94   : > { %4563 = shalt.err (!%p4560_p5)
}
  0x95   : > { %3967 = dma.hbm_to_vmem [thread:$0]  (!%p5162_p6), %s7129_s7, 32, %s498_s26, [#allocation22]  }
  0x96   : > { %s7130_s9 = sld [smem:[#allocation123_spill]] }
  0x9c   : > { %s4564_s21 = scalar_lea.hbm %s7130_s9, 256 }
  0x9d   : > { %p4565_p7 = scmp.ne.s32.totalorder %s7130_s9, %s4564_s21  ;;  %p4571_p1 = scmp.lt.u32.totalorder %s4564_s21, %s7130_s9 }
  0x9f   : > { %p4567_p9 = pnand %p4565_p7, %p5178_p8 }
  0xa1   : > { %p4568_p4 = pneg %p4567_p9 }
  0xa3   : > { %p4573_p3 = pnand %p4571_p1, %p4568_p4 }
  0xa5   : > { %4576 = shalt.err (!%p4573_p3)
}
  0xa6   : > { %s4577_s27 = scalar_lea.vmem %s522_s14, 256  ;;  %p4585_p13 = scmp.lt.s32.totalorder %s522_s14, %s522_s14 }
  0xa7   : > { %p4578_p10 = scmp.ne.s32.totalorder %s522_s14, %s4577_s27  ;;  %p4586_p0 = scmp.lt.s32.totalorder %s4577_s27, %s4577_s27 }
  0xa9   : > { %p4580_p11 = pnand %p4578_p10, %p5178_p8  ;;  %p4587_p2 = por %p4586_p0, %p4585_p13 }
  0xab   : > { %p4581_p12 = pneg %p4580_p11 }
  0xad   : > { %p4588_p5 = pnand %p4587_p2, %p4581_p12 }
  0xaf   : > { %4591 = shalt.err (!%p4588_p5)
}
  0xb0   : > { %3973 = dma.hbm_to_vmem [thread:$0]  (!%p5162_p6), %s7130_s9, 256, %s522_s14, [#allocation25]  }
  0xb1   : > { %s5003_s17 = smov [#allocation27]   ;;  %s4592_s19 = scalar_lea.hbm %s6988_s11, 512 }
  0xb2   : > { %s542_s2 = sshll.u32 %s5003_s17, 4  ;;  %p4593_p7 = scmp.ne.s32.totalorder %s6988_s11, %s4592_s19  ;;  %s543_s2 = int_to_ptr.vmem [resolvable:$true] %s542_s2 }
  0xb3   : > { %p4599_p1 = scmp.lt.u32.totalorder %s4592_s19, %s6988_s11 }
  0xb4   : > { %p4595_p9 = pnand %p4593_p7, %p5178_p8 }
  0xb6   : > { %p4596_p4 = pneg %p4595_p9 }
  0xb8   : > { %p4601_p3 = pnand %p4599_p1, %p4596_p4 }
  0xba   : > { %4604 = shalt.err (!%p4601_p3)
}
  0xbb   : > { %s4605_s14 = scalar_lea.vmem %s543_s2, 512  ;;  %p4613_p13 = scmp.lt.s32.totalorder %s543_s2, %s543_s2 }
  0xbc   : > { %p4606_p10 = scmp.ne.s32.totalorder %s543_s2, %s4605_s14  ;;  %p4614_p0 = scmp.lt.s32.totalorder %s4605_s14, %s4605_s14 }
  0xbe   : > { %p4608_p11 = pnand %p4606_p10, %p5178_p8  ;;  %p4615_p2 = por %p4614_p0, %p4613_p13 }
  0xc0   : > { %p4609_p12 = pneg %p4608_p11 }
  0xc2   : > { %p4616_p5 = pnand %p4615_p2, %p4609_p12 }
  0xc4   : > { %4619 = shalt.err (!%p4616_p5)
}
  0xc5   : > { %s5004_s15 = smov 256   ;;  %s5005_s27 = smov 16  }
  0xc6   : > { %3979 = dma.hbm_to_vmem [thread:$0]  (!%p5162_p6), %s6988_s11, 512, %s543_s2, [#allocation28], %s5004_s15, %s5004_s15, %s5005_s27  }
  0xc7   : > { %s5006_s17 = smov [#allocation17]   ;;  %s5007_s18 = smov [#allocation20]  }
  0xc8   : > { %s459_s3 = sshll.u32 %s5006_s17, 4  ;;  %s486_s19 = sshll.u32 %s5007_s18, 4  ;;  %s460_s3 = int_to_ptr.vmem [resolvable:$true] %s459_s3  ;;  %s5294_s19 = int_to_ptr.vmem [resolvable:$true] %s486_s19 }
  0xc9   : > { %s7131_s4 = sld [smem:[#allocation118_spill]] }
  0xcf   : > { %s4620_s1 = scalar_lea.hbm %s7131_s4, 2048 }
  0xd0   : > { %p4621_p7 = scmp.ne.s32.totalorder %s7131_s4, %s4620_s1  ;;  %p4627_p1 = scmp.lt.u32.totalorder %s4620_s1, %s7131_s4 }
  0xd2   : > { %p4623_p9 = pnand %p4621_p7, %p5178_p8 }
  0xd4   : > { %p4624_p4 = pneg %p4623_p9 }
  0xd6   : > { %p4629_p3 = pnand %p4627_p1, %p4624_p4 }
  0xd8   : > { %4632 = shalt.err (!%p4629_p3)
}
  0xd9   : > { %s4633_s15 = scalar_lea.vmem %s460_s3, 2048  ;;  %p4641_p13 = scmp.lt.s32.totalorder %s460_s3, %s460_s3 }
  0xda   : > { %p4634_p10 = scmp.ne.s32.totalorder %s460_s3, %s4633_s15  ;;  %p4642_p0 = scmp.lt.s32.totalorder %s4633_s15, %s4633_s15 }
  0xdc   : > { %p4636_p11 = pnand %p4634_p10, %p5178_p8  ;;  %p4643_p2 = por %p4642_p0, %p4641_p13 }
  0xde   : > { %p4637_p12 = pneg %p4636_p11 }
  0xe0   : > { %p4644_p5 = pnand %p4643_p2, %p4637_p12 }
  0xe2   : > { %4647 = shalt.err (!%p4644_p5)
}
  0xe3   : > { %3958 = dma.hbm_to_vmem [thread:$0]  (!%p5162_p6), %s7131_s4, 2048, %s460_s3, [#allocation16], %s7005_s29, %s7005_s29, %s7007_s24  }
  0xe4   : > { %s7132_s6 = sld [smem:[#allocation120_spill]] }
  0xea   : > { %s4648_s21 = scalar_lea.hbm %s7132_s6, 128 }
  0xeb   : > { %p4649_p7 = scmp.ne.s32.totalorder %s7132_s6, %s4648_s21  ;;  %p4655_p1 = scmp.lt.u32.totalorder %s4648_s21, %s7132_s6 }
  0xed   : > { %p4651_p9 = pnand %p4649_p7, %p5178_p8 }
  0xef   : > { %p4652_p4 = pneg %p4651_p9 }
  0xf1   : > { %p4657_p3 = pnand %p4655_p1, %p4652_p4 }
  0xf3   : > { %4660 = shalt.err (!%p4657_p3)
}
  0xf4   : > { %s4661_s3 = scalar_lea.vmem %s5294_s19, 128  ;;  %p4669_p13 = scmp.lt.s32.totalorder %s5294_s19, %s5294_s19 }
  0xf5   : > { %p4662_p10 = scmp.ne.s32.totalorder %s5294_s19, %s4661_s3  ;;  %p4670_p0 = scmp.lt.s32.totalorder %s4661_s3, %s4661_s3 }
  0xf7   : > { %p4664_p11 = pnand %p4662_p10, %p5178_p8  ;;  %p4671_p2 = por %p4670_p0, %p4669_p13 }
  0xf9   : > { %p4665_p12 = pneg %p4664_p11 }
  0xfb   : > { %p4672_p5 = pnand %p4671_p2, %p4665_p12 }
  0xfd   : > { %4675 = shalt.err (!%p4672_p5)
}
  0xfe   : > { %3964 = dma.hbm_to_vmem [thread:$0]  (!%p5162_p6), %s7132_s6, 128, %s5294_s19, [#allocation19]  }
  0xff   : > { %s5008_s15 = smov [#allocation23]   ;;  %s7133_s8 = sld [smem:[#allocation122_spill]] }
 0x100   : > { %s507_s27 = sshll.u32 %s5008_s15, 4  ;;  %s508_s27 = int_to_ptr.vmem [resolvable:$true] %s507_s27 }
 0x105   : > { %s4676_s18 = scalar_lea.hbm %s7133_s8, 2048 }
 0x106   : > { %p4677_p7 = scmp.ne.s32.totalorder %s7133_s8, %s4676_s18  ;;  %p4683_p1 = scmp.lt.u32.totalorder %s4676_s18, %s7133_s8 }
 0x108   : > { %p4679_p9 = pnand %p4677_p7, %p5178_p8 }
 0x10a   : > { %p4680_p4 = pneg %p4679_p9 }
 0x10c   : > { %p4685_p3 = pnand %p4683_p1, %p4680_p4 }
 0x10e   : > { %4688 = shalt.err (!%p4685_p3)
}
 0x10f   : > { %s4689_s19 = scalar_lea.vmem %s508_s27, 2048  ;;  %p4697_p13 = scmp.lt.s32.totalorder %s508_s27, %s508_s27 }
 0x110   : > { %p4690_p10 = scmp.ne.s32.totalorder %s508_s27, %s4689_s19  ;;  %p4698_p0 = scmp.lt.s32.totalorder %s4689_s19, %s4689_s19 }
 0x112   : > { %p4692_p11 = pnand %p4690_p10, %p5178_p8  ;;  %p4699_p2 = por %p4698_p0, %p4697_p13 }
 0x114   : > { %p4693_p12 = pneg %p4692_p11 }
 0x116   : > { %p4700_p5 = pnand %p4699_p2, %p4693_p12 }
 0x118   : > { %4703 = shalt.err (!%p4700_p5)
}
 0x119   : > { %s5009_s14 = smov 64   ;;  %s5010_s3 = smov 4  }
 0x11a   : > { %3970 = dma.hbm_to_vmem [thread:$0]  (!%p5162_p6), %s7133_s8, 2048, %s508_s27, [#allocation22], %s5009_s14, %s5009_s14, %s5010_s3  }
 0x11b   : > { %s5011_s15 = smov [#allocation26]   ;;  %s5012_s17 = smov [#allocation29]  }
 0x11c   : > { %s532_s0 = sshll.u32 %s5011_s15, 4  ;;  %s556_s18 = sshll.u32 %s5012_s17, 4  ;;  %s533_s0 = int_to_ptr.vmem [resolvable:$true] %s532_s0  ;;  %s557_s18 = int_to_ptr.vmem [resolvable:$true] %s556_s18 }
 0x11d   : > { %s7134_s10 = sld [smem:[#allocation124_spill]] }
 0x123   : > { %s4704_s1 = scalar_lea.hbm %s7134_s10, 32 }
 0x124   : > { %p4705_p7 = scmp.ne.s32.totalorder %s7134_s10, %s4704_s1  ;;  %p4711_p1 = scmp.lt.u32.totalorder %s4704_s1, %s7134_s10 }
 0x126   : > { %p4707_p9 = pnand %p4705_p7, %p5178_p8 }
 0x128   : > { %p4708_p4 = pneg %p4707_p9 }
 0x12a   : > { %p4713_p3 = pnand %p4711_p1, %p4708_p4 }
 0x12c   : > { %4716 = shalt.err (!%p4713_p3)
}
 0x12d   : > { %s4717_s27 = scalar_lea.vmem %s533_s0, 32  ;;  %p4725_p13 = scmp.lt.s32.totalorder %s533_s0, %s533_s0 }
 0x12e   : > { %p4718_p10 = scmp.ne.s32.totalorder %s533_s0, %s4717_s27  ;;  %p4726_p0 = scmp.lt.s32.totalorder %s4717_s27, %s4717_s27 }
 0x130   : > { %p4720_p11 = pnand %p4718_p10, %p5178_p8  ;;  %p4727_p2 = por %p4726_p0, %p4725_p13 }
 0x132   : > { %p4721_p12 = pneg %p4720_p11 }
 0x134   : > { %p4728_p5 = pnand %p4727_p2, %p4721_p12 }
 0x136   : > { %4731 = shalt.err (!%p4728_p5)
}
 0x137   : > { %3976 = dma.hbm_to_vmem [thread:$0]  (!%p5162_p6), %s7134_s10, 32, %s533_s0, [#allocation25]  }
 0x138   : > { %s4732_s15 = scalar_lea.hbm %s6989_s12, 32 }
 0x139   : > { %p4733_p7 = scmp.ne.s32.totalorder %s6989_s12, %s4732_s15  ;;  %p4739_p1 = scmp.lt.u32.totalorder %s4732_s15, %s6989_s12 }
 0x13b   : > { %p4735_p9 = pnand %p4733_p7, %p5178_p8 }
 0x13d   : > { %p4736_p4 = pneg %p4735_p9 }
 0x13f   : > { %p4741_p3 = pnand %p4739_p1, %p4736_p4 }
 0x141   : > { %4744 = shalt.err (!%p4741_p3)
}
 0x142   : > { %s4745_s16 = scalar_lea.vmem %s557_s18, 32  ;;  %p4753_p13 = scmp.lt.s32.totalorder %s557_s18, %s557_s18 }
 0x143   : > { %p4746_p10 = scmp.ne.s32.totalorder %s557_s18, %s4745_s16  ;;  %p4754_p0 = scmp.lt.s32.totalorder %s4745_s16, %s4745_s16 }
 0x145   : > { %p4748_p11 = pnand %p4746_p10, %p5178_p8  ;;  %p4755_p2 = por %p4754_p0, %p4753_p13 }
 0x147   : > { %p4749_p12 = pneg %p4748_p11 }
 0x149   : > { %p4756_p5 = pnand %p4755_p2, %p4749_p12 }
 0x14b   : > { %4759 = shalt.err (!%p4756_p5)
}
 0x14c   : > { %3982 = dma.hbm_to_vmem [thread:$0]  (!%p5162_p6), %s6989_s12, 32, %s557_s18, [#allocation28]  }
 0x14d   : > { %s5013_s27 = smov [#allocation30]   ;;  %s4760_s24 = scalar_lea.hbm %s6990_s13, 2048 }
 0x14e   : > { %s566_s26 = sshll.u32 %s5013_s27, 4  ;;  %p4761_p7 = scmp.ne.s32.totalorder %s6990_s13, %s4760_s24  ;;  %s567_s26 = int_to_ptr.vmem [resolvable:$true] %s566_s26 }
 0x14f   : > { %p4767_p1 = scmp.lt.u32.totalorder %s4760_s24, %s6990_s13 }
 0x150   : > { %p4763_p9 = pnand %p4761_p7, %p5178_p8 }
 0x152   : > { %p4764_p4 = pneg %p4763_p9 }
 0x154   : > { %p4769_p3 = pnand %p4767_p1, %p4764_p4 }
 0x156   : > { %4772 = shalt.err (!%p4769_p3)
}
 0x157   : > { %s4773_s18 = scalar_lea.vmem %s567_s26, 2048  ;;  %p4781_p13 = scmp.lt.s32.totalorder %s567_s26, %s567_s26 }
 0x158   : > { %p4774_p10 = scmp.ne.s32.totalorder %s567_s26, %s4773_s18  ;;  %p4782_p0 = scmp.lt.s32.totalorder %s4773_s18, %s4773_s18 }
 0x15a   : > { %p4776_p11 = pnand %p4774_p10, %p5178_p8  ;;  %p4783_p2 = por %p4782_p0, %p4781_p13 }
 0x15c   : > { %p4777_p12 = pneg %p4776_p11 }
 0x15e   : > { %p4784_p5 = pnand %p4783_p2, %p4777_p12 }
 0x160   : > { %4787 = shalt.err (!%p4784_p5)
}
 0x161   : > { %s7135_s0 = sld [smem:[#allocation47_spill]]  ;;  %s7136_s28 = sld [smem:[#allocation46_spill]] }
 0x162   : > { %s7137_s19 = sld [smem:[#allocation49_spill]]  ;;  %s3689_s30 = sadd.s32 4294967294, %s4994_s23  }
 0x163   : > { %3985 = dma.hbm_to_vmem [thread:$0]  (!%p5162_p6), %s6990_s13, 2048, %s567_s26, [#allocation31], %s5009_s14, %s5009_s14, %s5010_s3  }
 0x164   : > { %s56_s27 = sadd.s32 1, %s4990_s22  ;;  %s65_s2 = sadd.s32 1, %s4982_s20 }
 0x165   : > { %p58_p8 = scmp.ge.s32.totalorder %s56_s27, 2  ;;  %p73_p9 = scmp.eq.s32.totalorder %s4994_s23, 0 }
 0x166   : > { %p390_p13 = scmp.eq.s32.totalorder %s3689_s30, 1  ;;  %p4012_p2 = scmp.lt.s32.totalorder %s4994_s23, 2 }
 0x167   : > { %p72_p7 = scmp.ne.s32.totalorder %s4982_s20, %s7135_s0  ;;  %s7364_s27 = smov (%p58_p8, %s56_s27), 0 }
 0x168   : > { %p78_p1 = scmp.ne.s32.totalorder %s7135_s0, %s7136_s28  ;;  %s60_s14 = ssub.s32 %s4990_s22, %s7364_s27 }
 0x169   : > { %p5426_p4 = por %p73_p9, %p72_p7  ;;  %p384_p6 = scmp.eq.s32.totalorder %s7137_s19, 1 }
 0x16a   : > { %p63_p3 = scmp.eq.s32.totalorder %s60_s14, 0  ;;  %p7139_p10 = scmp.eq.s32.totalorder %s7137_s19, 0 }
 0x16b   : > { %p5441_p12 = por %p384_p6, %p72_p7  ;;  %p5448_p0 = por %p390_p13, %p78_p1 }
 0x16c   : > { %p5437_p11 = por %p7139_p10, %p78_p1  ;;  %s580_s17 = sand.u32 1, %s4982_s20  }
 0x16d   : > { %s7141_s26 = scalar_select %p5441_p12, 1, 0 }
 0x16e   : > { %s5446_s24 = scalar_select %p63_p3, %s4982_s20, %s65_s2  }
 0x16f   : > { %s7142_s15 = scalar_select %p5448_p0, 1, 0 }
 0x170   : > { %s3823_s21 = sshll.u32 %s4990_s22, 8  ;;  %s5455_s25 = sshll.u32 %s580_s17, 4 }
 0x171   : > { %s7143_s16 = sld [smem:[#allocation114_spill]]  ;;  %s584_s28 = scalar_lea.vmem [#allocation9], %s5455_s25 }
 0x172   : > { %s593_s19 = sshll.u32 %s584_s28, 4  ;;  %p5465_p5 = pnand %p4012_p2, %p5426_p4  ;;  %s5469_s19 = int_to_ptr.vmem [resolvable:$true] %s593_s19 }
 0x173   : > { %s7145_s18 = sld [smem:[#allocation115_spill]]  ;;  %s5476_s5 = scalar_lea.sflag [#allocation10], %s580_s17 }
 0x174   : > { %p4790_p7 = pneg %p5465_p5 }
 0x177   : > { %s5460_s0 = scalar_lea.hbm %s7143_s16, %s3823_s21  ;;  %s4793_s7 = scalar_lea.hbm %s7143_s16, 512 }
 0x178   : > { %s4788_s6 = scalar_lea.hbm %s5460_s0, 256  ;;  %p4794_p1 = scmp.lt.u32.totalorder %s5460_s0, %s7143_s16 }
 0x179   : > { %s7146_s1 = smov %s7145_s18  ;;  %s5474_s4 = scalar_lea.hbm %s7145_s18, %s3823_s21 }
 0x17a   : > { %p4789_p8 = scmp.ne.s32.totalorder %s5460_s0, %s4788_s6  ;;  %p4795_p6 = scmp.lt.u32.totalorder %s4793_s7, %s4788_s6 }
 0x17b   : > { %p4797_p10 = scmp.lt.u32.totalorder %s4788_s6, %s5460_s0 }
 0x17c   : > { %p4791_p9 = pnand %p4790_p7, %p4789_p8  ;;  %p4796_p3 = por %p4795_p6, %p4794_p1 }
 0x17e   : > { %p4792_p4 = pneg %p4791_p9  ;;  %p4798_p13 = por %p4797_p10, %p4796_p3 }
 0x180   : > { %p4799_p2 = pnand %p4798_p13, %p4792_p4 }
 0x182   : > { %4802 = shalt.err (!%p4799_p2)
}
 0x183   : > { %s4803_s17 = scalar_lea.vmem %s5469_s19, 256  ;;  %s5014_s21 = smov [#allocation9]  }
 0x184   : > { %p4804_p8 = scmp.ne.s32.totalorder %s5469_s19, %s4803_s17  ;;  %s4808_s2 = sshll.u32 %s5014_s21, 4  ;;  %s4809_s2 = int_to_ptr.vmem [resolvable:$false] %s4808_s2 }
 0x185   : > { %s4810_s8 = scalar_lea.vmem %s4809_s2, 512  ;;  %p4811_p12 = scmp.lt.s32.totalorder %s5469_s19, %s4809_s2 }
 0x186   : > { %p4806_p9 = pnand %p4804_p8, %p4790_p7  ;;  %p4812_p1 = scmp.lt.s32.totalorder %s4810_s8, %s4803_s17 }
 0x188   : > { %p4807_p0 = pneg %p4806_p9  ;;  %p4813_p6 = por %p4812_p1, %p4811_p12 }
 0x18a   : > { %p4814_p3 = pnand %p4813_p6, %p4807_p0 }
 0x18c   : > { %4817 = shalt.err (!%p4814_p3)
}
 0x18d   : > { %s7147_s6 = smov 8   ;;  %s7148_s7 = smov 128  }
 0x18e   : > { %3989 = dma.hbm_to_vmem [thread:$0]  (!%p5465_p5), %s5460_s0, 256, %s5469_s19, %s5476_s5, %s7148_s7, %s7148_s7, %s7147_s6  }
 0x18f   : > { %s607_s9 = scalar_lea.vmem [#allocation12], %s5455_s25  ;;  %s603_s18 = sand.u32 1, %s4994_s23  }
 0x190   : > { %s616_s14 = sshll.u32 %s607_s9, 4  ;;  %s5511_s29 = scalar_lea.sflag [#allocation13], %s603_s18  ;;  %s5509_s14 = int_to_ptr.vmem [resolvable:$true] %s616_s14 }
 0x191   : > { %s4818_s28 = scalar_lea.hbm %s5474_s4, 256  ;;  %s4823_s2 = scalar_lea.hbm %s7146_s1, 512 }
 0x192   : > { %p4819_p12 = scmp.ne.s32.totalorder %s5474_s4, %s4818_s28  ;;  %p4824_p10 = scmp.lt.u32.totalorder %s5474_s4, %s7146_s1 }
 0x193   : > { %p4825_p13 = scmp.lt.u32.totalorder %s4823_s2, %s4818_s28  ;;  %p4827_p8 = scmp.lt.u32.totalorder %s4818_s28, %s5474_s4 }
 0x194   : > { %p4821_p0 = pnand %p4819_p12, %p4790_p7 }
 0x195   : > { %p4826_p2 = por %p4825_p13, %p4824_p10 }
 0x196   : > { %p4822_p4 = pneg %p4821_p0 }
 0x197   : > { %p4828_p9 = por %p4827_p8, %p4826_p2 }
 0x199   : > { %p4829_p1 = pnand %p4828_p9, %p4822_p4 }
 0x19b   : > { %4832 = shalt.err (!%p4829_p1)
}
 0x19c   : > { %s4833_s5 = scalar_lea.vmem %s5509_s14, 256  ;;  %s5015_s25 = smov [#allocation12]  }
 0x19d   : > { %p4834_p6 = scmp.ne.s32.totalorder %s5509_s14, %s4833_s5  ;;  %s4838_s0 = sshll.u32 %s5015_s25, 4  ;;  %s4839_s0 = int_to_ptr.vmem [resolvable:$false] %s4838_s0 }
 0x19e   : > { %s4840_s10 = scalar_lea.vmem %s4839_s0, 512  ;;  %p4841_p0 = scmp.lt.s32.totalorder %s5509_s14, %s4839_s0 }
 0x19f   : > { %p4836_p3 = pnand %p4834_p6, %p4790_p7  ;;  %p4842_p10 = scmp.lt.s32.totalorder %s4840_s10, %s4833_s5 }
 0x1a1   : > { %p4837_p12 = pneg %p4836_p3  ;;  %p4843_p13 = por %p4842_p10, %p4841_p0 }
 0x1a3   : > { %p4844_p2 = pnand %p4843_p13, %p4837_p12 }
 0x1a5   : > { %4847 = shalt.err (!%p4844_p2)
}
 0x1a6   : > { %3992 = dma.hbm_to_vmem [thread:$0]  (!%p5465_p5), %s5474_s4, 256, %s5509_s14, %s5511_s29, %s7148_s7, %s7148_s7, %s7147_s6  }
 0x1a7   : > { %s7149_s19 = sld [smem:[#allocation50_spill]] }
 0x1ad   : > { %p7150_p7 = scmp.ne.s32.totalorder %s7149_s19, 0 }
 0x1af   : > { %628 = sbr.rel (%p7150_p7) target bundleno = 2119 (0x847), region = 76 }
 0x1b6   : > { %s7151_s9 = sld [smem:[#allocation47_spill]] }
 0x1bc   : > { %s5543_s18 = sand.u32 1, %s7151_s9  }
 0x1bd   : > { %s5546_s28 = sshll.u32 %s5543_s18, 4  ;;  %s631_s30 = scalar_lea.sflag [#allocation10], %s5543_s18 }
 0x1be   : > { %s634_s17 = scalar_lea.vmem [#allocation9], %s5546_s28 }
 0x1bf   : > { %4929 = dma.done.wait (%p5437_p11), %s631_s30, 256  }
 0x1c0   : > { %4931 = vsyncadd (%p5437_p11), %s631_s30, 4294967040  ;;  %s7152_s4 = sld [smem:[#allocation49_spill]]  ;;  %s643_s14 = scalar_lea.vmem [#allocation12], %s5546_s28 }
 0x1c6   : > { %s639_s6 = sand.u32 1, %s7152_s4  }
 0x1c7   : > { %s640_s7 = scalar_lea.sflag [#allocation13], %s639_s6 }
 0x1c8   : > { %4933 = dma.done.wait (%p5437_p11), %s640_s7, 256  }
 0x1c9   : > { %4935 = vsyncadd (%p5437_p11), %s640_s7, 4294967040  ;;  %p7153_p5 = scmp.eq.s32.totalorder %s7152_s4, 0 }
 0x1cb   : > { %4937 = dma.done.wait (%p7153_p5), [#allocation13], 16   ;;  %p7154_p4 = pmov %p7153_p5 }
 0x1cd   : > { %4939 = vsyncadd (%p7154_p4), [#allocation13], 4294967280  ;;  %p7155_p8 = pmov %p7154_p4 }
 0x1ce   : > { %p7156_p9 = pmov %p7154_p4 }
 0x1cf   : > { %4941 = dma.done.wait (%p7155_p8), [#allocation16], 2064  }
 0x1d0   : > { %4943 = vsyncadd (%p7156_p9), [#allocation16], 4294965232  ;;  %p7157_p1 = pmov %p7154_p4 }
 0x1d2   : > { %4945 = dma.done.wait (%p7157_p1), [#allocation19], 2176   ;;  %p7158_p6 = pmov %p7157_p1 }
 0x1d3   : > { %p7159_p11 = pmov %p7157_p1 }
 0x1d4   : > { %4947 = vsyncadd (%p7158_p6), [#allocation19], 4294965120 }
 0x1d5   : > { %4949 = dma.done.wait (%p7159_p11), [#allocation22], 2080   ;;  %p7160_p3 = pmov %p7157_p1 }
 0x1d6   : > { %p7161_p12 = pmov %p7157_p1 }
 0x1d7   : > { %4951 = vsyncadd (%p7160_p3), [#allocation22], 4294965216 }
 0x1d8   : > { %4953 = dma.done.wait (%p7161_p12), [#allocation25], 288   ;;  %p7162_p0 = pmov %p7157_p1 }
 0x1da   : > { %4955 = vsyncadd (%p7162_p0), [#allocation25], 4294967008  ;;  %p7163_p10 = pmov %p7162_p0 }
 0x1db   : > { %p7164_p13 = pmov %p7162_p0 }
 0x1dc   : > { %4957 = dma.done.wait (%p7163_p10), [#allocation28], 544  }
 0x1dd   : > { %4959 = vsyncadd (%p7164_p13), [#allocation28], 4294966752  ;;  %p7165_p2 = pmov %p7162_p0 }
 0x1de   : > { %p7166_p7 = pmov %p7162_p0 }
 0x1df   : > { %4961 = dma.done.wait (%p7165_p2), [#allocation31], 2048  }
 0x1e0   : > { %4963 = vsyncadd (%p7166_p7), [#allocation31], 4294965248  ;;  %v763_v0 = vld [vmem:[%s634_s17] sm:$0xff]  ;;  %v764_v2 = vld [vmem:[%s634_s17 + $0x8] sm:$0xff]  ;;  %s5589_s3 = scalar_lea.vmem [#allocation33], %s5546_s28  ;;  %v5016_v25 = vmov 0  }
 0x1e1   : > { %v765_v1 = vld [vmem:[%s643_s14] sm:$0xff]  ;;  %v766_v4 = vld [vmem:[%s643_s14 + $0x8] sm:$0xff]  ;;  %942 = vmatprep.mubr.bf16.mxu0 %v5016_v25  ;;  %4111 = vset.pattern.permute.xlu1 %v5016_v25  ;;  %vm1004_vm0 = vcmask 1046528   ;;  %vm1052_vm1 = vcmask 1045504   ;;  %vm1096_vm2 = vcmask 1044480   ;;  %vm1183_vm3 = vcmask 1042432  }
 0x1e2   : > { %v767_v3 = vadd.f32 %v765_v1, %v763_v0  ;;  %v768_v5 = vadd.f32 %v766_v4, %v764_v2  ;;  %v4175_v6 = vld [vmem:[#allocation17 + $0x4] ss:$8 sps:$4 sm:$0xff]   ;;  %v4177_v7 = vld [vmem:[#allocation17] ss:$8 sps:$4 sm:$0xff]   ;;  %v4178_v8 = vld [vmem:[#allocation17 + $0x14] ss:$8 sps:$4 sm:$0xff]   ;;  %v957_v0 = vlaneseq }
 0x1e3   : > { %910 = vmatprep.subr.bf16.mxu0 %v4175_v6  ;;  %v4180_v17 = vld [vmem:[#allocation17 + $0x10] ss:$8 sps:$4 sm:$0xff]   ;;  %v4181_v18 = vld [vmem:[#allocation17 + $0x24] ss:$8 sps:$4 sm:$0xff]   ;;  %v4183_v19 = vld [vmem:[#allocation17 + $0x20] ss:$8 sps:$4 sm:$0xff]  }
 0x1e4   : > { %771 = vadd.xlane.f32.xlu0 %v767_v3  ;;  %769 = vst [vmem:[%s5589_s3] sm:$0xff] %v767_v3  ;;  %770 = vst [vmem:[%s5589_s3 + $0x8] sm:$0xff] %v768_v5  ;;  %911 = vmatpush1.bf16.msra.mxu0 %v4177_v7  ;;  %v4184_v20 = vld [vmem:[#allocation17 + $0x34] ss:$8 sps:$4 sm:$0xff]   ;;  %v4186_v21 = vld [vmem:[#allocation17 + $0x30] ss:$8 sps:$4 sm:$0xff]   ;;  %v5599_v1 = vshrl.u32 %v957_v0, 7 }
 0x1e5   : > { %912 = vmatprep.subr.bf16.mxu0 %v4178_v8  ;;  %v4187_v22 = vld [vmem:[#allocation17 + $0x44] ss:$8 sps:$4 sm:$0xff]   ;;  %v4189_v23 = vld [vmem:[#allocation17 + $0x40] ss:$8 sps:$4 sm:$0xff]   ;;  %v4190_v24 = vld [vmem:[#allocation17 + $0x54] ss:$8 sps:$4 sm:$0xff]  }
 0x1e6   : > { %v4192_v26 = vld [vmem:[#allocation17 + $0x50] ss:$8 sps:$4 sm:$0xff]   ;;  %v4193_v27 = vld [vmem:[#allocation17 + $0x64] ss:$8 sps:$4 sm:$0xff]   ;;  %v4195_v28 = vld [vmem:[#allocation17 + $0x60] ss:$8 sps:$4 sm:$0xff]  }
 0x1e7   : > { %v4196_v29 = vld [vmem:[#allocation17 + $0x74] ss:$8 sps:$4 sm:$0xff]   ;;  %v4198_v30 = vld [vmem:[#allocation17 + $0x70] ss:$8 sps:$4 sm:$0xff]   ;;  %v4205_v54 = vld [vmem:[#allocation23 + $0x58] sm:$0xff]   ;;  %7167 = vst [vmem:[#allocation51_spill] sm:$0xff] %v5599_v1 }
 0x1e8   : > { %773 = vadd.xlane.f32.xlu0 %v768_v5  ;;  %913 = vmatpush1.bf16.msra.mxu0 %v4180_v17  ;;  %v3727_v39 = vld [vmem:[#allocation14] ss:$0 sm:$0xff]  ;;  %v3728_v43 = vld [vmem:[#allocation15] ss:$0 sm:$0xff]  ;;  %v4199_v48 = vld [vmem:[#allocation23 + $0x40] sm:$0xff]   ;;  %v5602_v2 = vsub.s32 0, %v5599_v1 }
 0x1e9   : > { %914 = vmatprep.subr.bf16.mxu0 %v4181_v18  ;;  %v4200_v49 = vld [vmem:[#allocation23] sm:$0xff]   ;;  %3827 = vmatprep.subr.bf16.mxu1 %v4199_v48  ;;  %v4201_v50 = vld [vmem:[#allocation23 + $0x48] sm:$0xff]   ;;  %v4203_v52 = vld [vmem:[#allocation23 + $0x50] sm:$0xff]   ;;  %vm1238_vm4 = vsmask.f32 5376  ;;  %vm1572_vm6 = vcmask 326656  }
 0x1ea   : > { %3828 = vmatpush3.bf16.msra.mxu1 %v4200_v49  ;;  %v4202_v51 = vld [vmem:[#allocation23 + $0x8] sm:$0xff]   ;;  %v4204_v53 = vld [vmem:[#allocation23 + $0x10] sm:$0xff]   ;;  %v4206_v55 = vld [vmem:[#allocation23 + $0x18] sm:$0xff]   ;;  %7168 = vst [vmem:[#allocation52_spill] sm:$0xff] %v5602_v2  ;;  %vm1426_vm7 = vcmask 64512   ;;  %vm1674_vm12 = vcmask 130048  }
 0x1eb   : > { %3829 = vmatprep.subr.bf16.mxu1 %v4201_v50  ;;  %v4207_v56 = vld [vmem:[#allocation23 + $0x60] sm:$0xff]   ;;  %v4209_v58 = vld [vmem:[#allocation23 + $0x68] sm:$0xff]   ;;  %v4211_v60 = vld [vmem:[#allocation23 + $0x70] sm:$0xff]   ;;  %s7345_s29 = sld [smem:[#allocation48_spill]]  ;;  %s3426_s21 = sshll.u32 %s5589_s3, 4  ;;  %s6881_s21 = int_to_ptr.vmem [resolvable:$true] %s3426_s21 }
 0x1ec   : > { %915 = vmatpush1.bf16.msra.mxu0 %v4183_v19  ;;  %v4208_v57 = vld [vmem:[#allocation23 + $0x20] sm:$0xff]   ;;  %v4210_v59 = vld [vmem:[#allocation23 + $0x28] sm:$0xff]   ;;  %v4212_v61 = vld [vmem:[#allocation23 + $0x30] sm:$0xff]   ;;  %s7352_s25 = sld [smem:[#allocation126_spill]]  ;;  %s3393_s10 = scalar_lea.sflag [#allocation34], %s5543_s18 }
 0x1ed   : > { %916 = vmatprep.subr.bf16.mxu0 %v4184_v20  ;;  %v4213_v62 = vld [vmem:[#allocation23 + $0x78] sm:$0xff]   ;;  %vm3888_vm8 = vmpackc.low %vm1572_vm6, %vm1572_vm6  ;;  %s4848_s19 = scalar_lea.vmem %s6881_s21, 256  ;;  %p7353_p4 = scmp.ne.s32.totalorder %s7141_s26, 0 }
 0x1ee   : > { %3830 = vmatpush3.bf16.msra.mxu1 %v4202_v51  ;;  %v4214_v63 = vld [vmem:[#allocation23 + $0x38] sm:$0xff]   ;;  %p4849_p5 = scmp.ne.s32.totalorder %s6881_s21, %s4848_s19  ;;  %s5033_s9 = smov [#allocation33]  }
 0x1ef   : > { %3831 = vmatprep.subr.bf16.mxu1 %v4203_v52  ;;  %v1028_v4 = vld [vmem:[#allocation20 + $0x2] ss:$4 sm:$0x3]  ;;  %v1117_v18 = vld [vmem:[#allocation21] sm:$0x3]  ;;  %s4852_s30 = sshll.u32 %s5033_s9, 4  ;;  %s4853_s30 = int_to_ptr.vmem [resolvable:$false] %s4852_s30 }
 0x1f0   : > { %917 = vmatpush1.bf16.msra.mxu0 %v4186_v21  ;;  %v1033_v7 = vrot.slane %v1028_v4, %v5602_v2  ;;  %p4850_p8 = pnand %p4849_p5, %p7353_p4  ;;  %s4854_s17 = scalar_lea.vmem %s4853_s30, 512 }
 0x1f1   : > { %918 = vmatprep.subr.bf16.mxu0 %v4187_v22  ;;  %s3825_s2 = sshll.u32 %s7345_s29, 8  ;;  %p4855_p1 = scmp.lt.s32.totalorder %s6881_s21, %s4853_s30 }
 0x1f2   : > { %3832 = vmatpush3.bf16.msra.mxu1 %v4204_v53  ;;  %s6888_s0 = scalar_lea.hbm %s7352_s25, %s3825_s2  ;;  %p4851_p9 = pneg %p4850_p8 }
 0x1f3   : > { %3833 = vmatprep.subr.bf16.mxu1 %v4205_v54  ;;  %p4856_p6 = scmp.lt.s32.totalorder %s4854_s17, %s4848_s19 }
 0x1f4   : > { %919 = vmatpush1.bf16.msra.mxu0 %v4189_v23 }
 0x1f5   : > { %920 = vmatprep.subr.bf16.mxu0 %v4190_v24  ;;  %p4857_p11 = por %p4856_p6, %p4855_p1 }
 0x1f6   : > { %3834 = vmatpush3.bf16.msra.mxu1 %v4206_v55 }
 0x1f7   : > { %3835 = vmatprep.subr.bf16.mxu1 %v4207_v56  ;;  %p4858_p3 = pnand %p4857_p11, %p4851_p9 }
 0x1f8   : > { %921 = vmatpush1.bf16.msra.mxu0 %v4192_v26 }
 0x1f9   : > { %922 = vmatprep.subr.bf16.mxu0 %v4193_v27  ;;  %v5619_v27 = vrot.slane %v1117_v18, %v5602_v2 }
 0x1fa   : > { %3836 = vmatpush3.bf16.msra.mxu1 %v4208_v57 }
 0x1fb   : > { %3837 = vmatprep.subr.bf16.mxu1 %v4209_v58 }
 0x1fc   : > { %923 = vmatpush1.bf16.msra.mxu0 %v4195_v28 }
 0x1fd   : > { %924 = vmatprep.subr.bf16.mxu0 %v4196_v29 }
 0x1fe   : > { %3838 = vmatpush3.bf16.msra.mxu1 %v4210_v59 }
 0x1ff   : > { %3839 = vmatprep.subr.bf16.mxu1 %v4211_v60 }
 0x200   : > { %925 = vmatpush1.bf16.msra.mxu0 %v4198_v30 }
 0x202   : > { %3840 = vmatpush3.bf16.msra.mxu1 %v4212_v61 }
 0x203   : > { %3841 = vmatprep.subr.bf16.mxu1 %v4213_v62 }
 0x206   : > { %3842 = vmatpush3.bf16.msra.mxu1 %v4214_v63 }
 0x271   : > { %v772_v9 = vpop.xlane.xlu0 %771 }
 0x272   : > { %v776_v10 = vmul.f32 0.0078125, %v772_v9 }
 0x274   : > { %v778_v11 = vsub.f32 %v767_v3, %v776_v10  ;;  %v980_v3 = vld [vmem:[#allocation20 + $0x1] ss:$4 sm:$0x3]  ;;  %v955_v10 = vld [vmem:[#allocation20] ss:$4 sm:$0x3] }
 0x275   : > { %v774_v12 = vpop.xlane.xlu0 %773  ;;  %v985_v6 = vrot.slane %v980_v3, %v5602_v2 }
 0x276   : > { %v777_v13 = vmul.f32 0.0078125, %v774_v12  ;;  %v780_v14 = vmul.f32 %v778_v11, %v778_v11 }
 0x277   : > { %v992_v12 = vmul.f32 0.0, %v985_v6 }
 0x278   : > { %v779_v15 = vsub.f32 %v768_v5, %v777_v13  ;;  %782 = vadd.xlane.f32.xlu1 %v780_v14  ;;  %v5605_v5 = vsub.s32 1, %v5599_v1  ;;  %v1040_v13 = vmul.f32 0.0, %v1033_v7  ;;  %v960_v14 = vrot.slane %v955_v10, %v5602_v2 }
 0x279   : > { %v1005_v22 = vrot.slane %v992_v12, 1 }
 0x27a   : > { %v781_v16 = vmul.f32 %v779_v15, %v779_v15  ;;  %7169 = vst [vmem:[#allocation53_spill] sm:$0xff] %v5605_v5  ;;  %v989_v8 = vrot.slane %v980_v3, %v5605_v5  ;;  %v5611_v9 = vrot.slane %v1028_v4, %v5605_v5  ;;  %v964_v19 = vrot.slane %v955_v10, %v5605_v5 }
 0x27b   : > { %v967_v20 = vmul.f32 0.0, %v960_v14  ;;  %v1053_v23 = vrot.slane %v1040_v13, 2 }
 0x27c   : > { %784 = vadd.xlane.f32.xlu1 %v781_v16  ;;  %v1041_v16 = vmul.f32 0.0, %v5611_v9  ;;  %v968_v24 = vmul.f32 0.0, %v964_v19 }
 0x27e   : > { %v1056_v29 = vrot.slane %v1041_v16, 2 }
 0x305   : > { %v783_v31 = vpop.xlane.xlu1 %782 }
 0x306   : > { %v786_v32 = vmul.f32 0.0078125, %v783_v31 }
 0x308   : > { %v788_v33 = vadd.f32 1e-05, %v786_v32 }
 0x309   : > { %v785_v34 = vpop.xlane.xlu1 %784 }
 0x30a   : > { %4255 = vrsqrt.f32 %v788_v33  ;;  %v787_v35 = vmul.f32 0.0078125, %v785_v34  ;;  %v5622_v34 = vrot.slane %v1117_v18, %v5605_v5 }
 0x30c   : > { %v789_v36 = vadd.f32 1e-05, %v787_v35 }
 0x30e   : > { %4257 = vrsqrt.f32 %v789_v36 }
 0x314   : > { %v4256_v37 = vpop.eup %4255 }
 0x315   : > { %v792_v38 = vmul.f32 %v4256_v37, %v778_v11  ;;  %v1076_v11 = vld [vmem:[#allocation20 + $0x3] ss:$4 sm:$0x3] }
 0x316   : > { %v1081_v17 = vrot.slane %v1076_v11, %v5602_v2  ;;  %v1085_v21 = vrot.slane %v1076_v11, %v5605_v5 }
 0x317   : > { %v801_v42 = vmul.f32 %v3727_v39, %v792_v38 }
 0x318   : > { %v4258_v40 = vpop.eup %4257 }
 0x319   : > { %v793_v41 = vmul.f32 %v4258_v40, %v779_v15  ;;  %v810_v45 = vadd.f32 %v3728_v43, %v801_v42  ;;  %v993_v15 = vmul.f32 0.0, %v989_v8 }
 0x31b   : > { %v802_v44 = vmul.f32 %v3727_v39, %v793_v41  ;;  %v1008_v28 = vrot.slane %v993_v15, 1 }
 0x31d   : > { %v811_v46 = vadd.f32 %v3728_v43, %v802_v44 }
 0x31f   : > { %v5595_v47 = vpack.c.bf16 %v811_v46, %v810_v45 }
 0x321   : > { %943 = vmatmul.mubr.bf16.vlgmr.msra.gmra.mrb[0].mxu0 %v5595_v47 }
 0x3f4   : > { %v944_v26 = vpop.f32.mrb[0].mxu0 }
 0x3f5   : > { %v994_v30 = vmul.f32 %v985_v6, %v944_v26  ;;  %v1042_v31 = vmul.f32 %v1033_v7, %v944_v26  ;;  %v1088_v32 = vmul.f32 %v1081_v17, %v944_v26  ;;  %v946_v33 = vpop.f32.mrb[1].mxu0  ;;  %v969_v35 = vmul.f32 %v960_v14, %v944_v26 }
 0x3f6   : > { %v995_v36 = vmul.f32 %v989_v8, %v946_v33  ;;  %v1043_v37 = vmul.f32 %v5611_v9, %v946_v33  ;;  %v1089_v38 = vmul.f32 %v1085_v21, %v946_v33  ;;  %v948_v39 = vpop.f32.mrb[2].mxu0  ;;  %v970_v16 = vmul.f32 %v964_v19, %v946_v33 }
 0x3f7   : > { %v1006_v40 = vrot.slane %v994_v30, 1  ;;  %v1054_v41 = vrot.slane %v1042_v31, 2  ;;  %v1097_v42 = vrot.slane %v1088_v32, 3  ;;  %v971_v43 = vmul.f32 %v960_v14, %v948_v39  ;;  %v950_v44 = vpop.f32.mrb[3].mxu0 }
 0x3f8   : > { %v1009_v45 = vrot.slane %v995_v36, 1  ;;  %v1057_v46 = vrot.slane %v1043_v37, 2  ;;  %v1098_v48 = vrot.slane %v1089_v38, 3  ;;  %v996_v49 = vmul.f32 %v985_v6, %v948_v39 }
 0x3f9   : > { %v1007_v50 = vsel %vm1004_vm0, %v1005_v22, %v1006_v40  ;;  %v1055_v51 = vsel %vm1052_vm1, %v1053_v23, %v1054_v41  ;;  %v1044_v52 = vmul.f32 %v1033_v7, %v948_v39  ;;  %v1090_v53 = vmul.f32 %v1081_v17, %v948_v39 }
 0x3fa   : > { %v1021_v54 = vadd.f32 %v1007_v50, %v967_v20  ;;  %v1010_v55 = vsel %vm1004_vm0, %v1008_v28, %v1009_v45  ;;  %v1058_v56 = vsel %vm1052_vm1, %v1056_v29, %v1057_v46  ;;  %v1011_v57 = vrot.slane %v996_v49, 1 }
 0x3fb   : > { %v1022_v58 = vadd.f32 %v1010_v55, %v968_v24  ;;  %v1059_v59 = vrot.slane %v1044_v52, 2  ;;  %v1099_v60 = vrot.slane %v1090_v53, 3  ;;  %v972_v61 = vmul.f32 %v964_v19, %v950_v44 }
 0x3fc   : > { %v1069_v62 = vadd.f32 %v1055_v51, %v1021_v54  ;;  %v1012_v63 = vsel %vm1004_vm0, %v1006_v40, %v1011_v57  ;;  %v1025_v3 = vadd.f32 %v1011_v57, %v971_v43  ;;  %v997_v4 = vmul.f32 %v989_v8, %v950_v44 }
 0x3fd   : > { %v1070_v6 = vadd.f32 %v1058_v56, %v1022_v58  ;;  %v1023_v10 = vadd.f32 %v1012_v63, %v969_v35  ;;  %v1060_v7 = vsel %vm1052_vm1, %v1054_v41, %v1059_v59  ;;  %v1100_v11 = vsel %vm1096_vm2, %v1097_v42, %v1099_v60 }
 0x3fe   : > { %v1109_v12 = vadd.f32 %v1097_v42, %v1069_v62  ;;  %v1073_v13 = vadd.f32 %v1059_v59, %v1025_v3  ;;  %v1013_v14 = vrot.slane %v997_v4, 1  ;;  %v1045_v15 = vmul.f32 %v5611_v9, %v950_v44 }
 0x3ff   : > { %v1110_v17 = vadd.f32 %v1098_v48, %v1070_v6  ;;  %v1071_v18 = vadd.f32 %v1060_v7, %v1023_v10  ;;  %v1091_v20 = vmul.f32 %v1085_v21, %v950_v44 }
 0x400   : > { %v1129_v22 = vadd.f32 %v5619_v27, %v1109_v12  ;;  %v1113_v23 = vadd.f32 %v1099_v60, %v1073_v13  ;;  %v1014_v8 = vsel %vm1004_vm0, %v1009_v45, %v1013_v14  ;;  %v1026_v24 = vadd.f32 %v1013_v14, %v972_v61 }
 0x401   : > { %v1130_v26 = vadd.f32 %v5622_v34, %v1110_v17  ;;  %v1111_v28 = vadd.f32 %v1100_v11, %v1071_v18  ;;  %v1024_v29 = vadd.f32 %v1014_v8, %v970_v16  ;;  %v1061_v30 = vrot.slane %v1045_v15, 2 }
 0x402   : > { %v3745_v31 = vmul.f32 -1.442695, %v1129_v22  ;;  %v1133_v32 = vadd.f32 %v5619_v27, %v1113_v23  ;;  %v1101_v35 = vrot.slane %v1091_v20, 3 }
 0x403   : > { %v3746_v9 = vmul.f32 -1.442695, %v1130_v26  ;;  %v1131_v19 = vadd.f32 %v5619_v27, %v1111_v28  ;;  %v1062_v21 = vsel %vm1052_vm1, %v1057_v46, %v1061_v30  ;;  %v1074_v33 = vadd.f32 %v1061_v30, %v1026_v24 }
 0x404   : > { %4259 = vpow2.f32 %v3745_v31  ;;  %v3749_v36 = vmul.f32 -1.442695, %v1133_v32  ;;  %v1072_v37 = vadd.f32 %v1062_v21, %v1024_v29  ;;  %v1102_v38 = vsel %vm1096_vm2, %v1098_v48, %v1101_v35 }
 0x405   : > { %4261 = vpow2.f32 %v3746_v9  ;;  %v3747_v39 = vmul.f32 -1.442695, %v1131_v19  ;;  %v1114_v40 = vadd.f32 %v1101_v35, %v1074_v33 }
 0x406   : > { %4263 = vpow2.f32 %v3749_v36  ;;  %v1112_v41 = vadd.f32 %v1102_v38, %v1072_v37 }
 0x407   : > { %4265 = vpow2.f32 %v3747_v39  ;;  %v1134_v42 = vadd.f32 %v5622_v34, %v1114_v40 }
 0x408   : > { %v1132_v43 = vadd.f32 %v5622_v34, %v1112_v41 }
 0x409   : > { %v3750_v44 = vmul.f32 -1.442695, %v1134_v42 }
 0x40a   : > { %v3748_v27 = vmul.f32 -1.442695, %v1132_v43 }
 0x40b   : > { %4267 = vpow2.f32 %v3750_v44 }
 0x40c   : > { %4269 = vpow2.f32 %v3748_v27 }
 0x40e   : > { %v4260_v45 = vpop.eup %4259 }
 0x40f   : > { %v4262_v46 = vpop.eup %4261  ;;  %v1153_v49 = vadd.f32 1.0, %v4260_v45 }
 0x410   : > { %v4264_v50 = vpop.eup %4263  ;;  %v1154_v48 = vadd.f32 1.0, %v4262_v46 }
 0x411   : > { %v4266_v51 = vpop.eup %4265  ;;  %4271 = vrcp.f32 %v1153_v49  ;;  %v1157_v52 = vadd.f32 1.0, %v4264_v50  ;;  %v1413_v49 = vld [vmem:[#allocation24 + $0x8] sm:$0xff]  ;;  %v1412_v50 = vld [vmem:[#allocation24] sm:$0xff] }
 0x412   : > { %v1155_v53 = vadd.f32 1.0, %v4266_v51  ;;  %1433 = vmatprep.subr.mxu0 %v1413_v49  ;;  %v4217_v51 = vld [vmem:[#allocation18 + $0x4] ss:$8 sps:$4 sm:$0xff]  }
 0x413   : > { %4273 = vrcp.f32 %v1157_v52  ;;  %1434 = vmatpush1.msra.mxu0 %v1412_v50  ;;  %v5657_v52 = vadd.s32 8, %v5599_v1 }
 0x414   : > { %4275 = vrcp.f32 %v1155_v53  ;;  %3111 = vmatprep.subr.bf16.mxu0 %v4217_v51  ;;  %v1556_v53 = vand.u32 127, %v957_v0  ;;  %v4218_v0 = vld [vmem:[#allocation18 + $0x10] ss:$8 sps:$4 sm:$0xff]  }
 0x415   : > { %v4268_v54 = vpop.eup %4267  ;;  %4277 = vrcp.f32 %v1154_v48  ;;  %v5017_v48 = vmov 0.0   ;;  %7174 = vst [vmem:[#allocation58_spill] sm:$0xff] %v5657_v52 }
 0x416   : > { %v4270_v55 = vpop.eup %4269  ;;  %v1158_v56 = vadd.f32 1.0, %v4268_v54  ;;  %1497 = vmatprep.mubr.f32.mxu0 %v5017_v48  ;;  %vm1560_vm5 = vcmp.eq.s32.totalorder %v1556_v53, %v5657_v52 }
 0x417   : > { %v1156_v34 = vadd.f32 1.0, %v4270_v55  ;;  %v3769_v54 = vsel %vm1560_vm5, 1.0, %v5017_v48 }
 0x418   : > { %4279 = vrcp.f32 %v1158_v56 }
 0x419   : > { %4281 = vrcp.f32 %v1156_v34  ;;  %v4215_v34 = vld [vmem:[#allocation18] ss:$8 sps:$4 sm:$0xff]  }
 0x41b   : > { %v4272_v57 = vpop.eup %4271 }
 0x41c   : > { %v1171_v59 = vmul.f32 %v4272_v57, %v1129_v22 }
 0x41d   : > { %v4274_v58 = vpop.eup %4273 }
 0x41e   : > { %v4276_v60 = vpop.eup %4275  ;;  %v1175_v61 = vmul.f32 %v4274_v58, %v1133_v32  ;;  %v1184_v6 = vrot.slane %v1171_v59, 5 }
 0x41f   : > { %v4278_v62 = vpop.eup %4277  ;;  %v1173_v63 = vmul.f32 %v4276_v60, %v1131_v19 }
 0x420   : > { %v1190_v3 = vrot.slane %v1175_v61, 5  ;;  %v1204_v4 = vpack.c.bf16 %v1175_v61, %v1175_v61  ;;  %v1172_v12 = vmul.f32 %v4278_v62, %v1130_v26  ;;  %v1553_v61 = vadd.s32 16, %v5599_v1 }
 0x421   : > { %v1185_v10 = vrot.slane %v1173_v63, 5  ;;  %v1202_v7 = vpack.c.bf16 %v1173_v63, %v1171_v59  ;;  %v4220_v59 = vld [vmem:[#allocation18 + $0x14] ss:$8 sps:$4 sm:$0xff]  }
 0x422   : > { %v4280_v11 = vpop.eup %4279  ;;  %v1248_v13 = vshrl.u32 %v1204_v4, 16  ;;  %v1251_v14 = vshll.u32 %v1204_v4, 16  ;;  %v1187_v31 = vrot.slane %v1172_v12, 5  ;;  %v1557_v4 = vadd.s32 8, %v5657_v52 }
 0x423   : > { %v4282_v15 = vpop.eup %4281  ;;  %v1176_v16 = vmul.f32 %v4280_v11, %v1134_v42  ;;  %v5643_v17 = vsel %vm1183_vm3, %v1184_v6, %v1185_v10  ;;  %v5646_v18 = vsel %vm1183_vm3, %v1185_v10, %v1190_v3  ;;  %v1240_v20 = vshrl.u32 %v1202_v7, 16  ;;  %v4223_v3 = vld [vmem:[#allocation18 + $0x24] ss:$8 sps:$4 sm:$0xff]   ;;  %v4226_v11 = vld [vmem:[#allocation18 + $0x34] ss:$8 sps:$4 sm:$0xff]  }
 0x424   : > { %7170 = vst [vmem:[#allocation54_spill] sm:$0xff] %v5643_v17  ;;  %7171 = vst [vmem:[#allocation55_spill] sm:$0xff] %v5646_v18  ;;  %v1174_v22 = vmul.f32 %v4282_v15, %v1132_v43  ;;  %v1243_v23 = vshll.u32 %v1202_v7, 16  ;;  %v1250_v8 = vrot.slane %v1248_v13, 2  ;;  %v1253_v24 = vrot.slane %v1251_v14, 3 }
 0x425   : > { %v1192_v28 = vrot.slane %v1176_v16, 5  ;;  %v1205_v29 = vpack.c.bf16 %v1176_v16, %v1176_v16  ;;  %v1242_v30 = vrot.slane %v1240_v20, 2  ;;  %v1554_v6 = vadd.s32 24, %v5599_v1  ;;  %v4221_v7 = vld [vmem:[#allocation18 + $0x20] ss:$8 sps:$4 sm:$0xff]  }
 0x426   : > { %v1188_v26 = vrot.slane %v1174_v22, 5  ;;  %v1203_v32 = vpack.c.bf16 %v1174_v22, %v1172_v12  ;;  %v1245_v35 = vrot.slane %v1243_v23, 3  ;;  %v1254_v21 = vor.u32 %v1253_v24, %v1250_v8  ;;  %v4224_v13 = vld [vmem:[#allocation18 + $0x30] ss:$8 sps:$4 sm:$0xff]   ;;  %v4229_v15 = vld [vmem:[#allocation18 + $0x44] ss:$8 sps:$4 sm:$0xff]  }
 0x427   : > { %v1265_v9 = vshrl.u32 %v1205_v29, 16  ;;  %v1268_v19 = vshll.u32 %v1205_v29, 16  ;;  %v1558_v10 = vadd.s32 8, %v1553_v61  ;;  %vm1561_vm9 = vcmp.eq.s32.totalorder %v1556_v53, %v1557_v4  ;;  %v4227_v20 = vld [vmem:[#allocation18 + $0x40] ss:$8 sps:$4 sm:$0xff]  }
 0x428   : > { %v5649_v33 = vsel %vm1183_vm3, %v1187_v31, %v1188_v26  ;;  %v5652_v36 = vsel %vm1183_vm3, %v1188_v26, %v1192_v28  ;;  %v1257_v37 = vshrl.u32 %v1203_v32, 16  ;;  %v1260_v38 = vshll.u32 %v1203_v32, 16  ;;  %v4232_v23 = vld [vmem:[#allocation18 + $0x54] ss:$8 sps:$4 sm:$0xff]   ;;  %v4230_v8 = vld [vmem:[#allocation18 + $0x50] ss:$8 sps:$4 sm:$0xff]  }
 0x429   : > { %7172 = vst [vmem:[#allocation56_spill] sm:$0xff] %v5649_v33  ;;  %7173 = vst [vmem:[#allocation57_spill] sm:$0xff] %v5652_v36  ;;  %v1267_v39 = vrot.slane %v1265_v9, 2  ;;  %v1270_v40 = vrot.slane %v1268_v19, 3  ;;  %v1246_v41 = vor.u32 %v1245_v35, %v1242_v30  ;;  %v1559_v12 = vadd.s32 8, %v1554_v6 }
 0x42a   : > { %v1259_v42 = vrot.slane %v1257_v37, 2  ;;  %v1262_v43 = vrot.slane %v1260_v38, 3  ;;  %vm1562_vm10 = vcmp.eq.s32.totalorder %v1556_v53, %v1558_v10  ;;  %v3770_v14 = vsel %vm1561_vm9, 1.0, %v5017_v48  ;;  %v4235_v24 = vld [vmem:[#allocation18 + $0x64] ss:$8 sps:$4 sm:$0xff]  }
 0x42b   : > { %v1271_v44 = vor.u32 %v1270_v40, %v1267_v39  ;;  %v1255_v27 = vsel %vm1238_vm4, %v1246_v41, %v1254_v21  ;;  %v3771_v16 = vsel %vm1562_vm10, 1.0, %v5017_v48  ;;  %vm1563_vm11 = vcmp.eq.s32.totalorder %v1556_v53, %v1559_v12  ;;  %v4233_v28 = vld [vmem:[#allocation18 + $0x60] ss:$8 sps:$4 sm:$0xff]   ;;  %v4238_v29 = vld [vmem:[#allocation18 + $0x74] ss:$8 sps:$4 sm:$0xff]  }
 0x42c   : > { %v1263_v45 = vor.u32 %v1262_v43, %v1259_v42  ;;  %v3772_v22 = vsel %vm1563_vm11, 1.0, %v5017_v48  ;;  %v4236_v30 = vld [vmem:[#allocation18 + $0x70] ss:$8 sps:$4 sm:$0xff]   ;;  %v7023_v31 = vmov 4  }
 0x42d   : > { %4115 = vset.pattern.permute.xlu0 %v7023_v31  ;;  %v1414_v26 = vld [vmem:[#allocation26] sm:$0x3] }
 0x42e   : > { %v1272_v46 = vsel %vm1238_vm4, %v1263_v45, %v1271_v44  ;;  %v5680_v9 = vrot.slane %v1414_v26, %v5602_v2  ;;  %v5683_v19 = vrot.slane %v1414_v26, %v5605_v5  ;;  %v7017_v26 = vmov 14  }
 0x42f   : > { %1403 = vmatprep.mubr.bf16.mxu1 %v1272_v46 }
 0x430   : > { %1404 = vmatmul.mubr.bf16.vlgmr.msra.gmra.mrb[0].mxu1 %v1255_v27 }
 0x431   : > { %3881 = vmatprep.mubr.msk.f32.mxu1 %vm1572_vm6, %v3769_v54 }
 0x503   : > { %v3843_v55 = vpop.f32.mrb[0].mxu1 }
 0x504   : > { %v3844_v56 = vpop.f32.mrb[1].mxu1 }
 0x505   : > { %v3845_v57 = vadd.f32 %v3844_v56, %v3843_v55  ;;  %v3846_v58 = vpop.f32.mrb[2].mxu1  ;;  %v7016_v55 = vmov 7   ;;  %v7020_v56 = vmov 1  }
 0x506   : > { %v3847_v60 = vpop.f32.mrb[3].mxu1 }
 0x507   : > { %v3848_v62 = vadd.f32 %v3847_v60, %v3846_v58  ;;  %3767 = vmatmul.mubr.msk.f32.vlgmr.msra.gmra.mrb[4].mxu0 %vm1426_vm7, %v3845_v57 }
 0x508   : > { %3112 = vmatpush1.bf16.msra.mxu0 %v4215_v34  ;;  %1503 = vmatprep.mubr.f32.mxu0 %v5017_v48  ;;  %v7025_v34 = vmov 10  }
 0x509   : > { %v3887_v63 = vpack.c.bf16 %v3848_v62, %v3845_v57  ;;  %3113 = vmatprep.subr.bf16.mxu0 %v4220_v59  ;;  %v7014_v57 = vmov 2  }
 0x50b   : > { %3768 = vmatmul.mubr.msk.f32.gmra.mrb[6].mxu0 %vm1426_vm7, %v3848_v62  ;;  %3889 = vmatprep.subr.msk.bf16.mxu1 %vm3888_vm8, %v3887_v63  ;;  %v7019_v62 = vmov 13  }
 0x50c   : > { %3114 = vmatpush1.bf16.msra.mxu0 %v4218_v0  ;;  %3892 = vmatpush3.bf16.xpose.msk.msra.mxu1 %vm3888_vm8, %v3887_v63  ;;  %v7024_v0 = vmov 3  }
 0x50d   : > { %3115 = vmatprep.subr.bf16.mxu0 %v4223_v3  ;;  %3143 = vmatprep.mubr.bf16.mxu0 %v5016_v25 }
 0x510   : > { %3116 = vmatpush1.bf16.msra.mxu0 %v4221_v7 }
 0x511   : > { %3117 = vmatprep.subr.bf16.mxu0 %v4226_v11 }
 0x513   : > { %3882 = vmatmul.mubr.msk.f32.vlgmr.msra.gmra.mrb[4].mxu1 %vm1572_vm6, %v3770_v14  ;;  %v7021_v14 = vmov 5  }
 0x514   : > { %3118 = vmatpush1.bf16.msra.mxu0 %v4224_v13  ;;  %3884 = vmatprep.mubr.msk.f32.mxu1 %vm1572_vm6, %v3771_v16 }
 0x515   : > { %3119 = vmatprep.subr.bf16.mxu0 %v4229_v15 }
 0x517   : > { %3885 = vmatmul.mubr.msk.f32.gmra.mrb[6].mxu1 %vm1572_vm6, %v3772_v22  ;;  %v7015_v22 = vmov 8  }
 0x518   : > { %3120 = vmatpush1.bf16.msra.mxu0 %v4227_v20  ;;  %v7011_v20 = vmov 6  }
 0x519   : > { %3121 = vmatprep.subr.bf16.mxu0 %v4232_v23  ;;  %v7027_v23 = vmov 9  }
 0x51c   : > { %3122 = vmatpush1.bf16.msra.mxu0 %v4230_v8  ;;  %v7012_v8 = vmov 12  }
 0x51d   : > { %3123 = vmatprep.subr.bf16.mxu0 %v4235_v24 }
 0x520   : > { %3124 = vmatpush1.bf16.msra.mxu0 %v4233_v28  ;;  %v7013_v28 = vmov 11  }
 0x521   : > { %3125 = vmatprep.subr.bf16.mxu0 %v4238_v29 }
 0x524   : > { %3126 = vmatpush1.bf16.msra.mxu0 %v4236_v30 }
 0x527   : > { %3144 = vmatmul.mubr.bf16.vlgmr.msra.gmra.mrb[8].mxu0 %v5595_v47 }
 0x5da   : > { %v5675_v32 = vpop.f32.mrb[4].mxu0 }
 0x5db   : > { %v5677_v35 = vpop.f32.mrb[5].mxu0  ;;  %v5753_v29 = vadd.f32 %v5675_v32, %v5680_v9 }
 0x5dc   : > { %v5757_v30 = vadd.f32 %v5677_v35, %v5683_v19 }
 0x5de   : > { %v1505_v21 = vpop.f32.mrb[6].mxu0 }
 0x5df   : > { %v1506_v37 = vadd.f32 %v1505_v21, %v5680_v9  ;;  %v1507_v38 = vpop.f32.mrb[7].mxu0  ;;  %v1514_v21 = vand.u32 2147483647, %v5753_v29 }
 0x5e0   : > { %v1508_v47 = vadd.f32 %v1507_v38, %v5683_v19  ;;  %v7010_v38 = vmov 15  }
 0x5e1   : > { %v1516_v39 = vand.u32 2147483647, %v1506_v37  ;;  %v1512_v4 = vmax.f32 %v1506_v37, 0.0  ;;  %v1515_v37 = vand.u32 2147483647, %v5757_v30  ;;  %v1518_v32 = vsub.f32 0.0, %v1514_v21 }
 0x5e2   : > { %v1517_v40 = vand.u32 2147483647, %v1508_v47  ;;  %v1513_v10 = vmax.f32 %v1508_v47, 0.0 }
 0x5e3   : > { %v1520_v41 = vsub.f32 0.0, %v1516_v39  ;;  %v1519_v35 = vsub.f32 0.0, %v1515_v37  ;;  %v1522_v9 = vmul.f32 1.442695, %v1518_v32 }
 0x5e4   : > { %v1521_v42 = vsub.f32 0.0, %v1517_v40 }
 0x5e5   : > { %v1526_v43 = vmul.f32 1.442695, %v1520_v41  ;;  %v1524_v19 = vmul.f32 1.442695, %v1519_v35 }
 0x5e6   : > { %v1528_v44 = vmul.f32 1.442695, %v1521_v42  ;;  %v3883_v27 = vpop.f32.mrb[4].mxu1 }
 0x5e7   : > { %4283 = vpow2.f32 %v1526_v43  ;;  %1676 = vst.msk [vmem:[#allocation7 + $0x8] sm:$0xff] %vm1674_vm12, %v3883_v27  ;;  %v1655_v45 = vpop.f32.mrb[5].mxu1  ;;  %v1681_v43 = vld [vmem:[#allocation27 + $0x10] sm:$0xff] }
 0x5e8   : > { %4285 = vpow2.f32 %v1528_v44  ;;  %1675 = vst.msk [vmem:[#allocation7] sm:$0xff] %vm1674_vm12, %v1655_v45  ;;  %v1682_v44 = vld [vmem:[#allocation27 + $0x18] sm:$0xff]  ;;  %v1687_v27 = vmul.f32 1.442695, %v1681_v43 }
 0x5e9   : > { %v1689_v45 = vmul.f32 1.442695, %v1682_v44 }
 0x5ea   : > { %v3886_v46 = vpop.f32.mrb[6].mxu1 }
 0x5eb   : > { %1678 = vst.msk [vmem:[#allocation7 + $0x18] sm:$0xff] %vm1674_vm12, %v3886_v46  ;;  %v1665_v49 = vpop.f32.mrb[7].mxu1 }
 0x5ec   : > { %1677 = vst.msk [vmem:[#allocation7 + $0x10] sm:$0xff] %vm1674_vm12, %v1665_v49 }
 0x5ee   : > { %v5687_v50 = vld [vmem:[#allocation7 + $0x8] sm:$0xff] }
 0x5ef   : > { %2069 = vperm.xlu0 %4115, %v5687_v50   ;;  %1747 = vperm.xlu1 %4111, %v5687_v50   ;;  %v5715_v13 = vld [vmem:[#allocation7] sm:$0xff] }
 0x5f1   : > { %v4284_v51 = vpop.eup %4283 }
 0x5f2   : > { %v4286_v48 = vpop.eup %4285  ;;  %v1532_v53 = vadd.f32 1.0, %v4284_v51  ;;  %v5741_v24 = vld [vmem:[#allocation7 + $0x18] sm:$0xff] }
 0x5f3   : > { %v1533_v54 = vadd.f32 1.0, %v4286_v48  ;;  %4118 = vset.pattern.permute.xlu0 %v7016_v55  ;;  %4112 = vset.pattern.permute.xlu1 %v7020_v56  ;;  %v5773_v47 = vld [vmem:[#allocation7 + $0x10] sm:$0xff]  ;;  %v1510_v48 = vmax.f32 %v5753_v29, 0.0 }
 0x5f4   : > { %4287 = vlog2.f32 %v1532_v53  ;;  %2309 = vperm.xlu0 %4118, %v5687_v50   ;;  %1829 = vperm.xlu1 %4112, %v5687_v50   ;;  %v1511_v53 = vmax.f32 %v5757_v30, 0.0 }
 0x5f5   : > { %4289 = vlog2.f32 %v1533_v54 }
 0x5f6   : > { %4291 = vpow2.f32 %v1522_v9 }
 0x5f7   : > { %4293 = vpow2.f32 %v1524_v19 }
 0x5f8   : > { %4121 = vset.pattern.permute.xlu0 %v7025_v34  ;;  %4113 = vset.pattern.permute.xlu1 %v7014_v57 }
 0x5f9   : > { %2549 = vperm.xlu0 %4121, %v5687_v50   ;;  %1909 = vperm.xlu1 %4113, %v5687_v50  }
 0x5fa   : > { %v5699_v58 = vpop.f32.mrb[8].mxu0 }
 0x5fb   : > { %7175 = vst [vmem:[#allocation59_spill] sm:$0xff] %v5699_v58  ;;  %v5701_v59 = vpop.f32.mrb[9].mxu0 }
 0x5fc   : > { %7176 = vst [vmem:[#allocation60_spill] sm:$0xff] %v5701_v59  ;;  %v5703_v60 = vpop.f32.mrb[10].mxu0 }
 0x5fd   : > { %7177 = vst [vmem:[#allocation61_spill] sm:$0xff] %v5703_v60  ;;  %v5705_v61 = vpop.f32.mrb[11].mxu0  ;;  %4124 = vset.pattern.permute.xlu0 %v7019_v62  ;;  %4114 = vset.pattern.permute.xlu1 %v7024_v0 }
 0x5fe   : > { %7178 = vst [vmem:[#allocation62_spill] sm:$0xff] %v5705_v61  ;;  %v4288_v63 = vpop.eup %4287  ;;  %2789 = vperm.xlu0 %4124, %v5687_v50   ;;  %1989 = vperm.xlu1 %4114, %v5687_v50  }
 0x5ff   : > { %v4290_v3 = vpop.eup %4289  ;;  %v1539_v6 = vmul.f32 0.6931472, %v4288_v63 }
 0x600   : > { %v1541_v7 = vmul.f32 0.6931472, %v4290_v3  ;;  %v4292_v39 = vpop.eup %4291 }
 0x601   : > { %v5711_v11 = vadd.f32 %v1539_v6, %v1512_v4  ;;  %v4294_v40 = vpop.eup %4293  ;;  %v1530_v41 = vadd.f32 1.0, %v4292_v39  ;;  %v1679_v4 = vld [vmem:[#allocation27] sm:$0xff] }
 0x602   : > { %v5713_v12 = vadd.f32 %v1541_v7, %v1513_v10  ;;  %4127 = vset.pattern.permute.xlu0 %v5016_v25  ;;  %4116 = vset.pattern.permute.xlu1 %v7021_v14  ;;  %v1531_v42 = vadd.f32 1.0, %v4294_v40  ;;  %v1680_v10 = vld [vmem:[#allocation27 + $0x8] sm:$0xff]  ;;  %v1683_v29 = vmul.f32 1.442695, %v1679_v4  ;;  %v5839_v40 = vsub.s32 2, %v5599_v1 }
 0x603   : > { %2149 = vperm.xlu1 %4116, %v5687_v50   ;;  %1742 = vperm.xlu0 %4127, %v5715_v13   ;;  %v5723_v15 = vmul.f32 %v5711_v11, %v5646_v18  ;;  %4295 = vlog2.f32 %v1530_v41  ;;  %v1685_v32 = vmul.f32 1.442695, %v1680_v10 }
 0x604   : > { %v5727_v16 = vmul.f32 %v5713_v12, %v5652_v36  ;;  %4297 = vlog2.f32 %v1531_v42 }
 0x605   : > { %4299 = vpow2.f32 %v1687_v27 }
 0x606   : > { %4301 = vpow2.f32 %v1689_v45  ;;  %v5851_v45 = vsub.s32 3, %v5599_v1 }
 0x607   : > { %4117 = vset.pattern.permute.xlu1 %v7011_v20  ;;  %4133 = vset.pattern.permute.xlu0 %v7011_v20  ;;  %4303 = vpow2.f32 %v1683_v29 }
 0x608   : > { %2229 = vperm.xlu1 %4117, %v5687_v50   ;;  %2225 = vperm.xlu0 %4133, %v5715_v13   ;;  %4305 = vpow2.f32 %v1685_v32  ;;  %v5884_v32 = vsub.s32 7, %v5599_v1 }
 0x60c   : > { %4119 = vset.pattern.permute.xlu1 %v7015_v22  ;;  %4136 = vset.pattern.permute.xlu0 %v7027_v23 }
 0x60d   : > { %2389 = vperm.xlu1 %4119, %v5687_v50   ;;  %2465 = vperm.xlu0 %4136, %v5715_v13   ;;  %v4296_v46 = vpop.eup %4295 }
 0x60e   : > { %v4298_v49 = vpop.eup %4297 }
 0x60f   : > { %v1537_v51 = vmul.f32 0.6931472, %v4298_v49  ;;  %v4300_v63 = vpop.eup %4299  ;;  %v5860_v49 = vsub.s32 4, %v5599_v1 }
 0x610   : > { %v4302_v6 = vpop.eup %4301  ;;  %v5811_v7 = vsub.f32 0.0, %v4300_v63 }
 0x611   : > { %4120 = vset.pattern.permute.xlu1 %v7027_v23  ;;  %4139 = vset.pattern.permute.xlu0 %v7012_v8  ;;  %v5807_v3 = vadd.f32 %v1537_v51, %v1511_v53  ;;  %v5817_v30 = vsub.f32 0.0, %v4302_v6 }
 0x612   : > { %2469 = vperm.xlu1 %4120, %v5687_v50   ;;  %2705 = vperm.xlu0 %4139, %v5715_v13  }
 0x613   : > { %v5821_v37 = vrot.slane %v5807_v3, %v5602_v2  ;;  %v5836_v39 = vrot.slane %v5807_v3, %v5605_v5  ;;  %v5876_v10 = vrot.slane %v5807_v3, %v5851_v45  ;;  %v5881_v29 = vmul.f32 %v5807_v3, %v5649_v33 }
 0x615   : > { %v1731_v9 = vmul.f32 %v5821_v37, %v5817_v30  ;;  %v1815_v44 = vmul.f32 %v5836_v39, %v5817_v30  ;;  %v5969_v18 = vrot.slane %v5881_v29, %v5839_v40 }
 0x616   : > { %4122 = vset.pattern.permute.xlu1 %v7013_v28  ;;  %4144 = vset.pattern.permute.xlu0 %v7015_v22 }
 0x617   : > { %2629 = vperm.xlu1 %4122, %v5687_v50   ;;  %2417 = vperm.xlu0 %4144, %v5741_v24   ;;  %v1738_v42 = vmul.f32 1.442695, %v1731_v9  ;;  %v1822_v53 = vmul.f32 1.442695, %v1815_v44  ;;  %7187 = vst [vmem:[#allocation71_spill] sm:$0xff] %v5969_v18 }
 0x61b   : > { %4123 = vset.pattern.permute.xlu1 %v7012_v8  ;;  %4147 = vset.pattern.permute.xlu0 %v7014_v57 }
 0x61c   : > { %2709 = vperm.xlu1 %4123, %v5687_v50   ;;  %1937 = vperm.xlu0 %4147, %v5741_v24  }
 0x620   : > { %4125 = vset.pattern.permute.xlu1 %v7017_v26  ;;  %4150 = vset.pattern.permute.xlu0 %v7013_v28 }
 0x621   : > { %2869 = vperm.xlu1 %4125, %v5687_v50   ;;  %2657 = vperm.xlu0 %4150, %v5741_v24  }
 0x625   : > { %4126 = vset.pattern.permute.xlu1 %v7010_v38  ;;  %4152 = vset.pattern.permute.xlu0 %v7012_v8 }
 0x626   : > { %2949 = vperm.xlu1 %4126, %v5687_v50   ;;  %2737 = vperm.xlu0 %4152, %v5741_v24   ;;  %v1535_v50 = vmul.f32 0.6931472, %v4296_v46  ;;  %v5856_v46 = vrot.slane %v5807_v3, %v5839_v40 }
 0x628   : > { %v5805_v54 = vadd.f32 %v1535_v50, %v1510_v48  ;;  %v4304_v50 = vpop.eup %4303 }
 0x629   : > { %v4306_v48 = vpop.eup %4305 }
 0x62a   : > { %4128 = vset.pattern.permute.xlu1 %v7020_v56  ;;  %4155 = vset.pattern.permute.xlu0 %v7011_v20  ;;  %v5815_v21 = vrot.slane %v5805_v54, %v5602_v2  ;;  %v5831_v19 = vrot.slane %v5805_v54, %v5605_v5  ;;  %v5848_v27 = vrot.slane %v5805_v54, %v5839_v40 }
 0x62b   : > { %1825 = vperm.xlu1 %4128, %v5715_v13   ;;  %2257 = vperm.xlu0 %4155, %v5741_v24   ;;  %v5866_v4 = vrot.slane %v5805_v54, %v5851_v45  ;;  %v5870_v6 = vmul.f32 %v5805_v54, %v5643_v17  ;;  %v5891_v9 = vrot.slane %v5805_v54, %v5860_v49 }
 0x62c   : > { %v1730_v35 = vmul.f32 %v5815_v21, %v5811_v7  ;;  %v1814_v43 = vmul.f32 %v5831_v19, %v5811_v7  ;;  %v1894_v63 = vmul.f32 %v5848_v27, %v5811_v7 }
 0x62d   : > { %v1974_v44 = vmul.f32 %v5866_v4, %v5811_v7  ;;  %v5909_v20 = vrot.slane %v5870_v6, %v5860_v49  ;;  %v5927_v8 = vrot.slane %v5870_v6, %v5884_v32 }
 0x62e   : > { %v1736_v41 = vmul.f32 1.442695, %v1730_v35  ;;  %v1820_v51 = vmul.f32 1.442695, %v1814_v43  ;;  %v5887_v35 = vsub.s32 5, %v5599_v1 }
 0x62f   : > { %4129 = vset.pattern.permute.xlu1 %v7014_v57  ;;  %4158 = vset.pattern.permute.xlu0 %v5016_v25  ;;  %v1900_v43 = vmul.f32 1.442695, %v1894_v63  ;;  %7180 = vst [vmem:[#allocation64_spill] sm:$0xff] %v5909_v20  ;;  %v5923_v63 = vrot.slane %v5881_v29, %v5602_v2 }
 0x630   : > { %1905 = vperm.xlu1 %4129, %v5715_v13   ;;  %1772 = vperm.xlu0 %4158, %v5773_v47   ;;  %4307 = vpow2.f32 %v1736_v41  ;;  %v5894_v41 = vsub.f32 0.0, %v4304_v50  ;;  %v5913_v50 = vrot.slane %v5870_v6, %v5602_v2 }
 0x631   : > { %4309 = vpow2.f32 %v1738_v42  ;;  %v5899_v42 = vsub.s32 6, %v5599_v1 }
 0x632   : > { %4311 = vpow2.f32 %v1820_v51 }
 0x633   : > { %4313 = vpow2.f32 %v1822_v53  ;;  %v5919_v53 = vrot.slane %v5881_v29, %v5860_v49 }
 0x634   : > { %4130 = vset.pattern.permute.xlu1 %v7024_v0  ;;  %4161 = vset.pattern.permute.xlu0 %v7027_v23  ;;  %4315 = vpow2.f32 %v1900_v43 }
 0x635   : > { %1985 = vperm.xlu1 %4130, %v5715_v13   ;;  %2493 = vperm.xlu0 %4161, %v5773_v47   ;;  %7181 = vst [vmem:[#allocation65_spill] sm:$0xff] %v5919_v53 }
 0x639   : > { %4131 = vset.pattern.permute.xlu1 %v7023_v31  ;;  %4164 = vset.pattern.permute.xlu0 %v7024_v0  ;;  %v5957_v0 = vrot.slane %v5723_v15, %v5839_v40 }
 0x63a   : > { %2065 = vperm.xlu1 %4131, %v5715_v13   ;;  %2013 = vperm.xlu0 %4164, %v5773_v47   ;;  %v4308_v57 = vpop.eup %4307 }
 0x63b   : > { %v1764_v43 = vmul.f32 0.0, %v4308_v57  ;;  %v5978_v57 = vrot.slane %v5723_v15, %v5887_v35 }
 0x63e   : > { %4132 = vset.pattern.permute.xlu1 %v7021_v14  ;;  %4166 = vset.pattern.permute.xlu0 %v7023_v31  ;;  %v5953_v31 = vrot.slane %v5807_v3, %v5887_v35 }
 0x63f   : > { %2145 = vperm.xlu1 %4132, %v5715_v13   ;;  %2093 = vperm.xlu0 %4166, %v5773_v47  }
 0x640   : > { %7185 = vst [vmem:[#allocation69_spill] sm:$0xff] %v5953_v31  ;;  %v2135_v60 = vmul.f32 %v5953_v31, %v5817_v30  ;;  %v6013_v31 = vrot.slane %v5807_v3, %v5884_v32 }
 0x642   : > { %7194 = vst [vmem:[#allocation77_spill] sm:$0xff] %v6013_v31 }
 0x643   : > { %4134 = vset.pattern.permute.xlu1 %v7016_v55  ;;  %4169 = vset.pattern.permute.xlu0 %v7019_v62 }
 0x644   : > { %2305 = vperm.xlu1 %4134, %v5715_v13   ;;  %2813 = vperm.xlu0 %4169, %v5773_v47  }
 0x648   : > { %4135 = vset.pattern.permute.xlu1 %v7015_v22  ;;  %4172 = vset.pattern.permute.xlu0 %v7016_v55  ;;  %v5938_v22 = vrot.slane %v5870_v6, %v5605_v5  ;;  %v5942_v55 = vrot.slane %v5881_v29, %v5605_v5 }
 0x649   : > { %2385 = vperm.xlu1 %4135, %v5715_v13   ;;  %2333 = vperm.xlu0 %4172, %v5773_v47  }
 0x64a   : > { %7182 = vst [vmem:[#allocation66_spill] sm:$0xff] %v5938_v22  ;;  %7183 = vst [vmem:[#allocation67_spill] sm:$0xff] %v5942_v55 }
 0x64d   : > { %4137 = vset.pattern.permute.xlu1 %v7025_v34  ;;  %4174 = vset.pattern.permute.xlu0 %v7010_v38  ;;  %v5961_v34 = vrot.slane %v5727_v16, %v5839_v40 }
 0x64e   : > { %2545 = vperm.xlu1 %4137, %v5715_v13   ;;  %2977 = vperm.xlu0 %4174, %v5741_v24  }
 0x652   : > { %4138 = vset.pattern.permute.xlu1 %v7013_v28  ;;  %v2054_v28 = vmul.f32 %v5891_v9, %v5811_v7 }
 0x653   : > { %2625 = vperm.xlu1 %4138, %v5715_v13  }
 0x654   : > { %v2060_v52 = vmul.f32 1.442695, %v2054_v28 }
 0x657   : > { %4140 = vset.pattern.permute.xlu1 %v7019_v62  ;;  %v4310_v62 = vpop.eup %4309 }
 0x658   : > { %2785 = vperm.xlu1 %4140, %v5715_v13   ;;  %v1765_v17 = vmul.f32 0.0, %v4310_v62  ;;  %v4312_v28 = vpop.eup %4311 }
 0x659   : > { %v4314_v62 = vpop.eup %4313 }
 0x65c   : > { %4141 = vset.pattern.permute.xlu1 %v7017_v26  ;;  %v5946_v26 = vrot.slane %v5805_v54, %v5887_v35 }
 0x65d   : > { %2865 = vperm.xlu1 %4141, %v5715_v13  }
 0x65e   : > { %7184 = vst [vmem:[#allocation68_spill] sm:$0xff] %v5946_v26 }
 0x661   : > { %4142 = vset.pattern.permute.xlu1 %v7010_v38  ;;  %v5905_v38 = vrot.slane %v5807_v3, %v5860_v49 }
 0x662   : > { %2945 = vperm.xlu1 %4142, %v5715_v13   ;;  %v1895_v13 = vmul.f32 %v5856_v46, %v5817_v30 }
 0x663   : > { %7179 = vst [vmem:[#allocation63_spill] sm:$0xff] %v5905_v38  ;;  %v2055_v14 = vmul.f32 %v5905_v38, %v5817_v30 }
 0x664   : > { %v1902_v51 = vmul.f32 1.442695, %v1895_v13  ;;  %v5934_v13 = vrot.slane %v5881_v29, %v5884_v32 }
 0x665   : > { %v2062_v61 = vmul.f32 1.442695, %v2055_v14 }
 0x666   : > { %4143 = vset.pattern.permute.xlu1 %v5016_v25  ;;  %v5896_v25 = vsub.f32 0.0, %v4306_v48  ;;  %v1975_v48 = vmul.f32 %v5876_v10, %v5817_v30  ;;  %4317 = vpow2.f32 %v1902_v51  ;;  %v2134_v51 = vmul.f32 %v5946_v26, %v5811_v7 }
 0x667   : > { %1777 = vperm.xlu1 %4143, %v5741_v24  }
 0x668   : > { %v1982_v23 = vmul.f32 1.442695, %v1975_v48  ;;  %v7188_v48 = vmov 9  }
 0x66b   : > { %4145 = vset.pattern.permute.xlu1 %v7020_v56  ;;  %v1980_v56 = vmul.f32 1.442695, %v1974_v44  ;;  %v5965_v44 = vrot.slane %v5870_v6, %v5839_v40 }
 0x66c   : > { %1857 = vperm.xlu1 %4145, %v5741_v24  }
 0x66d   : > { %7186 = vst [vmem:[#allocation70_spill] sm:$0xff] %v5965_v44  ;;  %4319 = vpow2.f32 %v1980_v56  ;;  %v1729_v56 = vmul.f32 %v5821_v37, %v5896_v25  ;;  %v6009_v37 = vrot.slane %v5805_v54, %v5884_v32 }
 0x66e   : > { %v1748_v36 = vpop.permute.xlu1 %1747  ;;  %4321 = vpow2.f32 %v1982_v23  ;;  %v2140_v23 = vmul.f32 1.442695, %v2134_v51  ;;  %v6018_v51 = vrot.slane %v5870_v6, %v5851_v45 }
 0x66f   : > { %v1760_v1 = vmul.f32 %v5913_v50, %v1748_v36  ;;  %v1761_v33 = vmul.f32 %v5923_v63, %v1748_v36  ;;  %v1728_v36 = vmul.f32 %v5815_v21, %v5894_v41  ;;  %4323 = vpow2.f32 %v2060_v52  ;;  %7193 = vst [vmem:[#allocation76_spill] sm:$0xff] %v6009_v37 }
 0x670   : > { %4146 = vset.pattern.permute.xlu1 %v7188_v48  ;;  %v5991_v48 = vrot.slane %v5727_v16, %v5887_v35  ;;  %v6003_v21 = vrot.slane %v5807_v3, %v5899_v42  ;;  %4325 = vpow2.f32 %v2062_v61  ;;  %v6035_v61 = vrot.slane %v5713_v12, %v5602_v2 }
 0x671   : > { %v5982_v59 = vadd.f32 %v1764_v43, %v1760_v1  ;;  %v5984_v58 = vadd.f32 %v1765_v17, %v1761_v33  ;;  %2497 = vperm.xlu1 %4146, %v5741_v24   ;;  %v5997_v1 = vrot.slane %v5805_v54, %v5899_v42  ;;  %v1734_v54 = vmul.f32 1.442695, %v1729_v56 }
 0x672   : > { %7192 = vst [vmem:[#allocation75_spill] sm:$0xff] %v6003_v21  ;;  %4327 = vpow2.f32 %v2140_v23  ;;  %v2215_v26 = vmul.f32 %v6003_v21, %v5817_v30  ;;  %7198 = vst [vmem:[#allocation80_spill] sm:$0xff] %v6035_v61  ;;  %v2295_v23 = vmul.f32 %v6013_v31, %v5817_v30  ;;  %v6047_v21 = vrot.slane %v5881_v29, %v5851_v45 }
 0x673   : > { %7189 = vst [vmem:[#allocation72_spill] sm:$0xff] %v5982_v59  ;;  %7190 = vst [vmem:[#allocation73_spill] sm:$0xff] %v5984_v58  ;;  %v1830_v17 = vpop.permute.xlu1 %1829  ;;  %v1846_v33 = vmul.f32 %v4312_v28, %v5982_v59  ;;  %v1847_v14 = vmul.f32 %v4314_v62, %v5984_v58  ;;  %v7195_v28 = vmov 10   ;;  %v2142_v62 = vmul.f32 1.442695, %v2135_v60  ;;  %v4316_v59 = vpop.eup %4315 }
 0x674   : > { %7191 = vst [vmem:[#allocation74_spill] sm:$0xff] %v5997_v1  ;;  %v1842_v43 = vmul.f32 %v5938_v22, %v1830_v17  ;;  %v1843_v52 = vmul.f32 %v5942_v55, %v1830_v17  ;;  %v1732_v58 = vmul.f32 1.442695, %v1728_v36  ;;  %v2214_v3 = vmul.f32 %v5997_v1, %v5811_v7  ;;  %v4318_v55 = vpop.eup %4317 }
 0x675   : > { %4148 = vset.pattern.permute.xlu1 %v7195_v28  ;;  %v6031_v60 = vrot.slane %v5711_v11, %v5602_v2  ;;  %4329 = vpow2.f32 %v2142_v62  ;;  %v7199_v28 = vmov 3   ;;  %v2222_v62 = vmul.f32 1.442695, %v2215_v26 }
 0x676   : > { %v6020_v22 = vadd.f32 %v1846_v33, %v1842_v43  ;;  %v6022_v17 = vadd.f32 %v1847_v14, %v1843_v52  ;;  %2577 = vperm.xlu1 %4148, %v5741_v24   ;;  %v2294_v14 = vmul.f32 %v6009_v37, %v5811_v7  ;;  %4331 = vpow2.f32 %v1732_v58 }
 0x677   : > { %v4320_v1 = vpop.eup %4319  ;;  %4333 = vpow2.f32 %v1734_v54  ;;  %v2375_v38 = vmul.f32 %v6035_v61, %v5817_v30  ;;  %v6075_v26 = vrot.slane %v5713_v12, %v5605_v5 }
 0x678   : > { %7196 = vst [vmem:[#allocation78_spill] sm:$0xff] %v6020_v22  ;;  %7197 = vst [vmem:[#allocation79_spill] sm:$0xff] %v6022_v17  ;;  %v1910_v36 = vpop.permute.xlu1 %1909  ;;  %v1926_v33 = vmul.f32 %v4316_v59, %v6020_v22  ;;  %v1927_v56 = vmul.f32 %v4318_v55, %v6022_v17  ;;  %v6052_v55 = vrot.slane %v5870_v6, %v5887_v35  ;;  %v2220_v17 = vmul.f32 1.442695, %v2214_v3  ;;  %v4322_v22 = vpop.eup %4321 }
 0x679   : > { %v1922_v43 = vmul.f32 %v5965_v44, %v1910_v36  ;;  %v1923_v52 = vmul.f32 %v5969_v18, %v1910_v36  ;;  %v6056_v59 = vrot.slane %v5881_v29, %v5887_v35  ;;  %v4324_v37 = vpop.eup %4323  ;;  %v2300_v18 = vmul.f32 1.442695, %v2294_v14  ;;  %7205 = vst [vmem:[#allocation86_spill] sm:$0xff] %v6075_v26 }
 0x67a   : > { %4149 = vset.pattern.permute.xlu1 %v7199_v28  ;;  %7200 = vst [vmem:[#allocation81_spill] sm:$0xff] %v6052_v55  ;;  %v2374_v28 = vmul.f32 %v6031_v60, %v5811_v7  ;;  %v2302_v44 = vmul.f32 1.442695, %v2295_v23  ;;  %4335 = vpow2.f32 %v2220_v17  ;;  %v6081_v23 = vrot.slane %v5870_v6, %v5899_v42 }
 0x67b   : > { %7201 = vst [vmem:[#allocation82_spill] sm:$0xff] %v6056_v59  ;;  %v6058_v36 = vadd.f32 %v1926_v33, %v1922_v43  ;;  %v6060_v31 = vadd.f32 %v1927_v56, %v1923_v52  ;;  %2017 = vperm.xlu1 %4149, %v5741_v24   ;;  %v6071_v56 = vrot.slane %v5711_v11, %v5605_v5  ;;  %v2070_v43 = vpop.permute.xlu0 %2069  ;;  %4337 = vpow2.f32 %v2222_v62 }
 0x67c   : > { %7206 = vst [vmem:[#allocation87_spill] sm:$0xff] %v6081_v23  ;;  %v6086_v52 = vrot.slane %v5881_v29, %v5899_v42  ;;  %4339 = vpow2.f32 %v2300_v18  ;;  %v2382_v6 = vmul.f32 1.442695, %v2375_v38  ;;  %v2455_v29 = vmul.f32 %v6075_v26, %v5817_v30 }
 0x67d   : > { %7202 = vst [vmem:[#allocation83_spill] sm:$0xff] %v6058_v36  ;;  %7203 = vst [vmem:[#allocation84_spill] sm:$0xff] %v6060_v31  ;;  %v1990_v58 = vpop.permute.xlu1 %1989  ;;  %v2006_v3 = vmul.f32 %v4320_v1, %v6058_v36  ;;  %v2007_v33 = vmul.f32 %v4322_v22, %v6060_v31  ;;  %v4326_v1 = vpop.eup %4325  ;;  %v7207_v22 = vmov 4   ;;  %v2380_v31 = vmul.f32 1.442695, %v2374_v28 }
 0x67e   : > { %7204 = vst [vmem:[#allocation85_spill] sm:$0xff] %v6071_v56  ;;  %v2002_v54 = vmul.f32 %v6018_v51, %v1990_v58  ;;  %v2003_v14 = vmul.f32 %v6047_v21, %v1990_v58  ;;  %7208 = vst [vmem:[#allocation88_spill] sm:$0xff] %v6086_v52  ;;  %v6090_v36 = vrot.slane %v5711_v11, %v5839_v40  ;;  %v4328_v61 = vpop.eup %4327  ;;  %4341 = vpow2.f32 %v2302_v44 }
 0x67f   : > { %4151 = vset.pattern.permute.xlu1 %v7207_v22  ;;  %v2454_v62 = vmul.f32 %v6071_v56, %v5811_v7  ;;  %v6103_v28 = vrot.slane %v5713_v12, %v5839_v40  ;;  %v4330_v44 = vpop.eup %4329  ;;  %v6115_v40 = vrot.slane %v5711_v11, %v5851_v45  ;;  %4343 = vpow2.f32 %v2380_v31 }
 0x680   : > { %7209 = vst [vmem:[#allocation89_spill] sm:$0xff] %v6090_v36  ;;  %v6092_v58 = vadd.f32 %v2006_v3, %v2002_v54  ;;  %v6094_v17 = vadd.f32 %v2007_v33, %v2003_v14  ;;  %2097 = vperm.xlu1 %4151, %v5741_v24   ;;  %v2082_v3 = vmul.f32 %v5909_v20, %v2070_v43  ;;  %v4332_v56 = vpop.eup %4331  ;;  %4345 = vpow2.f32 %v2382_v6 }
 0x681   : > { %7212 = vst [vmem:[#allocation92_spill] sm:$0xff] %v6103_v28  ;;  %v2083_v33 = vmul.f32 %v5919_v53, %v2070_v43  ;;  %v2534_v26 = vmul.f32 %v6090_v36, %v5811_v7  ;;  %7213 = vst [vmem:[#allocation93_spill] sm:$0xff] %v6115_v40  ;;  %v6147_v36 = vrot.slane %v5713_v12, %v5851_v45 }
 0x682   : > { %7210 = vst [vmem:[#allocation90_spill] sm:$0xff] %v6092_v58  ;;  %7211 = vst [vmem:[#allocation91_spill] sm:$0xff] %v6094_v17  ;;  %v2086_v54 = vmul.f32 %v4324_v37, %v6092_v58  ;;  %v2087_v18 = vmul.f32 %v4326_v1, %v6094_v17  ;;  %v2150_v38 = vpop.permute.xlu1 %2149  ;;  %v7216_v37 = vmov 5   ;;  %v6124_v1 = vrot.slane %v5723_v15, %v5602_v2 }
 0x683   : > { %v2162_v14 = vmul.f32 %v6052_v55, %v2150_v38  ;;  %v2163_v22 = vmul.f32 %v6056_v59, %v2150_v38  ;;  %v6128_v38 = vrot.slane %v5727_v16, %v5602_v2  ;;  %v6133_v17 = vrot.slane %v5723_v15, %v5605_v5 }
 0x684   : > { %v6117_v20 = vadd.f32 %v2086_v54, %v2082_v3  ;;  %v6119_v43 = vadd.f32 %v2087_v18, %v2083_v33  ;;  %4153 = vset.pattern.permute.xlu1 %v7216_v37  ;;  %7217 = vst [vmem:[#allocation96_spill] sm:$0xff] %v6124_v1  ;;  %v6137_v3 = vrot.slane %v5727_v16, %v5605_v5  ;;  %v2460_v33 = vmul.f32 1.442695, %v2454_v62  ;;  %v6139_v54 = vpop.eup %4333 }
 0x685   : > { %7218 = vst [vmem:[#allocation97_spill] sm:$0xff] %v6128_v38  ;;  %2177 = vperm.xlu1 %4153, %v5741_v24   ;;  %7219 = vst [vmem:[#allocation98_spill] sm:$0xff] %v6133_v17  ;;  %v2462_v2 = vmul.f32 1.442695, %v2455_v29  ;;  %v2535_v59 = vmul.f32 %v6103_v28, %v5817_v30  ;;  %v2540_v55 = vmul.f32 1.442695, %v2534_v26  ;;  %v2614_v62 = vmul.f32 %v6115_v40, %v5811_v7  ;;  %v4336_v5 = vpop.eup %4335 }
 0x686   : > { %7214 = vst [vmem:[#allocation94_spill] sm:$0xff] %v6117_v20  ;;  %7215 = vst [vmem:[#allocation95_spill] sm:$0xff] %v6119_v43  ;;  %v2166_v18 = vmul.f32 %v4328_v61, %v6117_v20  ;;  %v2167_v58 = vmul.f32 %v4330_v44, %v6119_v43  ;;  %v4338_v43 = vpop.eup %4337  ;;  %v7223_v20 = vmov 13   ;;  %4347 = vpow2.f32 %v2460_v33 }
 0x687   : > { %7220 = vst [vmem:[#allocation99_spill] sm:$0xff] %v6137_v3  ;;  %v2230_v31 = vpop.permute.xlu1 %2229  ;;  %v6160_v26 = vrot.slane %v5723_v15, %v5860_v49  ;;  %v6164_v6 = vrot.slane %v5711_v11, %v5860_v49  ;;  %4349 = vpow2.f32 %v2462_v2  ;;  %v2620_v40 = vmul.f32 1.442695, %v2614_v62 }
 0x688   : > { %v6151_v53 = vadd.f32 %v2166_v18, %v2162_v14  ;;  %v6153_v61 = vadd.f32 %v2167_v58, %v2163_v22  ;;  %v2242_v29 = vmul.f32 %v6081_v23, %v2230_v31  ;;  %v2243_v44 = vmul.f32 %v6086_v52, %v2230_v31  ;;  %v4340_v14 = vpop.eup %4339  ;;  %v2310_v31 = vpop.permute.xlu0 %2309 }
 0x689   : > { %4154 = vset.pattern.permute.xlu1 %v7223_v20  ;;  %7224 = vst [vmem:[#allocation102_spill] sm:$0xff] %v6164_v6  ;;  %v6168_v58 = vrot.slane %v5713_v12, %v5860_v49  ;;  %v6175_v20 = vrot.slane %v5727_v16, %v5860_v49  ;;  %v4342_v33 = vpop.eup %4341  ;;  %4351 = vpow2.f32 %v2540_v55  ;;  %v2542_v52 = vmul.f32 1.442695, %v2535_v59 }
 0x68a   : > { %7221 = vst [vmem:[#allocation100_spill] sm:$0xff] %v6151_v53  ;;  %7222 = vst [vmem:[#allocation101_spill] sm:$0xff] %v6153_v61  ;;  %v2246_v22 = vmul.f32 %v4336_v5, %v6151_v53  ;;  %v2247_v18 = vmul.f32 %v4338_v43, %v6153_v61  ;;  %2817 = vperm.xlu1 %4154, %v5741_v24   ;;  %v2615_v23 = vmul.f32 %v6147_v36, %v5817_v30  ;;  %v4344_v53 = vpop.eup %4343 }
 0x68b   : > { %7225 = vst [vmem:[#allocation103_spill] sm:$0xff] %v6168_v58  ;;  %v6185_v2 = vrot.slane %v5711_v11, %v5887_v35  ;;  %v6189_v49 = vrot.slane %v5713_v12, %v5887_v35  ;;  %v2694_v62 = vmul.f32 %v6164_v6, %v5811_v7  ;;  %v7228_v35 = vmov 14  }
 0x68c   : > { %v6179_v28 = vadd.f32 %v2246_v22, %v2242_v29  ;;  %v6181_v5 = vadd.f32 %v2247_v18, %v2243_v44  ;;  %v2390_v43 = vpop.permute.xlu1 %2389  ;;  %v2695_v29 = vmul.f32 %v6168_v58, %v5817_v30  ;;  %v2322_v44 = vmul.f32 %v5927_v8, %v2310_v31 }
 0x68d   : > { %v2402_v55 = vmul.f32 %v6124_v1, %v2390_v43  ;;  %v2403_v59 = vmul.f32 %v6128_v38, %v2390_v43  ;;  %v2323_v22 = vmul.f32 %v5934_v13, %v2310_v31  ;;  %v6202_v1 = vmul.f32 0.0, %v4332_v56 }
 0x68e   : > { %7226 = vst [vmem:[#allocation104_spill] sm:$0xff] %v6179_v28  ;;  %7227 = vst [vmem:[#allocation105_spill] sm:$0xff] %v6181_v5  ;;  %v2326_v18 = vmul.f32 %v4340_v14, %v6179_v28  ;;  %v2327_v61 = vmul.f32 %v4342_v33, %v6181_v5  ;;  %4156 = vset.pattern.permute.xlu1 %v7228_v35  ;;  %4353 = vpow2.f32 %v2542_v52  ;;  %v2622_v43 = vmul.f32 1.442695, %v2615_v23  ;;  %v4346_v33 = vpop.eup %4345 }
 0x68f   : > { %2897 = vperm.xlu1 %4156, %v5741_v24   ;;  %v6207_v38 = vrot.slane %v5711_v11, %v5899_v42  ;;  %4355 = vpow2.f32 %v2620_v40  ;;  %v6215_v14 = vrot.slane %v5713_v12, %v5899_v42  ;;  %v2700_v5 = vmul.f32 1.442695, %v2694_v62 }
 0x690   : > { %v6209_v58 = vadd.f32 %v2326_v18, %v2322_v44  ;;  %v6211_v31 = vadd.f32 %v2327_v61, %v2323_v22  ;;  %v2702_v28 = vmul.f32 1.442695, %v2695_v29  ;;  %v2774_v23 = vmul.f32 %v6185_v2, %v5811_v7  ;;  %v4348_v18 = vpop.eup %4347 }
 0x691   : > { %7231 = vst [vmem:[#allocation108_spill] sm:$0xff] %v6215_v14  ;;  %v2470_v56 = vpop.permute.xlu1 %2469  ;;  %v2775_v52 = vmul.f32 %v6189_v49, %v5817_v30  ;;  %v6226_v6 = vmul.f32 0.0, %v6139_v54  ;;  %v7232_v62 = vmov 7   ;;  %4357 = vpow2.f32 %v2622_v43 }
 0x692   : > { %7229 = vst [vmem:[#allocation106_spill] sm:$0xff] %v6209_v58  ;;  %7230 = vst [vmem:[#allocation107_spill] sm:$0xff] %v6211_v31  ;;  %v2406_v44 = vmul.f32 %v4344_v53, %v6209_v58  ;;  %v2407_v61 = vmul.f32 %v4346_v33, %v6211_v31  ;;  %v2482_v40 = vmul.f32 %v6133_v17, %v2470_v56  ;;  %v4350_v33 = vpop.eup %4349  ;;  %v2550_v31 = vpop.permute.xlu0 %2549  ;;  %4359 = vpow2.f32 %v2700_v5 }
 0x693   : > { %v2483_v22 = vmul.f32 %v6137_v3, %v2470_v56  ;;  %4157 = vset.pattern.permute.xlu1 %v7232_v62  ;;  %v6231_v29 = vrot.slane %v5723_v15, %v5851_v45  ;;  %v6235_v53 = vrot.slane %v5727_v16, %v5851_v45  ;;  %v2854_v54 = vmul.f32 %v6207_v38, %v5811_v7  ;;  %v4352_v62 = vpop.eup %4351 }
 0x694   : > { %v6237_v58 = vadd.f32 %v2406_v44, %v2402_v55  ;;  %v6239_v56 = vadd.f32 %v2407_v61, %v2403_v59  ;;  %2337 = vperm.xlu1 %4157, %v5741_v24   ;;  %v2855_v43 = vmul.f32 %v6215_v14, %v5817_v30  ;;  %v2780_v3 = vmul.f32 1.442695, %v2774_v23 }
 0x695   : > { %7233 = vst [vmem:[#allocation109_spill] sm:$0xff] %v6231_v29  ;;  %7234 = vst [vmem:[#allocation110_spill] sm:$0xff] %v6235_v53  ;;  %v2782_v17 = vmul.f32 1.442695, %v2775_v52  ;;  %v6248_v45 = vrot.slane %v5711_v11, %v5884_v32  ;;  %4361 = vpow2.f32 %v2702_v28  ;;  %v1812_v24 = vmul.f32 %v5831_v19, %v5894_v41 }
 0x696   : > { %7235 = vst [vmem:[#allocation111_spill] sm:$0xff] %v6237_v58  ;;  %7236 = vst [vmem:[#allocation112_spill] sm:$0xff] %v6239_v56  ;;  %v2486_v55 = vmul.f32 %v4348_v18, %v6237_v58  ;;  %v2487_v59 = vmul.f32 %v4350_v33, %v6239_v56  ;;  %v2630_v44 = vpop.permute.xlu1 %2629  ;;  %v1813_v5 = vmul.f32 %v5836_v39, %v5896_v25  ;;  %v7237_v18 = vmov 8  }
 0x697   : > { %v2642_v61 = vmul.f32 %v6231_v29, %v2630_v44  ;;  %v2643_v14 = vmul.f32 %v6235_v53, %v2630_v44  ;;  %v6260_v11 = vrot.slane %v5713_v12, %v5884_v32  ;;  %v2860_v28 = vmul.f32 1.442695, %v2854_v54  ;;  %v2790_v54 = vpop.permute.xlu0 %2789 }
 0x698   : > { %v6262_v23 = vadd.f32 %v2486_v55, %v2482_v40  ;;  %v6264_v52 = vadd.f32 %v2487_v59, %v2483_v22  ;;  %4159 = vset.pattern.permute.xlu1 %v7237_v18  ;;  %v2862_v33 = vmul.f32 1.442695, %v2855_v43  ;;  %v4354_v19 = vpop.eup %4353  ;;  %4363 = vpow2.f32 %v2780_v3 }
 0x699   : > { %2413 = vperm.xlu1 %4159, %v5773_v47   ;;  %v1892_v44 = vmul.f32 %v5848_v27, %v5894_v41  ;;  %v1893_v39 = vmul.f32 %v5856_v46, %v5896_v25  ;;  %v2934_v12 = vmul.f32 %v6248_v45, %v5811_v7  ;;  %v4356_v40 = vpop.eup %4355  ;;  %v2562_v22 = vmul.f32 %v5957_v0, %v2550_v31 }
 0x69a   : > { %v2563_v55 = vmul.f32 %v5961_v34, %v2550_v31  ;;  %v2566_v43 = vmul.f32 %v4352_v62, %v6262_v23  ;;  %v2567_v59 = vmul.f32 %v4354_v19, %v6264_v52  ;;  %4365 = vpow2.f32 %v2782_v17 }
 0x69b   : > { %v2710_v3 = vpop.permute.xlu1 %2709  ;;  %v1816_v18 = vmul.f32 1.442695, %v1812_v24  ;;  %v1818_v27 = vmul.f32 1.442695, %v1813_v5  ;;  %v2935_v46 = vmul.f32 %v6260_v11, %v5817_v30  ;;  %v4358_v53 = vpop.eup %4357  ;;  %v7239_v29 = vmov 1  }
 0x69c   : > { %v6280_v56 = vadd.f32 %v2566_v43, %v2562_v22  ;;  %v6282_v7 = vadd.f32 %v2567_v59, %v2563_v55  ;;  %v2722_v58 = vmul.f32 %v6160_v26, %v2710_v3  ;;  %v2723_v31 = vmul.f32 %v6175_v20, %v2710_v3  ;;  %v4360_v22 = vpop.eup %4359  ;;  %v1743_v43 = vpop.permute.xlu0 %1742 }
 0x69d   : > { %4160 = vset.pattern.permute.xlu1 %v7239_v29  ;;  %4367 = vpow2.f32 %v2860_v28  ;;  %v6289_v17 = vrot.slane %v5723_v15, %v5899_v42  ;;  %v6293_v62 = vrot.slane %v5727_v16, %v5899_v42  ;;  %v1896_v30 = vmul.f32 1.442695, %v1892_v44 }
 0x69e   : > { %7238 = vst [vmem:[#allocation113_spill] sm:$0xff] %v6282_v7  ;;  %v2646_v24 = vmul.f32 %v4356_v40, %v6280_v56  ;;  %v2647_v5 = vmul.f32 %v4358_v53, %v6282_v7  ;;  %1853 = vperm.xlu1 %4160, %v5773_v47   ;;  %4369 = vpow2.f32 %v2862_v33  ;;  %v2940_v19 = vmul.f32 1.442695, %v2934_v12 }
 0x69f   : > { %4371 = vpow2.f32 %v1816_v18  ;;  %v1972_v29 = vmul.f32 %v5866_v4, %v5894_v41  ;;  %v1973_v28 = vmul.f32 %v5876_v10, %v5896_v25  ;;  %v2942_v55 = vmul.f32 1.442695, %v2935_v46  ;;  %v4362_v42 = vpop.eup %4361 }
 0x6a0   : > { %v6302_v44 = vadd.f32 %v2646_v24, %v2642_v61  ;;  %v6304_v40 = vadd.f32 %v2647_v5, %v2643_v14  ;;  %v2870_v53 = vpop.permute.xlu1 %2869  ;;  %4373 = vpow2.f32 %v1818_v27  ;;  %v1898_v59 = vmul.f32 1.442695, %v1893_v39 }
 0x6a1   : > { %v2882_v33 = vmul.f32 %v6289_v17, %v2870_v53  ;;  %v2883_v12 = vmul.f32 %v6293_v62, %v2870_v53  ;;  %v6310_v4 = vrot.slane %v5723_v15, %v5884_v32  ;;  %4375 = vpow2.f32 %v1896_v30 }
 0x6a2   : > { %v2726_v10 = vmul.f32 %v4360_v22, %v6302_v44  ;;  %v2727_v3 = vmul.f32 %v4362_v42, %v6304_v40  ;;  %v7240_v61 = vmov 2   ;;  %v6317_v14 = vrot.slane %v5727_v16, %v5884_v32  ;;  %v4364_v39 = vpop.eup %4363 }
 0x6a3   : > { %4162 = vset.pattern.permute.xlu1 %v7240_v61  ;;  %4377 = vpow2.f32 %v2940_v19  ;;  %v1758_v18 = vmul.f32 %v5913_v50, %v1743_v43  ;;  %v1759_v27 = vmul.f32 %v5923_v63, %v1743_v43  ;;  %v1976_v15 = vmul.f32 1.442695, %v1972_v29  ;;  %v7241_v63 = vld [vmem:[#allocation63_spill] sm:$0xff]  ;;  %v7243_v61 = vld [vmem:[#allocation68_spill] sm:$0xff] }
 0x6a4   : > { %1933 = vperm.xlu1 %4162, %v5773_v47   ;;  %4379 = vpow2.f32 %v2942_v55  ;;  %v6322_v46 = vadd.f32 %v2726_v10, %v2722_v58  ;;  %v6324_v30 = vadd.f32 %v2727_v3, %v2723_v31  ;;  %v1978_v24 = vmul.f32 1.442695, %v1973_v28  ;;  %v4366_v5 = vpop.eup %4365 }
 0x6a5   : > { %4381 = vpow2.f32 %v1898_v59  ;;  %v2802_v16 = vmul.f32 %v5978_v57, %v2790_v54  ;;  %v2803_v32 = vmul.f32 %v5991_v48, %v2790_v54  ;;  %v2950_v19 = vpop.permute.xlu1 %2949  ;;  %v2052_v50 = vmul.f32 %v5891_v9, %v5894_v41 }
 0x6a6   : > { %v2053_v22 = vmul.f32 %v7241_v63, %v5896_v25  ;;  %v2806_v29 = vmul.f32 %v4364_v39, %v6322_v46  ;;  %v2807_v58 = vmul.f32 %v4366_v5, %v6324_v30  ;;  %v2962_v31 = vmul.f32 %v6310_v4, %v2950_v19  ;;  %v7245_v63 = vld [vmem:[#allocation66_spill] sm:$0xff] }
 0x6a7   : > { %v2963_v28 = vmul.f32 %v6317_v14, %v2950_v19  ;;  %v4368_v55 = vpop.eup %4367  ;;  %v6337_v42 = vadd.f32 %v6202_v1, %v1758_v18  ;;  %v6340_v54 = vadd.f32 %v6226_v6, %v1759_v27  ;;  %v7242_v43 = vmov 10  }
 0x6a8   : > { %4163 = vset.pattern.permute.xlu1 %v7242_v43  ;;  %v4370_v9 = vpop.eup %4369  ;;  %v6343_v53 = vadd.f32 %v2806_v29, %v2802_v16  ;;  %v6345_v59 = vadd.f32 %v2807_v58, %v2803_v32  ;;  %4383 = vpow2.f32 %v1976_v15  ;;  %v2056_v3 = vmul.f32 1.442695, %v2052_v50  ;;  %v7244_v16 = vld [vmem:[#allocation69_spill] sm:$0xff]  ;;  %v7246_v15 = vld [vmem:[#allocation67_spill] sm:$0xff] }
 0x6a9   : > { %2573 = vperm.xlu1 %4163, %v5773_v47   ;;  %v4372_v10 = vpop.eup %4371  ;;  %4385 = vpow2.f32 %v1978_v24  ;;  %v2132_v1 = vmul.f32 %v7243_v61, %v5894_v41  ;;  %v2058_v5 = vmul.f32 1.442695, %v2053_v22  ;;  %v2133_v32 = vmul.f32 %v7244_v16, %v5896_v25 }
 0x6aa   : > { %v4374_v39 = vpop.eup %4373  ;;  %v2886_v6 = vmul.f32 %v4368_v55, %v6343_v53  ;;  %v2887_v18 = vmul.f32 %v4370_v9, %v6345_v59  ;;  %v1826_v27 = vpop.permute.xlu1 %1825  ;;  %v1844_v24 = vmul.f32 %v4372_v10, %v6337_v42  ;;  %v7249_v9 = vmov 11  }
 0x6ab   : > { %v4376_v19 = vpop.eup %4375  ;;  %v1840_v29 = vmul.f32 %v7245_v63, %v1826_v27  ;;  %v1841_v58 = vmul.f32 %v7246_v15, %v1826_v27  ;;  %v1845_v50 = vmul.f32 %v4374_v39, %v6340_v54  ;;  %4387 = vpow2.f32 %v2056_v3 }
 0x6ac   : > { %v6358_v61 = vadd.f32 %v2886_v6, %v2882_v33  ;;  %v6360_v55 = vadd.f32 %v2887_v18, %v2883_v12  ;;  %4389 = vpow2.f32 %v2058_v5  ;;  %v2136_v10 = vmul.f32 1.442695, %v2132_v1  ;;  %v7254_v5 = vld [vmem:[#allocation75_spill] sm:$0xff] }
 0x6ad   : > { %v4378_v43 = vpop.eup %4377  ;;  %4165 = vset.pattern.permute.xlu1 %v7249_v9  ;;  %v6363_v7 = vadd.f32 %v1844_v24, %v1840_v29  ;;  %v6365_v16 = vadd.f32 %v1845_v50, %v1841_v58  ;;  %v2138_v63 = vmul.f32 1.442695, %v2133_v32  ;;  %v7251_v29 = vld [vmem:[#allocation74_spill] sm:$0xff]  ;;  %v7253_v50 = vld [vmem:[#allocation71_spill] sm:$0xff]  ;;  %v2213_v1 = vmul.f32 %v7254_v5, %v5896_v25 }
 0x6ae   : > { %7247 = vst [vmem:[#allocation63_spill] sm:$0xff] %v6358_v61  ;;  %7248 = vst [vmem:[#allocation68_spill] sm:$0xff] %v6360_v55  ;;  %v4380_v22 = vpop.eup %4379  ;;  %2653 = vperm.xlu1 %4165, %v5773_v47   ;;  %v2966_v39 = vmul.f32 %v4378_v43, %v6358_v61  ;;  %v2212_v15 = vmul.f32 %v7251_v29, %v5894_v41  ;;  %v7252_v58 = vld [vmem:[#allocation70_spill] sm:$0xff]  ;;  %v7255_v9 = vmov 12   ;;  %4391 = vpow2.f32 %v2136_v10  ;;  %v7258_v29 = vld [vmem:[#allocation76_spill] sm:$0xff] }
 0x6af   : > { %7250 = vst [vmem:[#allocation69_spill] sm:$0xff] %v6365_v16  ;;  %v4382_v27 = vpop.eup %4381  ;;  %v2967_v33 = vmul.f32 %v4380_v22, %v6360_v55  ;;  %v1906_v6 = vpop.permute.xlu1 %1905  ;;  %v1924_v12 = vmul.f32 %v4376_v19, %v6363_v7  ;;  %4393 = vpow2.f32 %v2138_v63  ;;  %v2372_v63 = vmul.f32 %v6031_v60, %v5894_v41 }
 0x6b0   : > { %v1925_v18 = vmul.f32 %v4382_v27, %v6365_v16  ;;  %v1920_v24 = vmul.f32 %v7252_v58, %v1906_v6  ;;  %v1921_v3 = vmul.f32 %v7253_v50, %v1906_v6  ;;  %v6379_v43 = vadd.f32 %v2966_v39, %v2962_v31 }
 0x6b1   : > { %v6381_v22 = vadd.f32 %v2967_v33, %v2963_v28  ;;  %v2216_v6 = vmul.f32 1.442695, %v2212_v15  ;;  %v2292_v58 = vmul.f32 %v7258_v29, %v5894_v41  ;;  %v2218_v39 = vmul.f32 1.442695, %v2213_v1  ;;  %v7259_v33 = vld [vmem:[#allocation77_spill] sm:$0xff]  ;;  %v7261_v29 = vld [vmem:[#allocation64_spill] sm:$0xff] }
 0x6b2   : > { %4167 = vset.pattern.permute.xlu1 %v7255_v9  ;;  %v4384_v19 = vpop.eup %4383  ;;  %v6383_v55 = vadd.f32 %v1924_v12, %v1920_v24  ;;  %v6385_v32 = vadd.f32 %v1925_v18, %v1921_v3  ;;  %v2293_v12 = vmul.f32 %v7259_v33, %v5896_v25  ;;  %v2226_v18 = vpop.permute.xlu0 %2225  ;;  %v7263_v33 = vld [vmem:[#allocation85_spill] sm:$0xff] }
 0x6b3   : > { %2733 = vperm.xlu1 %4167, %v5773_v47   ;;  %v4386_v27 = vpop.eup %4385  ;;  %4395 = vpow2.f32 %v2216_v6  ;;  %v2296_v1 = vmul.f32 1.442695, %v2292_v58  ;;  %v7264_v58 = vmov 6  }
 0x6b4   : > { %7256 = vst [vmem:[#allocation66_spill] sm:$0xff] %v6383_v55  ;;  %7257 = vst [vmem:[#allocation67_spill] sm:$0xff] %v6385_v32  ;;  %v1986_v50 = vpop.permute.xlu1 %1985  ;;  %v2004_v31 = vmul.f32 %v4384_v19, %v6383_v55  ;;  %v2005_v28 = vmul.f32 %v4386_v27, %v6385_v32  ;;  %4397 = vpow2.f32 %v2218_v39  ;;  %v2298_v19 = vmul.f32 1.442695, %v2293_v12  ;;  %v7265_v12 = vld [vmem:[#allocation86_spill] sm:$0xff] }
 0x6b5   : > { %v2000_v24 = vmul.f32 %v6018_v51, %v1986_v50  ;;  %v2001_v10 = vmul.f32 %v6047_v21, %v1986_v50  ;;  %v4388_v15 = vpop.eup %4387  ;;  %v7260_v51 = vld [vmem:[#allocation80_spill] sm:$0xff]  ;;  %4399 = vpow2.f32 %v2296_v1  ;;  %v2376_v39 = vmul.f32 1.442695, %v2372_v63  ;;  %v7266_v63 = vld [vmem:[#allocation89_spill] sm:$0xff] }
 0x6b6   : > { %v4390_v9 = vpop.eup %4389  ;;  %v2373_v21 = vmul.f32 %v7260_v51, %v5896_v25  ;;  %v6412_v6 = vpop.permute.xlu0 %2465  ;;  %v4451_v51 = vld [vmem:[#allocation7 + $0x10] sm:$0xff]  ;;  %4401 = vpow2.f32 %v2298_v19  ;;  %v2532_v32 = vmul.f32 %v7266_v63, %v5894_v41 }
 0x6b7   : > { %4168 = vset.pattern.permute.xlu1 %v7216_v37  ;;  %v6399_v3 = vadd.f32 %v2004_v31, %v2000_v24  ;;  %v6401_v5 = vadd.f32 %v2005_v28, %v2001_v10  ;;  %v7262_v31 = vld [vmem:[#allocation65_spill] sm:$0xff]  ;;  %v2453_v24 = vmul.f32 %v7265_v12, %v5896_v25  ;;  %4403 = vpow2.f32 %v2376_v39 }
 0x6b8   : > { %2173 = vperm.xlu1 %4168, %v5773_v47   ;;  %v2452_v47 = vmul.f32 %v7263_v33, %v5894_v41  ;;  %v4392_v10 = vpop.eup %4391  ;;  %v7267_v12 = vld [vmem:[#allocation81_spill] sm:$0xff] }
 0x6b9   : > { %v2066_v27 = vpop.permute.xlu1 %2065  ;;  %v2084_v37 = vmul.f32 %v4388_v15, %v6399_v3  ;;  %v2085_v60 = vmul.f32 %v4390_v9, %v6401_v5  ;;  %v2458_v19 = vmul.f32 1.442695, %v2453_v24  ;;  %v7271_v39 = vld [vmem:[#allocation93_spill] sm:$0xff]  ;;  %v7272_v24 = vld [vmem:[#allocation87_spill] sm:$0xff] }
 0x6ba   : > { %v2080_v50 = vmul.f32 %v7261_v29, %v2066_v27  ;;  %v2081_v28 = vmul.f32 %v7262_v31, %v2066_v27  ;;  %v2378_v27 = vmul.f32 1.442695, %v2373_v21  ;;  %v4394_v29 = vpop.eup %4393  ;;  %v2456_v1 = vmul.f32 1.442695, %v2452_v47  ;;  %v7269_v21 = vld [vmem:[#allocation92_spill] sm:$0xff] }
 0x6bc   : > { %4170 = vset.pattern.permute.xlu1 %v7264_v58  ;;  %v6417_v15 = vadd.f32 %v2084_v37, %v2080_v50  ;;  %v6419_v9 = vadd.f32 %v2085_v60, %v2081_v28  ;;  %v7268_v37 = vld [vmem:[#allocation82_spill] sm:$0xff]  ;;  %4405 = vpow2.f32 %v2378_v27  ;;  %v2533_v60 = vmul.f32 %v7269_v21, %v5896_v25 }
 0x6bd   : > { %2253 = vperm.xlu1 %4170, %v4451_v51   ;;  %v4396_v28 = vpop.eup %4395  ;;  %4407 = vpow2.f32 %v2456_v1  ;;  %v2240_v27 = vmul.f32 %v7272_v24, %v2226_v18 }
 0x6be   : > { %v2146_v31 = vpop.permute.xlu1 %2145  ;;  %v2164_v33 = vmul.f32 %v4392_v10, %v6417_v15  ;;  %v2165_v58 = vmul.f32 %v4394_v29, %v6419_v9  ;;  %v6430_v10 = vpop.permute.xlu0 %2705  ;;  %4409 = vpow2.f32 %v2458_v19 }
 0x6bf   : > { %v2160_v55 = vmul.f32 %v7267_v12, %v2146_v31  ;;  %v2161_v50 = vmul.f32 %v7268_v37, %v2146_v31  ;;  %v4398_v63 = vpop.eup %4397  ;;  %v2536_v12 = vmul.f32 1.442695, %v2532_v32  ;;  %v2612_v31 = vmul.f32 %v7271_v39, %v5894_v41  ;;  %v7273_v37 = vld [vmem:[#allocation88_spill] sm:$0xff] }
 0x6c0   : > { %v2241_v21 = vmul.f32 %v7273_v37, %v2226_v18  ;;  %v2538_v32 = vmul.f32 1.442695, %v2533_v60  ;;  %v7277_v18 = vld [vmem:[#allocation102_spill] sm:$0xff] }
 0x6c1   : > { %4171 = vset.pattern.permute.xlu1 %v7228_v35  ;;  %v6432_v29 = vadd.f32 %v2164_v33, %v2160_v55  ;;  %v6434_v47 = vadd.f32 %v2165_v58, %v2161_v50  ;;  %v2613_v35 = vmul.f32 %v6147_v36, %v5896_v25  ;;  %v4400_v50 = vpop.eup %4399  ;;  %v7276_v36 = vmov 15  }
 0x6c2   : > { %2893 = vperm.xlu1 %4171, %v4451_v51   ;;  %v4402_v24 = vpop.eup %4401  ;;  %4411 = vpow2.f32 %v2536_v12  ;;  %v2616_v19 = vmul.f32 1.442695, %v2612_v31  ;;  %v2772_v12 = vmul.f32 %v6185_v2, %v5894_v41 }
 0x6c3   : > { %7270 = vst [vmem:[#allocation74_spill] sm:$0xff] %v6434_v47  ;;  %v2244_v61 = vmul.f32 %v4396_v28, %v6432_v29  ;;  %v2245_v55 = vmul.f32 %v4398_v63, %v6434_v47  ;;  %v2306_v33 = vpop.permute.xlu1 %2305  ;;  %v2692_v28 = vmul.f32 %v7277_v18, %v5894_v41  ;;  %v6453_v63 = vpop.permute.xlu0 %2417  ;;  %4413 = vpow2.f32 %v2538_v32  ;;  %v7280_v18 = vld [vmem:[#allocation97_spill] sm:$0xff]  ;;  %v4239_v32 = vld [vmem:[#allocation30 + $0x40] sm:$0xff]  }
 0x6c4   : > { %v2320_v58 = vmul.f32 %v5927_v8, %v2306_v33  ;;  %v2321_v1 = vmul.f32 %v5934_v13, %v2306_v33  ;;  %v7279_v33 = vld [vmem:[#allocation96_spill] sm:$0xff]  ;;  %4415 = vpow2.f32 %v2616_v19  ;;  %3855 = vmatprep.subr.bf16.mxu1 %v4239_v32 }
 0x6c5   : > { %v6446_v39 = vadd.f32 %v2244_v61, %v2240_v27  ;;  %v6448_v16 = vadd.f32 %v2245_v55, %v2241_v21  ;;  %v2618_v61 = vmul.f32 1.442695, %v2613_v35  ;;  %v7278_v27 = vld [vmem:[#allocation103_spill] sm:$0xff]  ;;  %v4404_v21 = vpop.eup %4403 }
 0x6c6   : > { %4173 = vset.pattern.permute.xlu1 %v7276_v36  ;;  %v2693_v37 = vmul.f32 %v7278_v27, %v5896_v25  ;;  %v2852_v27 = vmul.f32 %v6207_v38, %v5894_v41 }
 0x6c7   : > { %7274 = vst [vmem:[#allocation70_spill] sm:$0xff] %v6446_v39  ;;  %7275 = vst [vmem:[#allocation71_spill] sm:$0xff] %v6448_v16  ;;  %2973 = vperm.xlu1 %4173, %v4451_v51   ;;  %v2324_v8 = vmul.f32 %v4400_v50, %v6446_v39  ;;  %v2325_v13 = vmul.f32 %v4402_v24, %v6448_v16  ;;  %v4406_v50 = vpop.eup %4405  ;;  %v2696_v39 = vmul.f32 1.442695, %v2692_v28  ;;  %v4240_v24 = vld [vmem:[#allocation30] sm:$0xff]   ;;  %4417 = vpow2.f32 %v2618_v61 }
 0x6c8   : > { %v2386_v60 = vpop.permute.xlu1 %2385  ;;  %3856 = vmatpush3.bf16.msra.mxu1 %v4240_v24 }
 0x6c9   : > { %v6459_v55 = vadd.f32 %v2324_v8, %v2320_v58  ;;  %v6461_v51 = vadd.f32 %v2325_v13, %v2321_v1  ;;  %v2400_v36 = vmul.f32 %v7279_v33, %v2386_v60  ;;  %v2401_v47 = vmul.f32 %v7280_v18, %v2386_v60  ;;  %v4408_v58 = vpop.eup %4407  ;;  %v6471_v13 = vpop.permute.xlu0 %1937 }
 0x6ca   : > { %v2698_v1 = vmul.f32 1.442695, %v2693_v37  ;;  %v2773_v8 = vmul.f32 %v6189_v49, %v5896_v25  ;;  %v4410_v19 = vpop.eup %4409  ;;  %4419 = vpow2.f32 %v2696_v39  ;;  %v2776_v37 = vmul.f32 1.442695, %v2772_v12  ;;  %v7281_v49 = vld [vmem:[#allocation98_spill] sm:$0xff] }
 0x6cb   : > { %v2404_v31 = vmul.f32 %v4404_v21, %v6459_v55  ;;  %v2405_v35 = vmul.f32 %v4406_v50, %v6461_v51  ;;  %v2480_v33 = vmul.f32 %v7281_v49, %v6412_v6  ;;  %v7284_v49 = vld [vmem:[#allocation109_spill] sm:$0xff] }
 0x6cc   : > { %4421 = vpow2.f32 %v2698_v1  ;;  %v2778_v38 = vmul.f32 1.442695, %v2773_v8  ;;  %v4412_v39 = vpop.eup %4411  ;;  %v2932_v1 = vmul.f32 %v6248_v45, %v5894_v41  ;;  %v4243_v41 = vld [vmem:[#allocation30 + $0x50] sm:$0xff]  }
 0x6cd   : > { %v6473_v60 = vadd.f32 %v2404_v31, %v2400_v36  ;;  %v6475_v28 = vadd.f32 %v2405_v35, %v2401_v47  ;;  %v2546_v2 = vpop.permute.xlu1 %2545  ;;  %v7282_v36 = vld [vmem:[#allocation99_spill] sm:$0xff]  ;;  %v7283_v31 = vld [vmem:[#allocation108_spill] sm:$0xff]  ;;  %v6489_v12 = vpop.permute.xlu0 %2657  ;;  %4423 = vpow2.f32 %v2776_v37  ;;  %v4244_v45 = vld [vmem:[#allocation30 + $0x10] sm:$0xff]  }
 0x6ce   : > { %v2560_v21 = vmul.f32 %v5957_v0, %v2546_v2  ;;  %v2561_v61 = vmul.f32 %v5961_v34, %v2546_v2  ;;  %v2481_v47 = vmul.f32 %v7282_v36, %v6412_v6  ;;  %v2853_v0 = vmul.f32 %v7283_v31, %v5896_v25  ;;  %v4241_v35 = vld [vmem:[#allocation30 + $0x48] sm:$0xff]   ;;  %v4414_v2 = vpop.eup %4413  ;;  %v7285_v31 = vld [vmem:[#allocation110_spill] sm:$0xff] }
 0x6cf   : > { %v2484_v18 = vmul.f32 %v4408_v58, %v6473_v60  ;;  %v2485_v50 = vmul.f32 %v4410_v19, %v6475_v28  ;;  %v4242_v34 = vld [vmem:[#allocation30 + $0x8] sm:$0xff]   ;;  %v2856_v58 = vmul.f32 1.442695, %v2852_v27  ;;  %3857 = vmatprep.subr.bf16.mxu1 %v4241_v35  ;;  %4425 = vpow2.f32 %v2778_v38  ;;  %v4416_v37 = vpop.eup %4415 }
 0x6d0   : > { %3858 = vmatpush3.bf16.msra.mxu1 %v4242_v34  ;;  %v4246_v34 = vld [vmem:[#allocation30 + $0x18] sm:$0xff]  }
 0x6d1   : > { %v6491_v32 = vadd.f32 %v2484_v18, %v2480_v33  ;;  %v6493_v24 = vadd.f32 %v2485_v50, %v2481_v47  ;;  %v2858_v33 = vmul.f32 1.442695, %v2853_v0  ;;  %v2933_v47 = vmul.f32 %v6260_v11, %v5896_v25  ;;  %v4245_v50 = vld [vmem:[#allocation30 + $0x58] sm:$0xff]   ;;  %v4418_v35 = vpop.eup %4417  ;;  %3859 = vmatprep.subr.bf16.mxu1 %v4243_v41 }
 0x6d2   : > { %v2626_v6 = vpop.permute.xlu1 %2625  ;;  %4427 = vpow2.f32 %v2856_v58  ;;  %v2720_v58 = vmul.f32 %v6160_v26, %v6430_v10 }
 0x6d3   : > { %v2564_v8 = vmul.f32 %v4412_v39, %v6491_v32  ;;  %v2565_v19 = vmul.f32 %v4414_v2, %v6493_v24  ;;  %v2640_v36 = vmul.f32 %v7284_v49, %v2626_v6  ;;  %v2641_v16 = vmul.f32 %v7285_v31, %v2626_v6  ;;  %v6507_v2 = vpop.permute.xlu0 %2737 }
 0x6d4   : > { %v2936_v39 = vmul.f32 1.442695, %v2932_v1  ;;  %v4420_v25 = vpop.eup %4419  ;;  %4429 = vpow2.f32 %v2858_v33  ;;  %3860 = vmatpush3.bf16.msra.mxu1 %v4244_v45 }
 0x6d5   : > { %v6503_v27 = vadd.f32 %v2564_v8, %v2560_v21  ;;  %v6505_v18 = vadd.f32 %v2565_v19, %v2561_v61  ;;  %v2938_v61 = vmul.f32 1.442695, %v2933_v47  ;;  %3861 = vmatprep.subr.bf16.mxu1 %v4245_v50  ;;  %v4247_v19 = vld [vmem:[#allocation30 + $0x60] sm:$0xff]  }
 0x6d6   : > { %v4422_v49 = vpop.eup %4421  ;;  %4431 = vpow2.f32 %v2936_v39  ;;  %v4250_v39 = vld [vmem:[#allocation30 + $0x28] sm:$0xff]  }
 0x6d7   : > { %v2644_v6 = vmul.f32 %v4416_v37, %v6503_v27  ;;  %v2645_v38 = vmul.f32 %v4418_v35, %v6505_v18  ;;  %v2786_v0 = vpop.permute.xlu1 %2785  ;;  %v4424_v33 = vpop.eup %4423  ;;  %4433 = vpow2.f32 %v2938_v61  ;;  %v4251_v61 = vld [vmem:[#allocation30 + $0x70] sm:$0xff]  }
 0x6d8   : > { %v2800_v11 = vmul.f32 %v5978_v57, %v2786_v0  ;;  %v2801_v21 = vmul.f32 %v5991_v48, %v2786_v0  ;;  %v2721_v57 = vmul.f32 %v6175_v20, %v6430_v10  ;;  %3862 = vmatpush3.bf16.msra.mxu1 %v4246_v34  ;;  %v4249_v20 = vld [vmem:[#allocation30 + $0x68] sm:$0xff]  }
 0x6d9   : > { %v6513_v8 = vadd.f32 %v2644_v6, %v2640_v36  ;;  %v6515_v1 = vadd.f32 %v2645_v38, %v2641_v16  ;;  %v4248_v16 = vld [vmem:[#allocation30 + $0x20] sm:$0xff]   ;;  %v6523_v36 = vpop.permute.xlu0 %2257  ;;  %3863 = vmatprep.subr.bf16.mxu1 %v4247_v19  ;;  %v4426_v10 = vpop.eup %4425 }
 0x6db   : > { %v2724_v48 = vmul.f32 %v4420_v25, %v6513_v8  ;;  %v2725_v31 = vmul.f32 %v4422_v49, %v6515_v1 }
 0x6dc   : > { %v2866_v47 = vpop.permute.xlu1 %2865  ;;  %3864 = vmatpush3.bf16.msra.mxu1 %v4248_v16  ;;  %v4428_v6 = vpop.eup %4427  ;;  %v7288_v16 = vld [vmem:[#allocation72_spill] sm:$0xff] }
 0x6dd   : > { %v6525_v37 = vadd.f32 %v2724_v48, %v2720_v58  ;;  %v6527_v41 = vadd.f32 %v2725_v31, %v2721_v57  ;;  %v2880_v26 = vmul.f32 %v6289_v17, %v2866_v47  ;;  %v2881_v45 = vmul.f32 %v6293_v62, %v2866_v47  ;;  %3865 = vmatprep.subr.bf16.mxu1 %v4249_v20  ;;  %v1773_v19 = vpop.permute.xlu0 %1772  ;;  %v4252_v48 = vld [vmem:[#allocation30 + $0x30] sm:$0xff]   ;;  %v4253_v31 = vld [vmem:[#allocation30 + $0x78] sm:$0xff]  }
 0x6de   : > { %v4430_v17 = vpop.eup %4429  ;;  %v1780_v47 = vmul.f32 %v1773_v19, %v6337_v42 }
 0x6df   : > { %v2804_v50 = vmul.f32 %v4424_v33, %v6525_v37  ;;  %v2805_v35 = vmul.f32 %v4426_v10, %v6527_v41  ;;  %v7289_v10 = vld [vmem:[#allocation73_spill] sm:$0xff] }
 0x6e0   : > { %v4432_v57 = vpop.eup %4431  ;;  %3866 = vmatpush3.bf16.msra.mxu1 %v4250_v39 }
 0x6e1   : > { %v6533_v38 = vadd.f32 %v2804_v50, %v2800_v11  ;;  %v6535_v0 = vadd.f32 %v2805_v35, %v2801_v21  ;;  %v2946_v25 = vpop.permute.xlu1 %2945  ;;  %3867 = vmatprep.subr.bf16.mxu1 %v4251_v61  ;;  %v4434_v33 = vpop.eup %4433  ;;  %v4254_v61 = vld [vmem:[#allocation30 + $0x38] sm:$0xff]  }
 0x6e2   : > { %v2960_v62 = vmul.f32 %v6310_v4, %v2946_v25  ;;  %v2961_v34 = vmul.f32 %v6317_v14, %v2946_v25  ;;  %v1781_v4 = vmul.f32 %v1773_v19, %v6340_v54 }
 0x6e3   : > { %v2884_v49 = vmul.f32 %v4428_v6, %v6533_v38  ;;  %v2885_v58 = vmul.f32 %v4430_v17, %v6535_v0 }
 0x6e4   : > { %3868 = vmatpush3.bf16.msra.mxu1 %v4252_v48 }
 0x6e5   : > { %v6541_v11 = vadd.f32 %v2884_v49, %v2880_v26  ;;  %v6543_v21 = vadd.f32 %v2885_v58, %v2881_v45  ;;  %v7290_v26 = vld [vmem:[#allocation59_spill] sm:$0xff]  ;;  %v7291_v45 = vld [vmem:[#allocation60_spill] sm:$0xff]  ;;  %3869 = vmatprep.subr.bf16.mxu1 %v4253_v31  ;;  %v7294_v58 = vld [vmem:[#allocation78_spill] sm:$0xff] }
 0x6e6   : > { %v1778_v14 = vpop.permute.xlu1 %1777  ;;  %v3795_v6 = vmul.f32 -1.442695, %v7290_v26  ;;  %v3796_v25 = vmul.f32 -1.442695, %v7291_v45 }
 0x6e7   : > { %7286 = vst [vmem:[#allocation75_spill] sm:$0xff] %v6541_v11  ;;  %7287 = vst [vmem:[#allocation76_spill] sm:$0xff] %v6543_v21  ;;  %v1782_v20 = vmul.f32 %v1778_v14, %v7288_v16  ;;  %v1783_v50 = vmul.f32 %v1778_v14, %v7289_v10  ;;  %v2964_v35 = vmul.f32 %v4432_v57, %v6541_v11  ;;  %v7295_v57 = vld [vmem:[#allocation79_spill] sm:$0xff]  ;;  %v2494_v16 = vpop.permute.xlu0 %2493  ;;  %v7306_v11 = vld [vmem:[#allocation54_spill] sm:$0xff] }
 0x6e8   : > { %v2965_v39 = vmul.f32 %v4434_v33, %v6543_v21  ;;  %4435 = vpow2.f32 %v3795_v6  ;;  %3870 = vmatpush3.bf16.msra.mxu1 %v4254_v61 }
 0x6e9   : > { %v1784_v17 = vadd.f32 %v1782_v20, %v1780_v47  ;;  %v1791_v49 = vadd.f32 %v1783_v50, %v1781_v4  ;;  %v6553_v42 = vadd.f32 %v2964_v35, %v2960_v62  ;;  %4437 = vpow2.f32 %v3796_v25  ;;  %v7296_v4 = vld [vmem:[#allocation61_spill] sm:$0xff]  ;;  %v7297_v35 = vld [vmem:[#allocation62_spill] sm:$0xff] }
 0x6ea   : > { %v6555_v54 = vadd.f32 %v2965_v39, %v2961_v34  ;;  %v2500_v47 = vmul.f32 %v2494_v16, %v6491_v32  ;;  %v2501_v62 = vmul.f32 %v2494_v16, %v6493_v24  ;;  %v3797_v20 = vmul.f32 -1.442695, %v7296_v4  ;;  %v7301_v4 = vld [vmem:[#allocation95_spill] sm:$0xff] }
 0x6eb   : > { %7292 = vst [vmem:[#allocation77_spill] sm:$0xff] %v6553_v42  ;;  %v1858_v19 = vpop.permute.xlu1 %1857  ;;  %v3798_v39 = vmul.f32 -1.442695, %v7297_v35  ;;  %v1792_v42 = vrot.slane %v1791_v49, 4 }
 0x6ec   : > { %7293 = vst [vmem:[#allocation80_spill] sm:$0xff] %v6555_v54  ;;  %v6558_v14 = vmul.f32 %v1858_v19, %v7294_v58  ;;  %v6561_v33 = vmul.f32 %v1858_v19, %v7295_v57  ;;  %4439 = vpow2.f32 %v3797_v20  ;;  %v2014_v19 = vpop.permute.xlu0 %2013  ;;  %v7298_v57 = vld [vmem:[#allocation90_spill] sm:$0xff] }
 0x6ed   : > { %4441 = vpow2.f32 %v3798_v39 }
 0x6f0   : > { %v2498_v48 = vpop.permute.xlu1 %2497 }
 0x6f1   : > { %v2502_v34 = vmul.f32 %v2498_v48, %v6262_v23  ;;  %v2503_v31 = vmul.f32 %v2498_v48, %v6264_v52  ;;  %v2020_v23 = vmul.f32 %v2014_v19, %v6399_v3  ;;  %v2021_v52 = vmul.f32 %v2014_v19, %v6401_v5  ;;  %v7299_v48 = vld [vmem:[#allocation91_spill] sm:$0xff]  ;;  %v3162_v5 = vld [vmem:[#allocation29] sm:$0x3] }
 0x6f2   : > { %v4436_v61 = vpop.eup %4435 }
 0x6f3   : > { %v2504_v10 = vadd.f32 %v2502_v34, %v2500_v47  ;;  %v2511_v50 = vadd.f32 %v2503_v31, %v2501_v62  ;;  %v4438_v25 = vpop.eup %4437  ;;  %v3194_v32 = vadd.f32 1.0, %v4436_v61  ;;  %v2094_v62 = vpop.permute.xlu0 %2093  ;;  %v7300_v61 = vld [vmem:[#allocation94_spill] sm:$0xff] }
 0x6f4   : > { %v3195_v58 = vadd.f32 1.0, %v4438_v25  ;;  %v2100_v20 = vmul.f32 %v2094_v62, %v6417_v15  ;;  %v2101_v39 = vmul.f32 %v2094_v62, %v6419_v9  ;;  %v1793_v62 = vadd.f32 %v1792_v42, %v1791_v49 }
 0x6f5   : > { %v6569_v6 = vpop.permute.xlu1 %2577  ;;  %4443 = vrcp.f32 %v3194_v32  ;;  %v7302_v32 = vld [vmem:[#allocation52_spill] sm:$0xff] }
 0x6f6   : > { %4445 = vrcp.f32 %v3195_v58  ;;  %v4440_v54 = vpop.eup %4439  ;;  %v6582_v58 = vrot.slane %v3162_v5, %v7302_v32  ;;  %v1794_v42 = vrot.slane %v1793_v62, 2 }
 0x6f7   : > { %v4442_v19 = vpop.eup %4441  ;;  %v2814_v21 = vpop.permute.xlu0 %2813 }
 0x6f8   : > { %7303 = vst [vmem:[#allocation64_spill] sm:$0xff] %v6582_v58  ;;  %v3197_v15 = vadd.f32 1.0, %v4442_v19 }
 0x6fa   : > { %v2018_v24 = vpop.permute.xlu1 %2017 }
 0x6fb   : > { %v2022_v16 = vmul.f32 %v2018_v24, %v7298_v57  ;;  %v2023_v47 = vmul.f32 %v2018_v24, %v7299_v48  ;;  %v1785_v57 = vrot.slane %v1784_v17, 4 }
 0x6fd   : > { %v2024_v34 = vadd.f32 %v2022_v16, %v2020_v23  ;;  %v2031_v31 = vadd.f32 %v2023_v47, %v2021_v52  ;;  %v3196_v23 = vadd.f32 1.0, %v4440_v54  ;;  %v7304_v16 = vld [vmem:[#allocation53_spill] sm:$0xff]  ;;  %v1786_v47 = vadd.f32 %v1785_v57, %v1784_v17 }
 0x6fe   : > { %v6585_v9 = vrot.slane %v3162_v5, %v7304_v16  ;;  %v7308_v5 = vld [vmem:[#allocation56_spill] sm:$0xff] }
 0x6ff   : > { %v2098_v35 = vpop.permute.xlu1 %2097  ;;  %4447 = vrcp.f32 %v3196_v23  ;;  %v1787_v49 = vrot.slane %v1786_v47, 2  ;;  %v2025_v32 = vrot.slane %v2024_v34, 4  ;;  %v2032_v16 = vrot.slane %v2031_v31, 4 }
 0x700   : > { %v2102_v25 = vmul.f32 %v2098_v35, %v7300_v61  ;;  %v2103_v3 = vmul.f32 %v2098_v35, %v7301_v4  ;;  %7305 = vst [vmem:[#allocation65_spill] sm:$0xff] %v6585_v9  ;;  %v2505_v4 = vrot.slane %v2504_v10, 4  ;;  %v2512_v35 = vrot.slane %v2511_v50, 4  ;;  %v4444_v61 = vpop.eup %4443 }
 0x701   : > { %v4446_v54 = vpop.eup %4445  ;;  %4449 = vrcp.f32 %v3197_v15  ;;  %v6595_v17 = vmul.f32 %v6585_v9, %v7308_v5  ;;  %v6600_v15 = vmul.f32 %v4444_v61, %v7290_v26  ;;  %v7312_v5 = vld [vmem:[#allocation111_spill] sm:$0xff]  ;;  %v7315_v26 = vld [vmem:[#allocation84_spill] sm:$0xff]  ;;  %v1788_v61 = vadd.f32 %v1787_v49, %v1786_v47 }
 0x702   : > { %v2104_v24 = vadd.f32 %v2102_v25, %v2100_v20  ;;  %v2111_v48 = vadd.f32 %v2103_v3, %v2101_v39  ;;  %v6589_v20 = vmul.f32 %v6582_v58, %v7306_v11  ;;  %v2820_v25 = vmul.f32 %v2814_v21, %v6533_v38  ;;  %v7313_v58 = vld [vmem:[#allocation112_spill] sm:$0xff] }
 0x703   : > { %v2821_v3 = vmul.f32 %v2814_v21, %v6535_v0  ;;  %7309 = vst [vmem:[#allocation86_spill] sm:$0xff] %v6595_v17  ;;  %v2506_v23 = vadd.f32 %v2505_v4, %v2504_v10  ;;  %v2513_v11 = vadd.f32 %v2512_v35, %v2511_v50  ;;  %7310 = vst [vmem:[#allocation89_spill] sm:$0xff] %v6600_v15  ;;  %v7314_v50 = vld [vmem:[#allocation83_spill] sm:$0xff]  ;;  %v2334_v35 = vpop.permute.xlu0 %2333 }
 0x704   : > { %v6579_v52 = vpop.permute.xlu1 %2177  ;;  %7307 = vst [vmem:[#allocation85_spill] sm:$0xff] %v6589_v20  ;;  %v6603_v38 = vmul.f32 %v4446_v54, %v7291_v45  ;;  %v6607_v9 = vmul.f32 %v6453_v63, %v7312_v5  ;;  %v2112_v10 = vrot.slane %v2111_v48, 4  ;;  %v6615_v4 = vmul.f32 %v6471_v13, %v7314_v50 }
 0x705   : > { %v6619_v45 = vmul.f32 %v6471_v13, %v7315_v26  ;;  %v1795_v54 = vadd.f32 %v1794_v42, %v1793_v62  ;;  %v6630_v5 = vmul.f32 %v6489_v12, %v6304_v40  ;;  %v6634_v47 = vmul.f32 %v6507_v2, %v6322_v46 }
 0x706   : > { %7311 = vst [vmem:[#allocation81_spill] sm:$0xff] %v6603_v38  ;;  %v6638_v62 = vmul.f32 %v6507_v2, %v6324_v30  ;;  %v2341_v42 = vmul.f32 %v2334_v35, %v6461_v51  ;;  %v1789_v40 = vrot.slane %v1788_v61, 1  ;;  %v7322_v51 = vld [vmem:[#allocation105_spill] sm:$0xff] }
 0x707   : > { %v2978_v17 = vpop.permute.xlu0 %2977 }
 0x709   : > { %v2818_v39 = vpop.permute.xlu1 %2817  ;;  %v6640_v49 = vpop.eup %4447 }
 0x70a   : > { %v2822_v19 = vmul.f32 %v2818_v39, %v6343_v53  ;;  %v2823_v57 = vmul.f32 %v2818_v39, %v6345_v59  ;;  %v6611_v53 = vmul.f32 %v6453_v63, %v7313_v58  ;;  %v2105_v59 = vrot.slane %v2104_v24, 4  ;;  %7317 = vst [vmem:[#allocation82_spill] sm:$0xff] %v6640_v49  ;;  %v7321_v49 = vld [vmem:[#allocation104_spill] sm:$0xff] }
 0x70b   : > { %v2514_v63 = vrot.slane %v2513_v11, 2  ;;  %v2026_v58 = vadd.f32 %v2025_v32, %v2024_v34  ;;  %v6644_v32 = vpop.eup %4449 }
 0x70c   : > { %v2824_v0 = vadd.f32 %v2822_v19, %v2820_v25  ;;  %v2831_v21 = vadd.f32 %v2823_v57, %v2821_v3  ;;  %v7316_v25 = vld [vmem:[#allocation51_spill] sm:$0xff]  ;;  %v2507_v3 = vrot.slane %v2506_v23, 2  ;;  %v2033_v19 = vadd.f32 %v2032_v16, %v2031_v31  ;;  %7318 = vst [vmem:[#allocation92_spill] sm:$0xff] %v6644_v32 }
 0x70d   : > { %vm1798_vm13 = vcmp.eq.s32.totalorder %v7316_v25, 0  ;;  %v6626_v57 = vmul.f32 %v6489_v12, %v6302_v44  ;;  %v2106_v34 = vadd.f32 %v2105_v59, %v2104_v24  ;;  %v2113_v31 = vadd.f32 %v2112_v10, %v2111_v48  ;;  %v7319_v24 = vld [vmem:[#allocation106_spill] sm:$0xff]  ;;  %v7320_v59 = vld [vmem:[#allocation107_spill] sm:$0xff] }
 0x70e   : > { %v6621_v39 = vpop.permute.xlu1 %2897  ;;  %v2825_v13 = vrot.slane %v2824_v0, 4  ;;  %v2832_v50 = vrot.slane %v2831_v21, 4  ;;  %v2340_v44 = vmul.f32 %v2334_v35, %v6459_v55  ;;  %v1796_v12 = vrot.slane %v1795_v54, 1 }
 0x70f   : > { %v2508_v16 = vadd.f32 %v2507_v3, %v2506_v23  ;;  %v2515_v26 = vadd.f32 %v2514_v63, %v2513_v11  ;;  %v2027_v46 = vrot.slane %v2026_v58, 2  ;;  %v2034_v15 = vrot.slane %v2033_v19, 2 }
 0x710   : > { %v2826_v30 = vadd.f32 %v2825_v13, %v2824_v0  ;;  %v2833_v2 = vadd.f32 %v2832_v50, %v2831_v21  ;;  %v6650_v55 = vmul.f32 %v6523_v36, %v7321_v49  ;;  %v6654_v35 = vmul.f32 %v6523_v36, %v7322_v51 }
 0x711   : > { %v2107_v23 = vrot.slane %v2106_v34, 2  ;;  %v2114_v11 = vrot.slane %v2113_v31, 2  ;;  %v1790_v3 = vadd.f32 %v1789_v40, %v1788_v61  ;;  %v1797_v63 = vadd.f32 %v1796_v12, %v1795_v54 }
 0x712   : > { %v6661_v21 = vmul.f32 %v2978_v17, %v6379_v43  ;;  %v2028_v13 = vadd.f32 %v2027_v46, %v2026_v58  ;;  %v2035_v50 = vadd.f32 %v2034_v15, %v2033_v19  ;;  %v2509_v49 = vrot.slane %v2508_v16, 1  ;;  %v7323_v15 = vld [vmem:[#allocation113_spill] sm:$0xff] }
 0x713   : > { %v2338_v38 = vpop.permute.xlu1 %2337  ;;  %v2827_v36 = vrot.slane %v2826_v30, 2  ;;  %v2108_v20 = vadd.f32 %v2107_v23, %v2106_v34  ;;  %v2115_v61 = vadd.f32 %v2114_v11, %v2113_v31  ;;  %v6670_v43 = vsel %vm1798_vm13, %v1790_v3, 0.0  ;;  %v7324_v11 = vld [vmem:[#allocation100_spill] sm:$0xff]  ;;  %v7325_v3 = vld [vmem:[#allocation101_spill] sm:$0xff] }
 0x714   : > { %v2342_v48 = vmul.f32 %v2338_v38, %v7319_v24  ;;  %v2343_v10 = vmul.f32 %v2338_v38, %v7320_v59  ;;  %v6664_v38 = vmul.f32 %v2978_v17, %v6381_v22  ;;  %v2516_v24 = vrot.slane %v2515_v26, 1 }
 0x715   : > { %v2834_v59 = vrot.slane %v2833_v2, 2  ;;  %v6674_v22 = vsel %vm1798_vm13, %v1797_v63, 0.0  ;;  %v6678_v17 = vmul.f32 %v6569_v6, %v6280_v56  ;;  %v6682_v58 = vmul.f32 %v6569_v6, %v7323_v15 }
 0x716   : > { %v6656_v32 = vadd.f32 %v2342_v48, %v2340_v44  ;;  %v6658_v0 = vadd.f32 %v2343_v10, %v2341_v42  ;;  %v2029_v19 = vrot.slane %v2028_v13, 1  ;;  %v6686_v31 = vadd.f32 %v2509_v49, %v2508_v16 }
 0x717   : > { %v6688_v42 = vadd.f32 %v2516_v24, %v2515_v26  ;;  %v2828_v40 = vadd.f32 %v2827_v36, %v2826_v30  ;;  %v2835_v12 = vadd.f32 %v2834_v59, %v2833_v2  ;;  %v2109_v46 = vrot.slane %v2108_v20, 1  ;;  %v7327_v26 = vld [vmem:[#allocation69_spill] sm:$0xff] }
 0x718   : > { %v2414_v51 = vpop.permute.xlu1 %2413  ;;  %v2116_v48 = vrot.slane %v2115_v61, 1  ;;  %v6692_v6 = vmul.f32 %v6579_v52, %v7324_v11  ;;  %v6701_v2 = vadd.f32 %v2029_v19, %v2028_v13  ;;  %v7328_v13 = vld [vmem:[#allocation63_spill] sm:$0xff]  ;;  %v7329_v19 = vld [vmem:[#allocation68_spill] sm:$0xff]  ;;  %vm1878_vm0 = vcmp.eq.s32.totalorder %v7316_v25, 1 }
 0x719   : > { %v2420_v54 = vmul.f32 %v2414_v51, %v6473_v60  ;;  %v2421_v44 = vmul.f32 %v2414_v51, %v6475_v28  ;;  %v2036_v60 = vrot.slane %v2035_v50, 1  ;;  %v2829_v36 = vrot.slane %v2828_v40, 1 }
 0x71a   : > { %v2836_v59 = vrot.slane %v2835_v12, 1  ;;  %vm1958_vm1 = vcmp.eq.s32.totalorder %v7316_v25, 2  ;;  %vm2038_vm2 = vcmp.eq.s32.totalorder %v7316_v25, 3  ;;  %vm2118_vm3 = vcmp.eq.s32.totalorder %v7316_v25, 4 }
 0x71b   : > { %v2424_v28 = vadd.f32 %v6607_v9, %v2420_v54  ;;  %v2431_v34 = vadd.f32 %v6611_v53, %v2421_v44  ;;  %v6696_v9 = vmul.f32 %v6579_v52, %v7325_v3  ;;  %v7326_v53 = vld [vmem:[#allocation58_spill] sm:$0xff]  ;;  %v6703_v63 = vadd.f32 %v2036_v60, %v2035_v50 }
 0x71c   : > { %vm2439_vm14 = vcmp.eq.s32.totalorder %v7326_v53, 8  ;;  %vm2519_vm15 = vcmp.eq.s32.totalorder %v7326_v53, 9  ;;  %v6708_v54 = vadd.f32 %v2109_v46, %v2108_v20  ;;  %v6710_v44 = vadd.f32 %v2116_v48, %v2115_v61  ;;  %v7331_v61 = vld [vmem:[#allocation67_spill] sm:$0xff] }
 0x71d   : > { %v2425_v56 = vrot.slane %v2424_v28, 4  ;;  %v2432_v10 = vrot.slane %v2431_v34, 4  ;;  %v1854_v23 = vpop.permute.xlu1 %1853  ;;  %v6714_v50 = vmul.f32 %v6621_v39, %v7328_v13  ;;  %v6718_v60 = vmul.f32 %v6621_v39, %v7329_v19 }
 0x71e   : > { %v1860_v16 = vmul.f32 %v1854_v23, %v6363_v7  ;;  %v1861_v30 = vmul.f32 %v1854_v23, %v7327_v26  ;;  %v6723_v48 = vadd.f32 %v2829_v36, %v2828_v40  ;;  %v6725_v23 = vadd.f32 %v2836_v59, %v2835_v12 }
 0x71f   : > { %v2426_v49 = vadd.f32 %v2425_v56, %v2424_v28  ;;  %v2433_v24 = vadd.f32 %v2432_v10, %v2431_v34  ;;  %vm2599_vm4 = vcmp.eq.s32.totalorder %v7326_v53, 10  ;;  %vm2679_vm5 = vcmp.eq.s32.totalorder %v7326_v53, 11 }
 0x720   : > { %v1864_v51 = vadd.f32 %v6558_v14, %v1860_v16  ;;  %v1871_v52 = vadd.f32 %v6561_v33, %v1861_v30  ;;  %v7330_v33 = vld [vmem:[#allocation66_spill] sm:$0xff]  ;;  %vm2759_vm6 = vcmp.eq.s32.totalorder %v7326_v53, 12  ;;  %vm2839_vm7 = vcmp.eq.s32.totalorder %v7326_v53, 13 }
 0x721   : > { %v2427_v7 = vrot.slane %v2426_v49, 2  ;;  %v2434_v15 = vrot.slane %v2433_v24, 2  ;;  %vm2198_vm8 = vcmp.eq.s32.totalorder %v7316_v25, 5  ;;  %vm2278_vm9 = vcmp.eq.s32.totalorder %v7316_v25, 6 }
 0x722   : > { %v1865_v28 = vrot.slane %v1864_v51, 4  ;;  %v1872_v34 = vrot.slane %v1871_v52, 4  ;;  %vm2358_vm10 = vcmp.eq.s32.totalorder %v7316_v25, 7  ;;  %vm2919_vm11 = vcmp.eq.s32.totalorder %v7326_v53, 14 }
 0x723   : > { %v1934_v56 = vpop.permute.xlu1 %1933  ;;  %v2428_v14 = vadd.f32 %v2427_v7, %v2426_v49  ;;  %v2435_v10 = vadd.f32 %v2434_v15, %v2433_v24  ;;  %v2345_v49 = vrot.slane %v6656_v32, 4  ;;  %v2352_v24 = vrot.slane %v6658_v0, 4 }
 0x724   : > { %v1940_v20 = vmul.f32 %v1934_v56, %v7330_v33  ;;  %v1941_v46 = vmul.f32 %v1934_v56, %v7331_v61  ;;  %v1866_v11 = vadd.f32 %v1865_v28, %v1864_v51  ;;  %v1873_v3 = vadd.f32 %v1872_v34, %v1871_v52 }
 0x725   : > { %v2429_v16 = vrot.slane %v2428_v14, 1  ;;  %v2436_v39 = vrot.slane %v2435_v10, 1  ;;  %vm2999_vm12 = vcmp.eq.s32.totalorder %v7326_v53, 15 }
 0x726   : > { %v1944_v26 = vadd.f32 %v6615_v4, %v1940_v20  ;;  %v1951_v30 = vadd.f32 %v6619_v45, %v1941_v46  ;;  %v1867_v7 = vrot.slane %v1866_v11, 2  ;;  %v1874_v15 = vrot.slane %v1873_v3, 2 }
 0x727   : > { %v2430_v13 = vadd.f32 %v2429_v16, %v2428_v14  ;;  %v2437_v19 = vadd.f32 %v2436_v39, %v2435_v10 }
 0x728   : > { %v1945_v40 = vrot.slane %v1944_v26, 4  ;;  %v1952_v36 = vrot.slane %v1951_v30, 4  ;;  %v2574_v12 = vpop.permute.xlu1 %2573  ;;  %v1868_v59 = vadd.f32 %v1867_v7, %v1866_v11  ;;  %v1875_v51 = vadd.f32 %v1874_v15, %v1873_v3 }
 0x729   : > { %v2580_v52 = vmul.f32 %v2574_v12, %v6503_v27  ;;  %v2581_v4 = vmul.f32 %v2574_v12, %v6505_v18  ;;  %v2442_v45 = vsel %vm2439_vm14, %v2430_v13, 0.0  ;;  %v2443_v28 = vsel %vm2439_vm14, %v2437_v19, 0.0 }
 0x72a   : > { %v1946_v34 = vadd.f32 %v1945_v40, %v1944_v26  ;;  %v1953_v56 = vadd.f32 %v1952_v36, %v1951_v30  ;;  %v6742_v14 = vsel %vm2519_vm15, %v6686_v31, %v2442_v45  ;;  %v6747_v27 = vsel %vm2519_vm15, %v6688_v42, %v2443_v28 }
 0x72b   : > { %v1869_v18 = vrot.slane %v1868_v59, 1  ;;  %v1876_v10 = vrot.slane %v1875_v51, 1  ;;  %v2584_v61 = vadd.f32 %v6678_v17, %v2580_v52  ;;  %v2591_v46 = vadd.f32 %v6682_v58, %v2581_v4 }
 0x72c   : > { %v1947_v33 = vrot.slane %v1946_v34, 2  ;;  %v1954_v20 = vrot.slane %v1953_v56, 2  ;;  %v6753_v11 = vadd.f32 %v2345_v49, %v6656_v32  ;;  %v6756_v31 = vadd.f32 %v2352_v24, %v6658_v0 }
 0x72d   : > { %v1870_v3 = vadd.f32 %v1869_v18, %v1868_v59  ;;  %v1877_v16 = vadd.f32 %v1876_v10, %v1875_v51  ;;  %v2654_v42 = vpop.permute.xlu1 %2653  ;;  %v2585_v30 = vrot.slane %v2584_v61, 4  ;;  %v2592_v7 = vrot.slane %v2591_v46, 4 }
 0x72e   : > { %v1948_v39 = vadd.f32 %v1947_v33, %v1946_v34  ;;  %v1955_v26 = vadd.f32 %v1954_v20, %v1953_v56  ;;  %v2660_v32 = vmul.f32 %v2654_v42, %v6513_v8  ;;  %v2661_v0 = vmul.f32 %v2654_v42, %v6515_v1 }
 0x72f   : > { %v1880_v17 = vsel %vm1878_vm0, %v1870_v3, %v6670_v43  ;;  %v1881_v58 = vsel %vm1878_vm0, %v1877_v16, %v6674_v22  ;;  %v2586_v15 = vadd.f32 %v2585_v30, %v2584_v61  ;;  %v2593_v13 = vadd.f32 %v2592_v7, %v2591_v46 }
 0x730   : > { %v1949_v49 = vrot.slane %v1948_v39, 1  ;;  %v1956_v24 = vrot.slane %v1955_v26, 1  ;;  %v2347_v19 = vrot.slane %v6753_v11, 2  ;;  %v2354_v40 = vrot.slane %v6756_v31, 2 }
 0x731   : > { %v2664_v43 = vadd.f32 %v6626_v57, %v2660_v32  ;;  %v2671_v36 = vadd.f32 %v6630_v5, %v2661_v0  ;;  %v2587_v59 = vrot.slane %v2586_v15, 2  ;;  %v2594_v51 = vrot.slane %v2593_v13, 2 }
 0x732   : > { %v1950_v12 = vadd.f32 %v1949_v49, %v1948_v39  ;;  %v1957_v22 = vadd.f32 %v1956_v24, %v1955_v26  ;;  %v2734_v52 = vpop.permute.xlu1 %2733 }
 0x733   : > { %v2665_v8 = vrot.slane %v2664_v43, 4  ;;  %v2672_v4 = vrot.slane %v2671_v36, 4  ;;  %v2740_v1 = vmul.f32 %v2734_v52, %v6525_v37  ;;  %v2741_v45 = vmul.f32 %v2734_v52, %v6527_v41 }
 0x734   : > { %v1960_v28 = vsel %vm1958_vm1, %v1950_v12, %v1880_v17  ;;  %v1961_v34 = vsel %vm1958_vm1, %v1957_v22, %v1881_v58  ;;  %v2588_v57 = vadd.f32 %v2587_v59, %v2586_v15  ;;  %v2595_v56 = vadd.f32 %v2594_v51, %v2593_v13  ;;  %v7332_v17 = vld [vmem:[#allocation74_spill] sm:$0xff] }
 0x735   : > { %v2040_v5 = vsel %vm2038_vm2, %v6701_v2, %v1960_v28  ;;  %v2041_v37 = vsel %vm2038_vm2, %v6703_v63, %v1961_v34  ;;  %v2666_v18 = vadd.f32 %v2665_v8, %v2664_v43  ;;  %v2673_v41 = vadd.f32 %v2672_v4, %v2671_v36  ;;  %v7334_v4 = vld [vmem:[#allocation71_spill] sm:$0xff] }
 0x736   : > { %v2589_v10 = vrot.slane %v2588_v57, 1  ;;  %v2596_v33 = vrot.slane %v2595_v56, 1  ;;  %v2744_v20 = vadd.f32 %v6634_v47, %v2740_v1  ;;  %v2751_v61 = vadd.f32 %v6638_v62, %v2741_v45 }
 0x737   : > { %v2667_v46 = vrot.slane %v2666_v18, 2  ;;  %v2674_v3 = vrot.slane %v2673_v41, 2  ;;  %v2174_v16 = vpop.permute.xlu1 %2173  ;;  %v6789_v42 = vsel %vm2118_vm3, %v6708_v54, %v2040_v5  ;;  %v6794_v2 = vsel %vm2118_vm3, %v6710_v44, %v2041_v37 }
 0x738   : > { %v2590_v63 = vadd.f32 %v2589_v10, %v2588_v57  ;;  %v2597_v39 = vadd.f32 %v2596_v33, %v2595_v56  ;;  %v2745_v26 = vrot.slane %v2744_v20, 4  ;;  %v2752_v30 = vrot.slane %v2751_v61, 4 }
 0x739   : > { %v2668_v47 = vadd.f32 %v2667_v46, %v2666_v18  ;;  %v2675_v7 = vadd.f32 %v2674_v3, %v2673_v41  ;;  %v2180_v62 = vmul.f32 %v2174_v16, %v6432_v29  ;;  %v2181_v58 = vmul.f32 %v2174_v16, %v7332_v17  ;;  %v7335_v16 = vld [vmem:[#allocation75_spill] sm:$0xff] }
 0x73a   : > { %v2602_v54 = vsel %vm2599_vm4, %v2590_v63, %v6742_v14  ;;  %v2603_v44 = vsel %vm2599_vm4, %v2597_v39, %v6747_v27  ;;  %v2746_v32 = vadd.f32 %v2745_v26, %v2744_v20  ;;  %v2753_v0 = vadd.f32 %v2752_v30, %v2751_v61  ;;  %v7336_v39 = vld [vmem:[#allocation76_spill] sm:$0xff] }
 0x73b   : > { %v2669_v49 = vrot.slane %v2668_v47, 1  ;;  %v2676_v24 = vrot.slane %v2675_v7, 1  ;;  %v2184_v15 = vadd.f32 %v6692_v6, %v2180_v62  ;;  %v2191_v13 = vadd.f32 %v6696_v9, %v2181_v58  ;;  %v7333_v6 = vld [vmem:[#allocation70_spill] sm:$0xff] }
 0x73c   : > { %v6809_v29 = vadd.f32 %v2347_v19, %v6753_v11  ;;  %v6812_v43 = vadd.f32 %v2354_v40, %v6756_v31  ;;  %v2747_v14 = vrot.slane %v2746_v32, 2  ;;  %v2754_v36 = vrot.slane %v2753_v0, 2  ;;  %v2254_v12 = vpop.permute.xlu1 %2253 }
 0x73d   : > { %v2670_v27 = vadd.f32 %v2669_v49, %v2668_v47  ;;  %v2677_v22 = vadd.f32 %v2676_v24, %v2675_v7  ;;  %v2185_v59 = vrot.slane %v2184_v15, 4  ;;  %v2192_v51 = vrot.slane %v2191_v13, 4 }
 0x73e   : > { %v2748_v52 = vadd.f32 %v2747_v14, %v2746_v32  ;;  %v2755_v8 = vadd.f32 %v2754_v36, %v2753_v0  ;;  %v2260_v9 = vmul.f32 %v2254_v12, %v7333_v6  ;;  %v2261_v1 = vmul.f32 %v2254_v12, %v7334_v4 }
 0x73f   : > { %v2682_v11 = vsel %vm2679_vm5, %v2670_v27, %v2602_v54  ;;  %v2683_v31 = vsel %vm2679_vm5, %v2677_v22, %v2603_v44  ;;  %v2186_v19 = vadd.f32 %v2185_v59, %v2184_v15  ;;  %v2193_v40 = vadd.f32 %v2192_v51, %v2191_v13 }
 0x740   : > { %v2749_v45 = vrot.slane %v2748_v52, 1  ;;  %v2756_v28 = vrot.slane %v2755_v8, 1  ;;  %v2264_v34 = vadd.f32 %v6650_v55, %v2260_v9  ;;  %v2271_v57 = vadd.f32 %v6654_v35, %v2261_v1 }
 0x741   : > { %v2349_v56 = vrot.slane %v6809_v29, 1  ;;  %v2356_v5 = vrot.slane %v6812_v43, 1  ;;  %v2187_v37 = vrot.slane %v2186_v19, 2  ;;  %v2194_v18 = vrot.slane %v2193_v40, 2  ;;  %v2894_v41 = vpop.permute.xlu1 %2893 }
 0x742   : > { %v2750_v10 = vadd.f32 %v2749_v45, %v2748_v52  ;;  %v2757_v33 = vadd.f32 %v2756_v28, %v2755_v8  ;;  %v2265_v20 = vrot.slane %v2264_v34, 4  ;;  %v2272_v61 = vrot.slane %v2271_v57, 4 }
 0x743   : > { %v2188_v46 = vadd.f32 %v2187_v37, %v2186_v19  ;;  %v2195_v3 = vadd.f32 %v2194_v18, %v2193_v40  ;;  %v2900_v63 = vmul.f32 %v2894_v41, %v7335_v16  ;;  %v2901_v26 = vmul.f32 %v2894_v41, %v7336_v39 }
 0x744   : > { %v2762_v55 = vsel %vm2759_vm6, %v2750_v10, %v2682_v11  ;;  %v2763_v35 = vsel %vm2759_vm6, %v2757_v33, %v2683_v31  ;;  %v2266_v30 = vadd.f32 %v2265_v20, %v2264_v34  ;;  %v2273_v47 = vadd.f32 %v2272_v61, %v2271_v57  ;;  %v7340_v33 = vld [vmem:[#allocation86_spill] sm:$0xff] }
 0x745   : > { %v2189_v7 = vrot.slane %v2188_v46, 1  ;;  %v2196_v62 = vrot.slane %v2195_v3, 1  ;;  %v2904_v17 = vadd.f32 %v6714_v50, %v2900_v63  ;;  %v2911_v58 = vadd.f32 %v6718_v60, %v2901_v26  ;;  %v7337_v50 = vld [vmem:[#allocation77_spill] sm:$0xff]  ;;  %v7338_v60 = vld [vmem:[#allocation80_spill] sm:$0xff] }
 0x746   : > { %v2267_v54 = vrot.slane %v2266_v30, 2  ;;  %v2274_v44 = vrot.slane %v2273_v47, 2  ;;  %v2974_v32 = vpop.permute.xlu1 %2973  ;;  %v2842_v0 = vsel %vm2839_vm7, %v6723_v48, %v2762_v55  ;;  %v2843_v49 = vsel %vm2839_vm7, %v6725_v23, %v2763_v35  ;;  %v7341_v63 = vld [vmem:[#allocation81_spill] sm:$0xff] }
 0x747   : > { %v2190_v24 = vadd.f32 %v2189_v7, %v2188_v46  ;;  %v2197_v15 = vadd.f32 %v2196_v62, %v2195_v3  ;;  %v2905_v13 = vrot.slane %v2904_v17, 4  ;;  %v2912_v14 = vrot.slane %v2911_v58, 4  ;;  %v7342_v26 = vld [vmem:[#allocation89_spill] sm:$0xff] }
 0x748   : > { %v2268_v36 = vadd.f32 %v2267_v54, %v2266_v30  ;;  %v2275_v12 = vadd.f32 %v2274_v44, %v2273_v47  ;;  %v2980_v27 = vmul.f32 %v2974_v32, %v7337_v50  ;;  %v2981_v22 = vmul.f32 %v2974_v32, %v7338_v60  ;;  %v7346_v44 = vld [vmem:[#allocation57_spill] sm:$0xff] }
 0x749   : > { %v2200_v59 = vsel %vm2198_vm8, %v2190_v24, %v6789_v42  ;;  %v2906_v51 = vadd.f32 %v2905_v13, %v2904_v17  ;;  %v2913_v48 = vadd.f32 %v2912_v14, %v2911_v58  ;;  %v2201_v23 = vsel %vm2198_vm8, %v2197_v15, %v6794_v2  ;;  %v7343_v17 = vld [vmem:[#allocation55_spill] sm:$0xff]  ;;  %v7344_v58 = vld [vmem:[#allocation64_spill] sm:$0xff]  ;;  %v7347_v32 = vld [vmem:[#allocation65_spill] sm:$0xff] }
 0x74a   : > { %v2269_v52 = vrot.slane %v2268_v36, 1  ;;  %v2276_v8 = vrot.slane %v2275_v12, 1  ;;  %v2984_v6 = vadd.f32 %v6661_v21, %v2980_v27  ;;  %v2991_v9 = vadd.f32 %v6664_v38, %v2981_v22  ;;  %v7348_v13 = vld [vmem:[#allocation61_spill] sm:$0xff] }
 0x74b   : > { %v2907_v4 = vrot.slane %v2906_v51, 2  ;;  %v2914_v1 = vrot.slane %v2913_v48, 2  ;;  %v2350_v40 = vadd.f32 %v2349_v56, %v6809_v29  ;;  %v2357_v2 = vadd.f32 %v2356_v5, %v6812_v43  ;;  %v7339_v5 = vld [vmem:[#allocation85_spill] sm:$0xff] }
 0x74c   : > { %v2270_v11 = vadd.f32 %v2269_v52, %v2268_v36  ;;  %v2277_v42 = vadd.f32 %v2276_v8, %v2275_v12  ;;  %v2985_v31 = vrot.slane %v2984_v6, 4  ;;  %v2992_v19 = vrot.slane %v2991_v9, 4  ;;  %v7350_v36 = vld [vmem:[#allocation62_spill] sm:$0xff]  ;;  %v7351_v12 = vld [vmem:[#allocation92_spill] sm:$0xff] }
 0x74d   : > { %v2908_v45 = vadd.f32 %v2907_v4, %v2906_v51  ;;  %v2915_v28 = vadd.f32 %v2914_v1, %v2913_v48  ;;  %v3176_v54 = vmul.f32 %v7344_v58, %v7343_v17  ;;  %v3177_v24 = vmul.f32 %v7347_v32, %v7346_v44 }
 0x74e   : > { %v2986_v34 = vadd.f32 %v2985_v31, %v2984_v6  ;;  %v2993_v21 = vadd.f32 %v2992_v19, %v2991_v9  ;;  %v2280_v38 = vsel %vm2278_vm9, %v2270_v11, %v2200_v59  ;;  %v2281_v57 = vsel %vm2278_vm9, %v2277_v42, %v2201_v23 }
 0x74f   : > { %v2909_v37 = vrot.slane %v2908_v45, 1  ;;  %v2916_v18 = vrot.slane %v2915_v28, 1  ;;  %v2360_v41 = vsel %vm2358_vm10, %v2350_v40, %v2280_v38  ;;  %v2361_v29 = vsel %vm2358_vm10, %v2357_v2, %v2281_v57 }
 0x750   : > { %v2987_v56 = vrot.slane %v2986_v34, 2  ;;  %v2994_v43 = vrot.slane %v2993_v21, 2  ;;  %v3178_v10 = vadd.f32 %v7339_v5, %v2360_v41  ;;  %v3179_v20 = vadd.f32 %v7340_v33, %v2361_v29 }
 0x751   : > { %v2910_v61 = vadd.f32 %v2909_v37, %v2908_v45  ;;  %v2917_v46 = vadd.f32 %v2916_v18, %v2915_v28  ;;  %v3209_v53 = vmul.f32 %v7351_v12, %v7350_v36 }
 0x752   : > { %v2988_v3 = vadd.f32 %v2987_v56, %v2986_v34  ;;  %v2995_v16 = vadd.f32 %v2994_v43, %v2993_v21  ;;  %v3211_v39 = vmul.f32 %v7341_v63, %v3179_v20  ;;  %v3210_v55 = vmul.f32 %v7342_v26, %v3178_v10 }
 0x753   : > { %v2922_v35 = vsel %vm2919_vm11, %v2910_v61, %v2842_v0  ;;  %v2923_v25 = vsel %vm2919_vm11, %v2917_v46, %v2843_v49  ;;  %v7349_v49 = vld [vmem:[#allocation82_spill] sm:$0xff] }
 0x754   : > { %v2989_v30 = vrot.slane %v2988_v3, 1  ;;  %v2996_v47 = vrot.slane %v2995_v16, 1  ;;  %v3208_v14 = vmul.f32 %v7349_v49, %v7348_v13 }
 0x756   : > { %v2990_v7 = vadd.f32 %v2989_v30, %v2988_v3  ;;  %v2997_v62 = vadd.f32 %v2996_v47, %v2995_v16 }
 0x758   : > { %v3002_v15 = vsel %vm2999_vm12, %v2990_v7, %v2922_v35  ;;  %v3003_v0 = vsel %vm2999_vm12, %v2997_v62, %v2923_v25 }
 0x759   : > { %v3180_v50 = vadd.f32 %v3176_v54, %v3002_v15  ;;  %v3181_v27 = vadd.f32 %v3177_v24, %v3003_v0 }
 0x75b   : > { %v3213_v60 = vmul.f32 %v3209_v53, %v3181_v27  ;;  %v3212_v22 = vmul.f32 %v3208_v14, %v3180_v50 }
 0x75d   : > { %v3215_v59 = vpack.c.bf16 %v3213_v60, %v3211_v39  ;;  %v3214_v51 = vpack.c.bf16 %v3212_v22, %v3210_v55 }
 0x75f   : > { %3376 = vmatprep.mubr.bf16.mxu1 %v3215_v59 }
 0x760   : > { %3377 = vmatmul.mubr.bf16.vlgmr.msra.gmra.mrb[8].mxu1 %v3214_v51 }
 0x761   : > { %4861 = shalt.err (!%p4858_p3)
}
 0x762   : > { %s4862_s4 = scalar_lea.hbm %s6888_s0, 256  ;;  %s4866_s14 = scalar_lea.hbm %s7352_s25, 512 }
 0x763   : > { %p4863_p12 = scmp.ne.s32.totalorder %s6888_s0, %s4862_s4  ;;  %p4867_p13 = scmp.lt.u32.totalorder %s6888_s0, %s7352_s25 }
 0x764   : > { %p4868_p2 = scmp.lt.u32.totalorder %s4866_s14, %s4862_s4  ;;  %p4870_p5 = scmp.lt.u32.totalorder %s4862_s4, %s6888_s0 }
 0x765   : > { %p4864_p0 = pnand %p4863_p12, %p7353_p4 }
 0x766   : > { %p4869_p7 = por %p4868_p2, %p4867_p13 }
 0x767   : > { %p4865_p10 = pneg %p4864_p0 }
 0x768   : > { %p4871_p8 = por %p4870_p5, %p4869_p7 }
 0x76a   : > { %p4872_p9 = pnand %p4871_p8, %p4865_p10 }
 0x76c   : > { %4875 = shalt.err (!%p4872_p9)
}
 0x76d   : > { %s5034_s5 = smov 128   ;;  %s5035_s19 = smov 8  }
 0x76e   : > { %3946 = dma.vmem_to_hbm [thread:$0]  (%p7353_p4), %s6881_s21, 256, %s6888_s0, %s3393_s10, %s5034_s5, %s5034_s5, %s5035_s19  }
 0x76f   : > { %s740_s9 = scalar_lea.vmem [#allocation32], %s5546_s28  ;;  %s7354_s6 = sld [smem:[#allocation125_spill]] }
 0x770   : > { %s3408_s30 = sshll.u32 %s740_s9, 4  ;;  %s3388_s28 = scalar_lea.sflag [#allocation11], %s5543_s18  ;;  %s6918_s30 = int_to_ptr.vmem [resolvable:$true] %s3408_s30 }
 0x771   : > { %s4876_s0 = scalar_lea.vmem %s6918_s30, 256  ;;  %s5036_s10 = smov [#allocation32]  }
 0x772   : > { %p4877_p1 = scmp.ne.s32.totalorder %s6918_s30, %s4876_s0  ;;  %s4880_s7 = sshll.u32 %s5036_s10, 4  ;;  %s4881_s7 = int_to_ptr.vmem [resolvable:$false] %s4880_s7 }
 0x773   : > { %s4882_s14 = scalar_lea.vmem %s4881_s7, 512  ;;  %p4883_p3 = scmp.lt.s32.totalorder %s6918_s30, %s4881_s7 }
 0x774   : > { %p4878_p6 = pnand %p4877_p1, %p7353_p4  ;;  %p4884_p12 = scmp.lt.s32.totalorder %s4882_s14, %s4876_s0 }
 0x775   : > { %s6925_s21 = scalar_lea.hbm %s7354_s6, %s3825_s2 }
 0x776   : > { %p4879_p11 = pneg %p4878_p6  ;;  %p4885_p0 = por %p4884_p12, %p4883_p3 }
 0x778   : > { %p4886_p10 = pnand %p4885_p0, %p4879_p11 }
 0x833   : > { %v3871_v48 = vpop.f32.mrb[8].mxu1 }
 0x834   : > { %v3872_v23 = vpop.f32.mrb[9].mxu1 }
 0x835   : > { %v3873_v52 = vadd.f32 %v3872_v23, %v3871_v48  ;;  %v3874_v8 = vpop.f32.mrb[10].mxu1 }
 0x836   : > { %v3875_v6 = vpop.f32.mrb[11].mxu1 }
 0x837   : > { %3385 = vst [vmem:[%s740_s9] sm:$0xff] %v3873_v52  ;;  %v3876_v9 = vadd.f32 %v3875_v6, %v3874_v8 }
 0x839   : > { %3386 = vst [vmem:[%s740_s9 + $0x8] sm:$0xff] %v3876_v9 }
 0x83a   : > { %4889 = shalt.err (!%p4886_p10)
}
 0x83b   : > { %s4890_s29 = scalar_lea.hbm %s6925_s21, 256  ;;  %s4894_s8 = scalar_lea.hbm %s7354_s6, 512 }
 0x83c   : > { %p4891_p13 = scmp.ne.s32.totalorder %s6925_s21, %s4890_s29  ;;  %p4895_p5 = scmp.lt.u32.totalorder %s6925_s21, %s7354_s6 }
 0x83d   : > { %p4896_p8 = scmp.lt.u32.totalorder %s4894_s8, %s4890_s29  ;;  %p4898_p1 = scmp.lt.u32.totalorder %s4890_s29, %s6925_s21 }
 0x83e   : > { %p4892_p2 = pnand %p4891_p13, %p7353_p4 }
 0x83f   : > { %p4897_p9 = por %p4896_p8, %p4895_p5 }
 0x840   : > { %p4893_p7 = pneg %p4892_p2 }
 0x841   : > { %p4899_p6 = por %p4898_p1, %p4897_p9 }
 0x843   : > { %p4900_p11 = pnand %p4899_p6, %p4893_p7 }
 0x845   : > { %4903 = shalt.err (!%p4900_p11)
}
 0x846   : > { %3945 = dma.vmem_to_hbm [thread:$0]  (%p7353_p4), %s6918_s30, 256, %s6925_s21, %s3388_s28, %s5034_s5, %s5034_s5, %s5035_s19  }
 0x847 PF: > { %s7355_s4 = sld [smem:[#allocation46_spill]]  ;;  %p7356_p3 = scmp.ne.s32.totalorder %s7142_s15, 0 }
 0x848   : > { %p7357_p12 = scmp.ge.s32.totalorder %s4994_s23, 2 }
 0x84a   : > { %p3994_p0 = pnand %p7357_p12, %p7356_p3 }
 0x84d   : > { %s3441_s0 = sand.u32 1, %s7355_s4  }
 0x84e   : > { %s3442_s10 = scalar_lea.sflag [#allocation11], %s3441_s0 }
 0x84f   : > { %4965 = dma.done.wait (!%p3994_p0), %s3442_s10, 256  }
 0x850   : > { %4967 = vsyncadd (!%p3994_p0), %s3442_s10, 4294967040  ;;  %s3451_s26 = scalar_lea.sflag [#allocation34], %s3441_s0 }
 0x851   : > { %4969 = dma.done.wait (!%p3994_p0), %s3451_s26, 256  }
 0x852   : > { %4971 = vsyncadd (!%p3994_p0), %s3451_s26, 4294967040  ;;  %s44_s23 = sadd.s32 1, %s4994_s23   ;;  %s7358_s18 = sld [smem:[#allocation47_spill]] }
 0x853   : > { %p41_p10 = scmp.ge.s32.totalorder %s44_s23, 4   ;;  %s7359_s19 = smov %s4982_s20 }
 0x854   : > { %s7360_s20 = smov %s5446_s24  ;;  %s7361_s21 = smov %s4990_s22 }
 0x855   : > { %s7362_s22 = smov %s7364_s27  ;;  %43 = sbr.rel (!%p41_p10) target bundleno = 30 (0x1e), region = 209 }
 0x85c   :  { %3456 = vsyncpa [#allocation10], 1 }
 0x85d   :  { %3458 = vsyncpa [#allocation10 + $0x1], 1 }
 0x85e   :  { %3459 = vsyncpa [#allocation13], 1 }
 0x85f   :  { %3461 = vsyncpa [#allocation13 + $0x1], 1 }
 0x860   :  { %3462 = vsyncpa [#allocation16], 1 }
 0x861   :  { %3463 = vsyncpa [#allocation19], 1 }
 0x862   :  { %3464 = vsyncpa [#allocation22], 1 }
 0x863   :  { %3465 = vsyncpa [#allocation25], 1 }
 0x864   :  { %3466 = vsyncpa [#allocation28], 1 }
 0x865   :  { %3467 = vsyncpa [#allocation31], 1 }
 0x866   :  { %3468 = vsyncpa [#allocation11], 1 }
 0x867   :  { %3470 = vsyncpa [#allocation11 + $0x1], 1 }
 0x868   :  { %3471 = vsyncpa [#allocation34], 1 }
 0x869   :  { %3473 = vsyncpa [#allocation34 + $0x1], 1 }

</bundles_post_ra>
